<compile_context>
chip_gen: v7x
topology: tpu7x:2x2x1
jax: 0.10.0
libtpu: 0.0.40
codegen_flags: <defaults>
</compile_context>

<pallas_src>
import functools

import jax
import jax.numpy as jnp
from jax.experimental import pallas as pl
from jax.experimental.pallas import tpu as pltpu

_MIB = 1024 * 1024


def _round_up(a, b):
    return (a + b - 1) // b * b


def _chip_config():
    """Best-effort per-generation tuning knobs from the default device.

    Only affects tile sizing / elementwise dtype, never kernel semantics, so
    the generic fallback is always safe.
    """
    kind = (getattr(jax.devices()[0], "device_kind", "") or "").lower()
    if "v7" in kind or "7x" in kind:
        # 64 MiB VMEM per TensorCore, 2 TCs (megacore): stay well below the
        # physical limit so Mosaic internal scratch has headroom, and budget
        # the resident weights per core.
        return dict(vmem_ceiling=48 * _MIB, num_tc=2, bf16_elementwise=True)
    if "v6" in kind:
        # 128 MiB physical VMEM, 1 TensorCore, bf16 VPU/EUP available.
        return dict(vmem_ceiling=100 * _MIB, num_tc=1, bf16_elementwise=True)
    if "v5" in kind and ("lite" in kind or "5e" in kind):
        # v5e: 128 MiB physical VMEM, 1 TensorCore, no bf16 VPU/EUP -> keep
        # elementwise math in f32 there.
        return dict(vmem_ceiling=100 * _MIB, num_tc=1, bf16_elementwise=False)
    # Unknown / older generations: conservative budget, single core, f32.
    return dict(vmem_ceiling=48 * _MIB, num_tc=1, bf16_elementwise=False)


def _hidden_dtype(cfg):
    return jnp.bfloat16 if cfg["bf16_elementwise"] else jnp.float32


def _residual_ffn_kernel(x_ref, w1_ref, b1_ref, w2_ref, b2_ref, o_ref, *,
                         approximate_gelu, hidden_dtype):
    # x_ref : (Rt, D)  row tile of the residual input (pipelined, 2 buffers)
    # w1_ref: (D, H)   bf16, whole array resident in VMEM (single buffer)
    # b1_ref: (1, H)   f32,  resident
    # w2_ref: (H, D)   bf16, resident
    # b2_ref: (1, D)   f32,  resident
    x = x_ref[...]

    # fn(x): Linear -> GELU -> Linear.  bf16 operands on the MXU, f32 accum.
    h = jnp.dot(x.astype(jnp.bfloat16), w1_ref[...],
                preferred_element_type=jnp.float32)
    h = (h + b1_ref[...]).astype(hidden_dtype)        # bias add in f32 (VPU)
    h = jax.nn.gelu(h, approximate=approximate_gelu)  # tanh GELU -> EUP
    y = jnp.dot(h.astype(jnp.bfloat16), w2_ref[...],
                preferred_element_type=jnp.float32)
    y = y + b2_ref[...]

    # Residual.forward: fn(x) + x, residual add in f32, store in input dtype.
    o_ref[...] = (y + x.astype(jnp.float32)).astype(o_ref.dtype)


def residual_ffn(x, w1, b1, w2, b2, *, row_tile=1024, approximate_gelu=True):
    """Residual(FeedForward)(x) = FFN(x) + x, fused in one Pallas kernel.

    x : (B, S, D);  w1: (D, H), b1: (H,), w2: (H, D), b2: (D,)
    `row_tile` is a *maximum*; the actual tile is sized from the per-chip VMEM
    budget and the row count.
    """
    B, S, D = x.shape
    H = w1.shape[1]
    R = B * S

    cfg = _chip_config()
    hidden_dtype = _hidden_dtype(cfg)

    # ---- size the row tile from the VMEM budget ----------------------------
    bytes_x = x.dtype.itemsize
    bytes_h = jnp.dtype(hidden_dtype).itemsize
    weight_bytes = (D * H + H * D) * 2 + (H + D) * 4   # single-buffered bf16 + f32 biases
    per_row = (2 * D * bytes_x       # x row tile, double-buffered
               + 2 * D * bytes_x     # out row tile, double-buffered
               + H * 4               # first matmul f32 accumulator
               + H * bytes_h         # GELU hidden activation
               + (D + H) * 2         # bf16 operand copies feeding the MXU
               + D * 4)              # second matmul f32 accumulator / residual
    usable = int(cfg["vmem_ceiling"] * 0.8) - weight_bytes
    fit_rows = max(8, usable // per_row) if usable > 0 else 8

    # Never make the tile bigger than the problem; only force a split when the
    # chip actually has 2 TensorCores to shard the "parallel" row axis.
    cap = _round_up(R, 8)
    if cfg["num_tc"] >= 2 and R >= 16:
        cap = min(cap, _round_up(pl.cdiv(R, cfg["num_tc"]), 8))

    rt = max(8, min(int(row_tile), int(fit_rows), cap))
    rt -= rt % 8
    rt = max(8, rt)
    n_row_tiles = pl.cdiv(R, rt)          # ragged last tile handled by masking

    need = weight_bytes + rt * per_row
    vmem_limit = int(min(cfg["vmem_ceiling"], max(32 * _MIB, int(1.5 * need))))

    # ---- operands -----------------------------------------------------------
    x2 = x.reshape(R, D)                          # metadata-only reshape
    w1_b = w1.astype(jnp.bfloat16)                # cast ONCE, not per tile
    w2_b = w2.astype(jnp.bfloat16)
    b1_2 = b1.reshape(1, H).astype(jnp.float32)
    b2_2 = b2.reshape(1, D).astype(jnp.float32)

    kernel = functools.partial(_residual_ffn_kernel,
                               approximate_gelu=approximate_gelu,
                               hidden_dtype=hidden_dtype)

    # Whole-array VMEM residency -> guaranteed single buffer for the weights.
    resident = lambda: pl.BlockSpec(memory_space=pltpu.MemorySpace.VMEM)

    out2 = pl.pallas_call(
        kernel,
        out_shape=jax.ShapeDtypeStruct((R, D), x.dtype),
        grid=(n_row_tiles,),
        in_specs=[
            pl.BlockSpec((rt, D), lambda i: (i, 0)),   # x rows (pipelined)
            resident(),                                # w1
            resident(),                                # b1
            resident(),                                # w2
            resident(),                                # b2
        ],
        out_specs=pl.BlockSpec((rt, D), lambda i: (i, 0)),
        compiler_params=pltpu.CompilerParams(
            dimension_semantics=("parallel",),
            vmem_limit_bytes=vmem_limit),
    )(x2, w1_b, b1_2, w2_b, b2_2)

    return out2.reshape(B, S, D)


# ---------------------------- references -------------------------------------
def _reference_f32(x, w1, b1, w2, b2, *, approximate=True):
    h = jax.nn.gelu(jnp.einsum("bsd,dh->bsh", x, w1) + b1,
                    approximate=approximate)
    y = jnp.einsum("bsh,hd->bsd", h, w2) + b2
    return y + x


def _reference_matched(x, w1, b1, w2, b2, *, approximate=True,
                       hidden_dtype=jnp.float32):
    # Mirrors the kernel math: bf16 matmul operands, f32 accumulation, GELU in
    # `hidden_dtype`, residual add in f32, output in x.dtype.
    xb = x.astype(jnp.bfloat16)
    h = jnp.einsum("bsd,dh->bsh", xb, w1.astype(jnp.bfloat16),
                   preferred_element_type=jnp.float32) + b1
    h = jax.nn.gelu(h.astype(hidden_dtype), approximate=approximate)
    y = jnp.einsum("bsh,hd->bsd", h.astype(jnp.bfloat16),
                   w2.astype(jnp.bfloat16),
                   preferred_element_type=jnp.float32) + b2
    return (y + x.astype(jnp.float32)).astype(x.dtype)


if __name__ == "__main__":
    # Small, lane-dense demo shapes.  D/H are multiples of 256 so the MXU tile
    # is fully used on v6e/v7x; S=99 makes R = 198 (not a multiple of 8), so
    # the ragged-last-tile masked writeback path is exercised.
    B, S, D, H = 2, 99, 256, 512

    key = jax.random.PRNGKey(0)
    kx, k1, k2, k3, k4 = jax.random.split(key, 5)

    x = jax.random.normal(kx, (B, S, D), dtype=jnp.float32)
    # Deterministic synthetic parameters (shapes per nn.Linear(D,H)/Linear(H,D)).
    w1 = jax.random.normal(k1, (D, H), dtype=jnp.float32) * 0.05
    b1 = jax.random.normal(k2, (H,), dtype=jnp.float32) * 0.05
    w2 = jax.random.normal(k3, (H, D), dtype=jnp.float32) * 0.05
    b2 = jax.random.normal(k4, (D,), dtype=jnp.float32) * 0.05

    # Default call: one (or per-TC) large ragged row tile.
    out = jax.block_until_ready(residual_ffn(x, w1, b1, w2, b2))
    assert out.shape == x.shape and out.dtype == x.dtype

    hdt = _hidden_dtype(_chip_config())
    ref_m = _reference_matched(x, w1, b1, w2, b2, approximate=True,
                               hidden_dtype=hdt)
    ref_f = _reference_f32(x, w1, b1, w2, b2, approximate=True)

    assert jnp.allclose(out, ref_m, atol=5e-3, rtol=5e-3), \
        "mismatch vs precision-matched reference"
    assert jnp.allclose(out, ref_f, atol=3e-2, rtol=3e-2), \
        "mismatch vs f32 reference"

    # Second call with a small explicit tile: exercises the multi-step grid
    # plus the masked ragged last tile (198 rows over 64-row tiles).
    out_small = jax.block_until_ready(
        residual_ffn(x, w1, b1, w2, b2, row_tile=64))
    assert jnp.allclose(out_small, ref_m, atol=5e-3, rtol=5e-3), \
        "mismatch on multi-tile / ragged path"

    print("KERNEL_OK")
</pallas_src>

<mosaic_0001>
module attributes {stable_mosaic.version = 11 : i64} {
  func.func @_residual_ffn_kernel(%arg0: i32, %arg1: memref<200x256xf32, #tpu.memory_space<vmem>>, %arg2: memref<256x512xbf16, #tpu.memory_space<vmem>>, %arg3: memref<1x512xf32, #tpu.memory_space<vmem>>, %arg4: memref<512x256xbf16, #tpu.memory_space<vmem>>, %arg5: memref<1x256xf32, #tpu.memory_space<vmem>>, %arg6: memref<200x256xf32, #tpu.memory_space<vmem>>) attributes {dimension_semantics = [#tpu.dimension_semantics<parallel>], iteration_bounds = array<i64: 1>, scalar_prefetch = 0 : i64, scratch_operands = 0 : i64, tpu.core_type = #tpu.core_type<tc>, window_params = [{transform_indices = @transform_0, window_bounds = array<i64: 200, 256>}, {pipeline_mode = #tpu.pipeline_mode<synchronous>, transform_indices = @transform_1, window_bounds = array<i64: 256, 512>}, {pipeline_mode = #tpu.pipeline_mode<synchronous>, transform_indices = @transform_2, window_bounds = array<i64: 1, 512>}, {pipeline_mode = #tpu.pipeline_mode<synchronous>, transform_indices = @transform_3, window_bounds = array<i64: 512, 256>}, {pipeline_mode = #tpu.pipeline_mode<synchronous>, transform_indices = @transform_4, window_bounds = array<i64: 1, 256>}, {transform_indices = @transform_5, window_bounds = array<i64: 200, 256>}]} {
    %c0 = arith.constant 0 : index
    %c0_0 = arith.constant 0 : index
    %0 = vector.load %arg1[%c0, %c0_0] : memref<200x256xf32, #tpu.memory_space<vmem>>, vector<200x256xf32>
    %1 = arith.truncf %0 : vector<200x256xf32> to vector<200x256xbf16>
    %c0_1 = arith.constant 0 : index
    %c0_2 = arith.constant 0 : index
    %2 = vector.load %arg2[%c0_1, %c0_2] : memref<256x512xbf16, #tpu.memory_space<vmem>>, vector<256x512xbf16>
    %cst = arith.constant dense<0.000000e+00> : vector<200x512xf32>
    %3 = tpu.matmul %1, %2, %cst {dimension_numbers = #tpu.dot_dimension_numbers<[1], [0], [0], [1], [0, 0, 1, 1], [], []>} : vector<200x256xbf16>, vector<256x512xbf16>, vector<200x512xf32> -> vector<200x512xf32>
    %c0_3 = arith.constant 0 : index
    %c0_4 = arith.constant 0 : index
    %4 = vector.load %arg3[%c0_3, %c0_4] : memref<1x512xf32, #tpu.memory_space<vmem>>, vector<1x512xf32>
    %5 = vector.broadcast %4 : vector<1x512xf32> to vector<200x512xf32>
    %6 = arith.addf %3, %5 : vector<200x512xf32>
    %7 = arith.mulf %6, %6 : vector<200x512xf32>
    %8 = arith.mulf %6, %7 : vector<200x512xf32>
    %cst_5 = arith.constant 4.471500e-02 : f32
    %9 = vector.broadcast %cst_5 : f32 to vector<200x512xf32>
    %10 = arith.mulf %9, %8 : vector<200x512xf32>
    %11 = arith.addf %6, %10 : vector<200x512xf32>
    %cst_6 = arith.constant 0.797884583 : f32
    %12 = vector.broadcast %cst_6 : f32 to vector<200x512xf32>
    %13 = arith.mulf %12, %11 : vector<200x512xf32>
    %14 = math.tanh %13 : vector<200x512xf32>
    %cst_7 = arith.constant 1.000000e+00 : f32
    %15 = vector.broadcast %cst_7 : f32 to vector<200x512xf32>
    %16 = arith.addf %15, %14 : vector<200x512xf32>
    %cst_8 = arith.constant 5.000000e-01 : f32
    %17 = vector.broadcast %cst_8 : f32 to vector<200x512xf32>
    %18 = arith.mulf %17, %16 : vector<200x512xf32>
    %19 = arith.mulf %6, %18 : vector<200x512xf32>
    %20 = arith.truncf %19 : vector<200x512xf32> to vector<200x512xbf16>
    %c0_9 = arith.constant 0 : index
    %c0_10 = arith.constant 0 : index
    %21 = vector.load %arg4[%c0_9, %c0_10] : memref<512x256xbf16, #tpu.memory_space<vmem>>, vector<512x256xbf16>
    %cst_11 = arith.constant dense<0.000000e+00> : vector<200x256xf32>
    %22 = tpu.matmul %20, %21, %cst_11 {dimension_numbers = #tpu.dot_dimension_numbers<[1], [0], [0], [1], [0, 0, 1, 1], [], []>} : vector<200x512xbf16>, vector<512x256xbf16>, vector<200x256xf32> -> vector<200x256xf32>
    %c0_12 = arith.constant 0 : index
    %c0_13 = arith.constant 0 : index
    %23 = vector.load %arg5[%c0_12, %c0_13] : memref<1x256xf32, #tpu.memory_space<vmem>>, vector<1x256xf32>
    %24 = vector.broadcast %23 : vector<1x256xf32> to vector<200x256xf32>
    %25 = arith.addf %22, %24 : vector<200x256xf32>
    %26 = arith.addf %25, %0 : vector<200x256xf32>
    %c0_14 = arith.constant 0 : index
    %c0_15 = arith.constant 0 : index
    %27 = vector.load %arg6[%c0_14, %c0_15] : memref<200x256xf32, #tpu.memory_space<vmem>>, vector<200x256xf32>
    tpu.vector_store %arg6[%c0_14, %c0_15], %26 {strides = array<i32>} : memref<200x256xf32, #tpu.memory_space<vmem>>, vector<200x256xf32>,
    return
  }
  func.func @transform_0(%arg0: i32) -> (i32, i32) {
    %c0_i32 = arith.constant 0 : i32
    %c0_i32_0 = arith.constant 0 : i32
    return %arg0, %c0_i32 : i32, i32
  }
  func.func @transform_1(%arg0: i32) -> (i32, i32) {
    %c0_i32 = arith.constant 0 : i32
    %c0_i32_0 = arith.constant 0 : i32
    %c0_i32_1 = arith.constant 0 : i32
    return %c0_i32, %c0_i32_0 : i32, i32
  }
  func.func @transform_2(%arg0: i32) -> (i32, i32) {
    %c0_i32 = arith.constant 0 : i32
    %c0_i32_0 = arith.constant 0 : i32
    %c0_i32_1 = arith.constant 0 : i32
    return %c0_i32, %c0_i32_0 : i32, i32
  }
  func.func @transform_3(%arg0: i32) -> (i32, i32) {
    %c0_i32 = arith.constant 0 : i32
    %c0_i32_0 = arith.constant 0 : i32
    %c0_i32_1 = arith.constant 0 : i32
    return %c0_i32, %c0_i32_0 : i32, i32
  }
  func.func @transform_4(%arg0: i32) -> (i32, i32) {
    %c0_i32 = arith.constant 0 : i32
    %c0_i32_0 = arith.constant 0 : i32
    %c0_i32_1 = arith.constant 0 : i32
    return %c0_i32, %c0_i32_0 : i32, i32
  }
  func.func @transform_5(%arg0: i32) -> (i32, i32) {
    %c0_i32 = arith.constant 0 : i32
    %c0_i32_0 = arith.constant 0 : i32
    return %arg0, %c0_i32 : i32, i32
  }
}

</mosaic_0001>

<bundles_post_ra>
// kernel: tpu_custom_call.1
= control target key start
LH: loop header
LB: loop body
LE: loop exit
PB: predicated region body
PF: predicated region fallthrough
CT: control target
= control target key end

     0   :  { %10 = vsyncpa [#allocation3], 0  ;;  %s4980_s0 = inlined_call_operand.hbm [shape: f32[198,256], index: 0, kind: input, shape index: {}]   ;;  %s4981_s1 = inlined_call_operand.hbm [shape: bf16[256,512], index: 1, kind: input, shape index: {}]   ;;  %s4982_s2 = inlined_call_operand.vmem [shape: f32[1,512], index: 2, kind: input, shape index: {}]   ;;  %s4983_s3 = inlined_call_operand.hbm [shape: bf16[512,256], index: 3, kind: input, shape index: {}]   ;;  %s4984_s4 = inlined_call_operand.vmem [shape: f32[1,256], index: 4, kind: input, shape index: {}]   ;;  %s4985_s5 = inlined_call_operand.hbm [shape: f32[198,256], index: 5, kind: output, shape index: {}]  }
   0x1   :  { %11 = vsyncpa [#allocation6], 0 }
   0x2   :  { %12 = vsyncpa [#allocation4], 0  ;;  %s3422_s18 = smov [#allocation5]   ;;  %s3423_s20 = smov [#allocation2]  }
   0x3   :  { %s30_s19 = sshll.u32 %s3422_s18, 4  ;;  %s18_s21 = sshll.u32 %s3423_s20, 4  ;;  %s31_s19 = int_to_ptr.vmem [resolvable:$true] %s30_s19  ;;  %s3460_s21 = int_to_ptr.vmem [resolvable:$true] %s18_s21 }
   0x4   :  { %s3328_s24 = scalar_lea.hbm %s4981_s1, 8192 }
   0x5   :  { %p3329_p0 = scmp.ne.s32.totalorder %s4981_s1, %s3328_s24  ;;  %p3332_p1 = scmp.lt.u32.totalorder %s3328_s24, %s4981_s1 }
   0x7   :  { %p3334_p2 = pnand %p3332_p1, %p3329_p0 }
   0x9   :  { %3337 = shalt.err (!%p3334_p2)
}
   0xa   :  { %s3338_s29 = scalar_lea.vmem %s31_s19, 8192  ;;  %p3343_p4 = scmp.lt.s32.totalorder %s31_s19, %s31_s19 }
   0xb   :  { %p3339_p3 = scmp.ne.s32.totalorder %s31_s19, %s3338_s29  ;;  %p3344_p5 = scmp.lt.s32.totalorder %s3338_s29, %s3338_s29 }
   0xd   :  { %p3345_p6 = por %p3344_p5, %p3343_p4 }
   0xf   :  { %p3346_p7 = pnand %p3345_p6, %p3339_p3 }
  0x11   :  { %3349 = shalt.err (!%p3346_p7)
}
  0x12   :  { %s3424_s30 = smov 256   ;;  %s3425_s6 = smov 16  }
  0x13   :  { %36 = dma.hbm_to_vmem [thread:$0]  %s4981_s1, 8192, %s31_s19, [#allocation6], %s3424_s30, %s3424_s30, %s3425_s6  }
  0x14   :  { %s3350_s11 = scalar_lea.hbm %s4980_s0, 6400 }
  0x15   :  { %p3351_p8 = scmp.ne.s32.totalorder %s4980_s0, %s3350_s11  ;;  %p3354_p9 = scmp.lt.u32.totalorder %s3350_s11, %s4980_s0 }
  0x17   :  { %p3356_p10 = pnand %p3354_p9, %p3351_p8 }
  0x19   :  { %3359 = shalt.err (!%p3356_p10)
}
  0x1a   :  { %s3360_s16 = scalar_lea.vmem %s3460_s21, 6400  ;;  %p3365_p12 = scmp.lt.s32.totalorder %s3460_s21, %s3460_s21 }
  0x1b   :  { %p3361_p11 = scmp.ne.s32.totalorder %s3460_s21, %s3360_s16  ;;  %p3366_p13 = scmp.lt.s32.totalorder %s3360_s16, %s3360_s16 }
  0x1d   :  { %p3367_p0 = por %p3366_p13, %p3365_p12 }
  0x1f   :  { %p3368_p1 = pnand %p3367_p0, %p3361_p11 }
  0x21   :  { %3371 = shalt.err (!%p3368_p1)
}
  0x22   :  { %24 = dma.hbm_to_vmem [thread:$0]  %s4980_s0, 6400, %s3460_s21, [#allocation3], %s3424_s30, %s3424_s30, %s3425_s6  }
  0x23   :  { %s3426_s18 = smov [#allocation7]   ;;  %s3372_s23 = scalar_lea.hbm %s4983_s3, 8192 }
  0x24   :  { %s44_s19 = sshll.u32 %s3426_s18, 4  ;;  %p3373_p2 = scmp.ne.s32.totalorder %s4983_s3, %s3372_s23  ;;  %s45_s19 = int_to_ptr.vmem [resolvable:$true] %s44_s19 }
  0x25   :  { %p3376_p3 = scmp.lt.u32.totalorder %s3372_s23, %s4983_s3 }
  0x27   :  { %p3378_p4 = pnand %p3376_p3, %p3373_p2 }
  0x29   :  { %3381 = shalt.err (!%p3378_p4)
}
  0x2a   :  { %s3382_s28 = scalar_lea.vmem %s45_s19, 8192  ;;  %p3387_p6 = scmp.lt.s32.totalorder %s45_s19, %s45_s19 }
  0x2b   :  { %p3383_p5 = scmp.ne.s32.totalorder %s45_s19, %s3382_s28  ;;  %p3388_p7 = scmp.lt.s32.totalorder %s3382_s28, %s3382_s28 }
  0x2d   :  { %p3389_p8 = por %p3388_p7, %p3387_p6 }
  0x2f   :  { %p3390_p9 = pnand %p3389_p8, %p3383_p5 }
  0x31   :  { %3393 = shalt.err (!%p3390_p9)
}
  0x32   :  { %s3427_s0 = smov 128   ;;  %s3428_s21 = smov 8  }
  0x33   :  { %50 = dma.hbm_to_vmem [thread:$0]  %s4983_s3, 8192, %s45_s19, [#allocation6], %s3427_s0, %s3427_s0, %s3428_s21  }
  0x34   :  { %3416 = dma.done.wait [#allocation3], 6400  }
  0x35   :  { %3417 = vsyncadd [#allocation3], 4294960896 }
  0x36   :  { %3418 = dma.done.wait [#allocation6], 16384  }
  0x37   :  { %3419 = vsyncadd [#allocation6], 4294950912  ;;  %v2886_v0 = vld [vmem:[#allocation5 + $0x4] ss:$16 sps:$4 sm:$0xff]   ;;  %v2888_v1 = vld [vmem:[#allocation5] ss:$16 sps:$4 sm:$0xff]  }
  0x38   :  { %544 = vmatprep.subr.bf16.mxu1 %v2886_v0  ;;  %v2889_v2 = vld [vmem:[#allocation5 + $0x24] ss:$16 sps:$4 sm:$0xff]   ;;  %v2891_v3 = vld [vmem:[#allocation5 + $0x20] ss:$16 sps:$4 sm:$0xff]   ;;  %v63_v13 = vld [vmem:[#allocation2 + $0x8] sm:$0xff] }
  0x39   :  { %545 = vmatpush1.bf16.msra.mxu1 %v2888_v1  ;;  %v2892_v4 = vld [vmem:[#allocation5 + $0x44] ss:$16 sps:$4 sm:$0xff]   ;;  %v2894_v5 = vld [vmem:[#allocation5 + $0x40] ss:$16 sps:$4 sm:$0xff]   ;;  %v65_v14 = vld [vmem:[#allocation2 + $0x18] sm:$0xff] }
  0x3a   :  { %546 = vmatprep.subr.bf16.mxu1 %v2889_v2  ;;  %v2895_v6 = vld [vmem:[#allocation5 + $0x64] ss:$16 sps:$4 sm:$0xff]   ;;  %v2897_v7 = vld [vmem:[#allocation5 + $0x60] ss:$16 sps:$4 sm:$0xff]   ;;  %v3509_v15 = vpack.c.bf16 %v65_v14, %v63_v13  ;;  %v2936_v37 = vld [vmem:[#allocation5 + $0xc] ss:$16 sps:$4 sm:$0xff]  }
  0x3b   :  { %v2898_v8 = vld [vmem:[#allocation5 + $0x84] ss:$16 sps:$4 sm:$0xff]   ;;  %v2900_v9 = vld [vmem:[#allocation5 + $0x80] ss:$16 sps:$4 sm:$0xff]   ;;  %v67_v38 = vld [vmem:[#allocation2 + $0x28] sm:$0xff] }
  0x3c   :  { %v2901_v10 = vld [vmem:[#allocation5 + $0xa4] ss:$16 sps:$4 sm:$0xff]   ;;  %v2903_v11 = vld [vmem:[#allocation5 + $0xa0] ss:$16 sps:$4 sm:$0xff]   ;;  %576 = vmatprep.mubr.bf16.mxu1 %v3509_v15  ;;  %v69_v39 = vld [vmem:[#allocation2 + $0x38] sm:$0xff] }
  0x3d   :  { %547 = vmatpush1.bf16.msra.mxu1 %v2891_v3  ;;  %v2904_v12 = vld [vmem:[#allocation5 + $0xc4] ss:$16 sps:$4 sm:$0xff]   ;;  %v2906_v16 = vld [vmem:[#allocation5 + $0xc0] ss:$16 sps:$4 sm:$0xff]   ;;  %v2934_v40 = vld [vmem:[#allocation5 + $0x8] ss:$16 sps:$4 sm:$0xff]   ;;  %v3514_v43 = vpack.c.bf16 %v69_v39, %v67_v38 }
  0x3e   :  { %548 = vmatprep.subr.bf16.mxu1 %v2892_v4  ;;  %v2907_v17 = vld [vmem:[#allocation5 + $0xe4] ss:$16 sps:$4 sm:$0xff]   ;;  %v2909_v18 = vld [vmem:[#allocation5 + $0xe0] ss:$16 sps:$4 sm:$0xff]   ;;  %v2939_v42 = vld [vmem:[#allocation5 + $0x2c] ss:$16 sps:$4 sm:$0xff]  }
  0x3f   :  { %v2910_v19 = vld [vmem:[#allocation5 + $0x104] ss:$16 sps:$4 sm:$0xff]   ;;  %v2912_v20 = vld [vmem:[#allocation5 + $0x100] ss:$16 sps:$4 sm:$0xff]   ;;  %v2937_v44 = vld [vmem:[#allocation5 + $0x28] ss:$16 sps:$4 sm:$0xff]  }
  0x40   :  { %v2913_v21 = vld [vmem:[#allocation5 + $0x124] ss:$16 sps:$4 sm:$0xff]   ;;  %v2915_v22 = vld [vmem:[#allocation5 + $0x120] ss:$16 sps:$4 sm:$0xff]   ;;  %v2942_v47 = vld [vmem:[#allocation5 + $0x4c] ss:$16 sps:$4 sm:$0xff]  }
  0x41   :  { %549 = vmatpush1.bf16.msra.mxu1 %v2894_v5  ;;  %v2916_v23 = vld [vmem:[#allocation5 + $0x144] ss:$16 sps:$4 sm:$0xff]   ;;  %v2918_v24 = vld [vmem:[#allocation5 + $0x140] ss:$16 sps:$4 sm:$0xff]   ;;  %v71_v48 = vld [vmem:[#allocation2 + $0x48] sm:$0xff] }
  0x42   :  { %550 = vmatprep.subr.bf16.mxu1 %v2895_v6  ;;  %v2919_v25 = vld [vmem:[#allocation5 + $0x164] ss:$16 sps:$4 sm:$0xff]   ;;  %v2921_v26 = vld [vmem:[#allocation5 + $0x160] ss:$16 sps:$4 sm:$0xff]   ;;  %v73_v49 = vld [vmem:[#allocation2 + $0x58] sm:$0xff] }
  0x43   :  { %v2922_v27 = vld [vmem:[#allocation5 + $0x184] ss:$16 sps:$4 sm:$0xff]   ;;  %v2924_v28 = vld [vmem:[#allocation5 + $0x180] ss:$16 sps:$4 sm:$0xff]   ;;  %v2940_v50 = vld [vmem:[#allocation5 + $0x48] ss:$16 sps:$4 sm:$0xff]   ;;  %v3520_v53 = vpack.c.bf16 %v73_v49, %v71_v48 }
  0x44   :  { %v2925_v29 = vld [vmem:[#allocation5 + $0x1a4] ss:$16 sps:$4 sm:$0xff]   ;;  %v2927_v30 = vld [vmem:[#allocation5 + $0x1a0] ss:$16 sps:$4 sm:$0xff]   ;;  %v2945_v52 = vld [vmem:[#allocation5 + $0x6c] ss:$16 sps:$4 sm:$0xff]  }
  0x45   :  { %551 = vmatpush1.bf16.msra.mxu1 %v2897_v7  ;;  %v2928_v31 = vld [vmem:[#allocation5 + $0x1c4] ss:$16 sps:$4 sm:$0xff]   ;;  %v2930_v32 = vld [vmem:[#allocation5 + $0x1c0] ss:$16 sps:$4 sm:$0xff]   ;;  %v2943_v56 = vld [vmem:[#allocation5 + $0x68] ss:$16 sps:$4 sm:$0xff]  }
  0x46   :  { %552 = vmatprep.subr.bf16.mxu1 %v2898_v8  ;;  %v2931_v33 = vld [vmem:[#allocation5 + $0x1e4] ss:$16 sps:$4 sm:$0xff]   ;;  %v2933_v34 = vld [vmem:[#allocation5 + $0x1e0] ss:$16 sps:$4 sm:$0xff]   ;;  %v75_v57 = vld [vmem:[#allocation2 + $0x68] sm:$0xff] }
  0x47   :  { %v62_v35 = vld [vmem:[#allocation2] sm:$0xff]  ;;  %v64_v36 = vld [vmem:[#allocation2 + $0x10] sm:$0xff]  ;;  %v77_v58 = vld [vmem:[#allocation2 + $0x78] sm:$0xff] }
  0x48   :  { %v3512_v41 = vpack.c.bf16 %v64_v36, %v62_v35  ;;  %v66_v45 = vld [vmem:[#allocation2 + $0x20] sm:$0xff]  ;;  %v68_v46 = vld [vmem:[#allocation2 + $0x30] sm:$0xff]  ;;  %v2948_v59 = vld [vmem:[#allocation5 + $0x8c] ss:$16 sps:$4 sm:$0xff]   ;;  %v3526_v62 = vpack.c.bf16 %v77_v58, %v75_v57 }
  0x49   :  { %553 = vmatpush1.bf16.msra.mxu1 %v2900_v9  ;;  %v3518_v51 = vpack.c.bf16 %v68_v46, %v66_v45  ;;  %v70_v54 = vld [vmem:[#allocation2 + $0x40] sm:$0xff]  ;;  %v72_v55 = vld [vmem:[#allocation2 + $0x50] sm:$0xff]  ;;  %v2946_v60 = vld [vmem:[#allocation5 + $0x88] ss:$16 sps:$4 sm:$0xff]  }
  0x4a   :  { %554 = vmatprep.subr.bf16.mxu1 %v2901_v10  ;;  %v3524_v61 = vpack.c.bf16 %v72_v55, %v70_v54  ;;  %v2951_v63 = vld [vmem:[#allocation5 + $0xac] ss:$16 sps:$4 sm:$0xff]   ;;  %v74_v0 = vld [vmem:[#allocation2 + $0x60] sm:$0xff]  ;;  %v76_v1 = vld [vmem:[#allocation2 + $0x70] sm:$0xff] }
  0x4b   :  { %v2949_v2 = vld [vmem:[#allocation5 + $0xa8] ss:$16 sps:$4 sm:$0xff]   ;;  %v2954_v5 = vld [vmem:[#allocation5 + $0xcc] ss:$16 sps:$4 sm:$0xff]   ;;  %v3530_v6 = vpack.c.bf16 %v76_v1, %v74_v0  ;;  %v78_v10 = vld [vmem:[#allocation2 + $0x80] sm:$0xff] }
  0x4c   :  { %v79_v3 = vld [vmem:[#allocation2 + $0x88] sm:$0xff]  ;;  %v81_v4 = vld [vmem:[#allocation2 + $0x98] sm:$0xff]  ;;  %v94_v57 = vld [vmem:[#allocation2 + $0x100] sm:$0xff] }
  0x4d   :  { %555 = vmatpush1.bf16.msra.mxu1 %v2903_v11  ;;  %v3532_v7 = vpack.c.bf16 %v81_v4, %v79_v3  ;;  %v2952_v8 = vld [vmem:[#allocation5 + $0xc8] ss:$16 sps:$4 sm:$0xff]   ;;  %v2957_v9 = vld [vmem:[#allocation5 + $0xec] ss:$16 sps:$4 sm:$0xff]   ;;  %v80_v11 = vld [vmem:[#allocation2 + $0x90] sm:$0xff] }
  0x4e   :  { %556 = vmatprep.subr.bf16.mxu1 %v2904_v12  ;;  %v2955_v12 = vld [vmem:[#allocation5 + $0xe8] ss:$16 sps:$4 sm:$0xff]   ;;  %v2972_v36 = vld [vmem:[#allocation5 + $0x18c] ss:$16 sps:$4 sm:$0xff]  }
  0x4f   :  { %v83_v13 = vld [vmem:[#allocation2 + $0xa8] sm:$0xff]  ;;  %v85_v14 = vld [vmem:[#allocation2 + $0xb8] sm:$0xff] }
  0x50   :  { %v93_v35 = vld [vmem:[#allocation2 + $0xf8] sm:$0xff]  ;;  %v2985_v58 = vld [vmem:[#allocation7 + $0x14] ss:$8 sps:$4 sm:$0xff]  }
  0x51   :  { %557 = vmatpush1.bf16.msra.mxu1 %v2906_v16  ;;  %v2960_v16 = vld [vmem:[#allocation5 + $0x10c] ss:$16 sps:$4 sm:$0xff]   ;;  %v2970_v39 = vld [vmem:[#allocation5 + $0x188] ss:$16 sps:$4 sm:$0xff]  }
  0x52   :  { %558 = vmatprep.subr.bf16.mxu1 %v2907_v17  ;;  %v3536_v17 = vpack.c.bf16 %v80_v11, %v78_v10  ;;  %v2973_v45 = vld [vmem:[#allocation5 + $0x1a8] ss:$16 sps:$4 sm:$0xff]   ;;  %v2982_v46 = vld [vmem:[#allocation7 + $0x4] ss:$8 sps:$4 sm:$0xff]   ;;  %v98_v10 = vld [vmem:[#allocation2 + $0x120] sm:$0xff] }
  0x53   :  { %v97_v48 = vld [vmem:[#allocation2 + $0x118] sm:$0xff]  ;;  %2214 = vmatprep.subr.bf16.mxu0 %v2982_v46  ;;  %v99_v1 = vld [vmem:[#allocation2 + $0x128] sm:$0xff]  ;;  %v100_v11 = vld [vmem:[#allocation2 + $0x130] sm:$0xff] }
  0x54   :  { %v2978_v49 = vld [vmem:[#allocation5 + $0x1cc] ss:$16 sps:$4 sm:$0xff]   ;;  %v2976_v54 = vld [vmem:[#allocation5 + $0x1c8] ss:$16 sps:$4 sm:$0xff]   ;;  %v110_v46 = vld [vmem:[#allocation2 + $0x180] sm:$0xff] }
  0x55   :  { %559 = vmatpush1.bf16.msra.mxu1 %v2909_v18  ;;  %v3538_v18 = vpack.c.bf16 %v85_v14, %v83_v13  ;;  %v2981_v55 = vld [vmem:[#allocation5 + $0x1ec] ss:$16 sps:$4 sm:$0xff]  }
  0x56   :  { %560 = vmatprep.subr.bf16.mxu1 %v2910_v19  ;;  %v2958_v19 = vld [vmem:[#allocation5 + $0x108] ss:$16 sps:$4 sm:$0xff]   ;;  %v2988_v0 = vld [vmem:[#allocation7 + $0x24] ss:$8 sps:$4 sm:$0xff]  }
  0x57   :  { %v103_v13 = vld [vmem:[#allocation2 + $0x148] sm:$0xff]  ;;  %v105_v14 = vld [vmem:[#allocation2 + $0x158] sm:$0xff] }
  0x59   :  { %561 = vmatpush1.bf16.msra.mxu1 %v2912_v20  ;;  %v2963_v20 = vld [vmem:[#allocation5 + $0x12c] ss:$16 sps:$4 sm:$0xff]  }
  0x5a   :  { %562 = vmatprep.subr.bf16.mxu1 %v2913_v21  ;;  %v82_v21 = vld [vmem:[#allocation2 + $0xa0] sm:$0xff] }
  0x5d   :  { %563 = vmatpush1.bf16.msra.mxu1 %v2915_v22  ;;  %v84_v22 = vld [vmem:[#allocation2 + $0xb0] sm:$0xff] }
  0x5e   :  { %564 = vmatprep.subr.bf16.mxu1 %v2916_v23  ;;  %v2961_v23 = vld [vmem:[#allocation5 + $0x128] ss:$16 sps:$4 sm:$0xff]  }
  0x61   :  { %565 = vmatpush1.bf16.msra.mxu1 %v2918_v24  ;;  %v87_v24 = vld [vmem:[#allocation2 + $0xc8] sm:$0xff] }
  0x62   :  { %566 = vmatprep.subr.bf16.mxu1 %v2919_v25  ;;  %v89_v25 = vld [vmem:[#allocation2 + $0xd8] sm:$0xff] }
  0x65   :  { %567 = vmatpush1.bf16.msra.mxu1 %v2921_v26  ;;  %v2966_v26 = vld [vmem:[#allocation5 + $0x14c] ss:$16 sps:$4 sm:$0xff]  }
  0x66   :  { %568 = vmatprep.subr.bf16.mxu1 %v2922_v27  ;;  %v3542_v27 = vpack.c.bf16 %v84_v22, %v82_v21  ;;  %v2997_v21 = vld [vmem:[#allocation7 + $0x54] ss:$8 sps:$4 sm:$0xff]   ;;  %v2999_v22 = vld [vmem:[#allocation7 + $0x50] ss:$8 sps:$4 sm:$0xff]  }
  0x69   :  { %569 = vmatpush1.bf16.msra.mxu1 %v2924_v28  ;;  %v3544_v28 = vpack.c.bf16 %v89_v25, %v87_v24  ;;  %v104_v24 = vld [vmem:[#allocation2 + $0x150] sm:$0xff] }
  0x6a   :  { %570 = vmatprep.subr.bf16.mxu1 %v2925_v29  ;;  %v2964_v29 = vld [vmem:[#allocation5 + $0x148] ss:$16 sps:$4 sm:$0xff]   ;;  %v3000_v25 = vld [vmem:[#allocation7 + $0x64] ss:$8 sps:$4 sm:$0xff]  }
  0x6d   :  { %571 = vmatpush1.bf16.msra.mxu1 %v2927_v30  ;;  %v2969_v30 = vld [vmem:[#allocation5 + $0x16c] ss:$16 sps:$4 sm:$0xff]  }
  0x6e   :  { %572 = vmatprep.subr.bf16.mxu1 %v2928_v31  ;;  %v86_v31 = vld [vmem:[#allocation2 + $0xc0] sm:$0xff] }
  0x71   :  { %573 = vmatpush1.bf16.msra.mxu1 %v2930_v32  ;;  %v88_v32 = vld [vmem:[#allocation2 + $0xd0] sm:$0xff] }
  0x72   :  { %574 = vmatprep.subr.bf16.mxu1 %v2931_v33  ;;  %v2967_v33 = vld [vmem:[#allocation5 + $0x168] ss:$16 sps:$4 sm:$0xff]  }
  0x75   :  { %575 = vmatpush1.bf16.msra.mxu1 %v2933_v34  ;;  %v91_v34 = vld [vmem:[#allocation2 + $0xe8] sm:$0xff] }
  0x76   :  { %705 = vmatprep.subr.bf16.mxu1 %v2936_v37  ;;  %v3548_v37 = vpack.c.bf16 %v88_v32, %v86_v31  ;;  %v3550_v38 = vpack.c.bf16 %v93_v35, %v91_v34  ;;  %v3002_v31 = vld [vmem:[#allocation7 + $0x60] ss:$8 sps:$4 sm:$0xff]   ;;  %v3003_v35 = vld [vmem:[#allocation7 + $0x74] ss:$8 sps:$4 sm:$0xff]  }
  0x77   :  { %v108_v34 = vld [vmem:[#allocation2 + $0x170] sm:$0xff] }
  0x78   :  { %577 = vmatmul.mubr.bf16.vlgmr.msra.gmra.mrb[0].mxu1 %v3512_v41 }
  0x79   :  { %706 = vmatpush1.bf16.msra.mxu1 %v2934_v40  ;;  %586 = vmatprep.mubr.bf16.mxu1 %v3514_v43  ;;  %v2975_v40 = vld [vmem:[#allocation5 + $0x1ac] ss:$16 sps:$4 sm:$0xff]  }
  0x7a   :  { %707 = vmatprep.subr.bf16.mxu1 %v2939_v42  ;;  %v90_v42 = vld [vmem:[#allocation2 + $0xe0] sm:$0xff] }
  0x7d   :  { %708 = vmatpush1.bf16.msra.mxu1 %v2937_v44  ;;  %v92_v44 = vld [vmem:[#allocation2 + $0xf0] sm:$0xff] }
  0x7e   :  { %709 = vmatprep.subr.bf16.mxu1 %v2942_v47  ;;  %v95_v47 = vld [vmem:[#allocation2 + $0x108] sm:$0xff] }
  0x80   :  { %587 = vmatmul.mubr.bf16.gmra.mrb[4].mxu1 %v3518_v51 }
  0x81   :  { %710 = vmatpush1.bf16.msra.mxu1 %v2940_v50  ;;  %596 = vmatprep.mubr.bf16.mxu1 %v3520_v53  ;;  %v3554_v50 = vpack.c.bf16 %v92_v44, %v90_v42  ;;  %v3006_v44 = vld [vmem:[#allocation7 + $0x84] ss:$8 sps:$4 sm:$0xff]  }
  0x82   :  { %711 = vmatprep.subr.bf16.mxu1 %v2945_v52  ;;  %v3556_v52 = vpack.c.bf16 %v97_v48, %v95_v47  ;;  %v3009_v47 = vld [vmem:[#allocation7 + $0x94] ss:$8 sps:$4 sm:$0xff]   ;;  %v3011_v48 = vld [vmem:[#allocation7 + $0x90] ss:$8 sps:$4 sm:$0xff]  }
  0x85   :  { %712 = vmatpush1.bf16.msra.mxu1 %v2943_v56  ;;  %v2984_v56 = vld [vmem:[#allocation7] ss:$8 sps:$4 sm:$0xff]  }
  0x86   :  { %713 = vmatprep.subr.bf16.mxu1 %v2948_v59  ;;  %2215 = vmatpush1.bf16.msra.mxu0 %v2984_v56  ;;  %v2987_v59 = vld [vmem:[#allocation7 + $0x10] ss:$8 sps:$4 sm:$0xff]   ;;  %v3015_v56 = vld [vmem:[#allocation7 + $0xb4] ss:$8 sps:$4 sm:$0xff]  }
  0x87   :  { %2216 = vmatprep.subr.bf16.mxu0 %v2985_v58  ;;  %v3018_v58 = vld [vmem:[#allocation7 + $0xc4] ss:$8 sps:$4 sm:$0xff]  }
  0x88   :  { %597 = vmatmul.mubr.bf16.gmra.mrb[8].mxu1 %v3524_v61 }
  0x89   :  { %606 = vmatprep.mubr.bf16.mxu1 %v3526_v62  ;;  %714 = vmatpush1.bf16.msra.mxu1 %v2946_v60  ;;  %v96_v60 = vld [vmem:[#allocation2 + $0x110] sm:$0xff] }
  0x8a   :  { %715 = vmatprep.subr.bf16.mxu1 %v2951_v63  ;;  %v2979_v63 = vld [vmem:[#allocation5 + $0x1e8] ss:$16 sps:$4 sm:$0xff]   ;;  %v3560_v3 = vpack.c.bf16 %v96_v60, %v94_v57  ;;  %2217 = vmatpush1.bf16.msra.mxu0 %v2987_v59  ;;  %v3021_v60 = vld [vmem:[#allocation7 + $0xd4] ss:$8 sps:$4 sm:$0xff]  }
  0x8b   :  { %2218 = vmatprep.subr.bf16.mxu0 %v2988_v0  ;;  %v3017_v57 = vld [vmem:[#allocation7 + $0xb0] ss:$8 sps:$4 sm:$0xff]   ;;  %v3020_v59 = vld [vmem:[#allocation7 + $0xc0] ss:$8 sps:$4 sm:$0xff]   ;;  %v3024_v0 = vld [vmem:[#allocation7 + $0xe4] ss:$8 sps:$4 sm:$0xff]  }
  0x8d   :  { %716 = vmatpush1.bf16.msra.mxu1 %v2949_v2  ;;  %v101_v2 = vld [vmem:[#allocation2 + $0x138] sm:$0xff] }
  0x8e   :  { %717 = vmatprep.subr.bf16.mxu1 %v2954_v5  ;;  %v3562_v4 = vpack.c.bf16 %v101_v2, %v99_v1  ;;  %v2990_v5 = vld [vmem:[#allocation7 + $0x20] ss:$8 sps:$4 sm:$0xff]   ;;  %v3029_v2 = vld [vmem:[#allocation7 + $0xf0] ss:$8 sps:$4 sm:$0xff]  }
  0x8f   :  { %2219 = vmatpush1.bf16.msra.mxu0 %v2990_v5  ;;  %v3026_v1 = vld [vmem:[#allocation7 + $0xe0] ss:$8 sps:$4 sm:$0xff]  }
  0x90   :  { %607 = vmatmul.mubr.bf16.gmra.mrb[12].mxu1 %v3530_v6 }
  0x91   :  { %616 = vmatprep.mubr.bf16.mxu1 %v3532_v7  ;;  %718 = vmatpush1.bf16.msra.mxu1 %v2952_v8  ;;  %v2991_v8 = vld [vmem:[#allocation7 + $0x34] ss:$8 sps:$4 sm:$0xff]  }
  0x92   :  { %719 = vmatprep.subr.bf16.mxu1 %v2957_v9  ;;  %v2993_v9 = vld [vmem:[#allocation7 + $0x30] ss:$8 sps:$4 sm:$0xff]   ;;  %2220 = vmatprep.subr.bf16.mxu0 %v2991_v8 }
  0x93   :  { %2221 = vmatpush1.bf16.msra.mxu0 %v2993_v9 }
  0x95   :  { %720 = vmatpush1.bf16.msra.mxu1 %v2955_v12  ;;  %v2994_v12 = vld [vmem:[#allocation7 + $0x44] ss:$8 sps:$4 sm:$0xff]  }
  0x96   :  { %721 = vmatprep.subr.bf16.mxu1 %v2960_v16  ;;  %v3566_v16 = vpack.c.bf16 %v100_v11, %v98_v10  ;;  %2222 = vmatprep.subr.bf16.mxu0 %v2994_v12 }
  0x98   :  { %617 = vmatmul.mubr.bf16.gmra.mrb[16].mxu1 %v3536_v17 }
  0x99   :  { %626 = vmatprep.mubr.bf16.mxu1 %v3538_v18  ;;  %722 = vmatpush1.bf16.msra.mxu1 %v2958_v19  ;;  %v3568_v19 = vpack.c.bf16 %v105_v14, %v103_v13 }
  0x9a   :  { %723 = vmatprep.subr.bf16.mxu1 %v2963_v20  ;;  %v2996_v20 = vld [vmem:[#allocation7 + $0x40] ss:$8 sps:$4 sm:$0xff]  }
  0x9b   :  { %2223 = vmatpush1.bf16.msra.mxu0 %v2996_v20 }
  0x9c   :  { %2224 = vmatprep.subr.bf16.mxu0 %v2997_v21 }
  0x9d   :  { %724 = vmatpush1.bf16.msra.mxu1 %v2961_v23  ;;  %v102_v23 = vld [vmem:[#allocation2 + $0x140] sm:$0xff] }
  0x9e   :  { %725 = vmatprep.subr.bf16.mxu1 %v2966_v26  ;;  %v107_v26 = vld [vmem:[#allocation2 + $0x168] sm:$0xff] }
  0x9f   :  { %2225 = vmatpush1.bf16.msra.mxu0 %v2999_v22 }
  0xa0   :  { %627 = vmatmul.mubr.bf16.gmra.mrb[20].mxu1 %v3542_v27  ;;  %2226 = vmatprep.subr.bf16.mxu0 %v3000_v25 }
  0xa1   :  { %636 = vmatprep.mubr.bf16.mxu1 %v3544_v28  ;;  %726 = vmatpush1.bf16.msra.mxu1 %v2964_v29  ;;  %v109_v29 = vld [vmem:[#allocation2 + $0x178] sm:$0xff] }
  0xa2   :  { %727 = vmatprep.subr.bf16.mxu1 %v2969_v30  ;;  %v3572_v30 = vpack.c.bf16 %v104_v24, %v102_v23  ;;  %v3574_v32 = vpack.c.bf16 %v109_v29, %v107_v26 }
  0xa3   :  { %2227 = vmatpush1.bf16.msra.mxu0 %v3002_v31 }
  0xa4   :  { %2228 = vmatprep.subr.bf16.mxu0 %v3003_v35 }
  0xa5   :  { %728 = vmatpush1.bf16.msra.mxu1 %v2967_v33  ;;  %v106_v33 = vld [vmem:[#allocation2 + $0x160] sm:$0xff] }
  0xa6   :  { %729 = vmatprep.subr.bf16.mxu1 %v2972_v36  ;;  %v111_v36 = vld [vmem:[#allocation2 + $0x188] sm:$0xff] }
  0xa7   :  { %v3580_v42 = vpack.c.bf16 %v111_v36, %v111_v36 }
  0xa8   :  { %637 = vmatmul.mubr.bf16.gmra.mrb[24].mxu1 %v3548_v37 }
  0xa9   :  { %646 = vmatprep.mubr.bf16.mxu1 %v3550_v38  ;;  %730 = vmatpush1.bf16.msra.mxu1 %v2970_v39  ;;  %v3005_v39 = vld [vmem:[#allocation7 + $0x70] ss:$8 sps:$4 sm:$0xff]  }
  0xaa   :  { %731 = vmatprep.subr.bf16.mxu1 %v2975_v40  ;;  %v3578_v40 = vpack.c.bf16 %v108_v34, %v106_v33  ;;  %2229 = vmatpush1.bf16.msra.mxu0 %v3005_v39 }
  0xab   :  { %2230 = vmatprep.subr.bf16.mxu0 %v3006_v44 }
  0xad   :  { %732 = vmatpush1.bf16.msra.mxu1 %v2973_v45  ;;  %v3008_v45 = vld [vmem:[#allocation7 + $0x80] ss:$8 sps:$4 sm:$0xff]  }
  0xae   :  { %733 = vmatprep.subr.bf16.mxu1 %v2978_v49  ;;  %2231 = vmatpush1.bf16.msra.mxu0 %v3008_v45  ;;  %v136_v49 = vpack.c.bf16 %v110_v46, %v110_v46 }
  0xaf   :  { %2232 = vmatprep.subr.bf16.mxu0 %v3009_v47 }
  0xb0   :  { %647 = vmatmul.mubr.bf16.gmra.mrb[28].mxu1 %v3554_v50 }
  0xb1   :  { %656 = vmatprep.mubr.bf16.mxu1 %v3556_v52  ;;  %734 = vmatpush1.bf16.msra.mxu1 %v2976_v54  ;;  %v3012_v54 = vld [vmem:[#allocation7 + $0xa4] ss:$8 sps:$4 sm:$0xff]  }
  0xb2   :  { %735 = vmatprep.subr.bf16.mxu1 %v2981_v55  ;;  %2233 = vmatpush1.bf16.msra.mxu0 %v3011_v48  ;;  %v3014_v55 = vld [vmem:[#allocation7 + $0xa0] ss:$8 sps:$4 sm:$0xff]  }
  0xb3   :  { %2234 = vmatprep.subr.bf16.mxu0 %v3012_v54 }
  0xb5   :  { %736 = vmatpush1.bf16.msra.mxu1 %v2979_v63  ;;  %v3023_v63 = vld [vmem:[#allocation7 + $0xd0] ss:$8 sps:$4 sm:$0xff]  }
  0xb6   :  { %2235 = vmatpush1.bf16.msra.mxu0 %v3014_v55 }
  0xb7   :  { %2236 = vmatprep.subr.bf16.mxu0 %v3015_v56 }
  0xb8   :  { %657 = vmatmul.mubr.bf16.gmra.mrb[32].mxu1 %v3560_v3 }
  0xb9   :  { %666 = vmatprep.mubr.bf16.mxu1 %v3562_v4 }
  0xba   :  { %2237 = vmatpush1.bf16.msra.mxu0 %v3017_v57 }
  0xbb   :  { %2238 = vmatprep.subr.bf16.mxu0 %v3018_v58 }
  0xbe   :  { %2239 = vmatpush1.bf16.msra.mxu0 %v3020_v59 }
  0xbf   :  { %2240 = vmatprep.subr.bf16.mxu0 %v3021_v60 }
  0xc0   :  { %667 = vmatmul.mubr.bf16.gmra.mrb[36].mxu1 %v3566_v16 }
  0xc1   :  { %676 = vmatprep.mubr.bf16.mxu1 %v3568_v19 }
  0xc2   :  { %2241 = vmatpush1.bf16.msra.mxu0 %v3023_v63 }
  0xc3   :  { %2242 = vmatprep.subr.bf16.mxu0 %v3024_v0 }
  0xc6   :  { %2243 = vmatpush1.bf16.msra.mxu0 %v3026_v1 }
  0xc8   :  { %677 = vmatmul.mubr.bf16.gmra.mrb[40].mxu1 %v3572_v30 }
  0xc9   :  { %686 = vmatprep.mubr.bf16.mxu1 %v3574_v32 }
  0xd0   :  { %687 = vmatmul.mubr.bf16.gmra.mrb[44].mxu1 %v3578_v40 }
  0xd1   :  { %696 = vmatprep.mubr.bf16.mxu1 %v3580_v42 }
  0xd8   :  { %697 = vmatmul.mubr.bf16.gmra.mrb[48].mxu1 %v136_v49 }
  0xd9   :  { %737 = vmatprep.mubr.bf16.mxu1 %v3509_v15  ;;  %v3027_v15 = vld [vmem:[#allocation7 + $0xf4] ss:$8 sps:$4 sm:$0xff]  }
  0xda   :  { %2244 = vmatprep.subr.bf16.mxu0 %v3027_v15 }
  0xdb   :  { %2245 = vmatpush1.bf16.msra.mxu0 %v3029_v2 }
  0xe0   :  { %738 = vmatmul.mubr.bf16.vlgmr.msra.gmra.mrb[52].mxu1 %v3512_v41  ;;  %v3032_v41 = vld [vmem:[#allocation7 + $0x104] ss:$8 sps:$4 sm:$0xff]  }
  0xe1   :  { %747 = vmatprep.mubr.bf16.mxu1 %v3514_v43  ;;  %2375 = vmatprep.subr.bf16.mxu0 %v3032_v41  ;;  %v204_v43 = vlaneseq }
  0xe8   :  { %748 = vmatmul.mubr.bf16.gmra.mrb[56].mxu1 %v3518_v51  ;;  %v3609_v51 = vshrl.u32 %v204_v43, 7 }
  0xe9   :  { %757 = vmatprep.mubr.bf16.mxu1 %v3520_v53 }
  0xea   :  { %4991 = vst [vmem:[#allocation12_spill] sm:$0xff] %v3609_v51  ;;  %v4987_v53 = vsub.s32 0, %v3609_v51  ;;  %v214_v29 = vsub.s32 2, %v3609_v51  ;;  %v218_v1 = vsub.s32 3, %v3609_v51 }
  0xf0   :  { %758 = vmatmul.mubr.bf16.gmra.mrb[60].mxu1 %v3524_v61  ;;  %v3615_v61 = vld [vmem:[%s4982_s2] sm:$0xf] }
  0xf1   :  { %767 = vmatprep.mubr.bf16.mxu1 %v3526_v62  ;;  %v4986_v62 = vsub.s32 1, %v3609_v51  ;;  %v3682_v58 = vrot.slane %v3615_v61, %v214_v29 }
  0xf8   :  { %768 = vmatmul.mubr.bf16.gmra.mrb[64].mxu1 %v3530_v6  ;;  %v3621_v6 = vrot.slane %v3615_v61, %v4987_v53 }
  0xf9   :  { %777 = vmatprep.mubr.bf16.mxu1 %v3532_v7  ;;  %v3626_v7 = vrot.slane %v3615_v61, %v4986_v62 }
 0x100   :  { %778 = vmatmul.mubr.bf16.gmra.mrb[68].mxu1 %v3536_v17 }
 0x101   :  { %787 = vmatprep.mubr.bf16.mxu1 %v3538_v18 }
 0x108   :  { %788 = vmatmul.mubr.bf16.gmra.mrb[72].mxu1 %v3542_v27 }
 0x109   :  { %797 = vmatprep.mubr.bf16.mxu1 %v3544_v28 }
 0x110   :  { %798 = vmatmul.mubr.bf16.gmra.mrb[76].mxu1 %v3548_v37 }
 0x111   :  { %807 = vmatprep.mubr.bf16.mxu1 %v3550_v38 }
 0x118   :  { %808 = vmatmul.mubr.bf16.gmra.mrb[80].mxu1 %v3554_v50 }
 0x119   :  { %817 = vmatprep.mubr.bf16.mxu1 %v3556_v52 }
 0x120   :  { %818 = vmatmul.mubr.bf16.gmra.mrb[84].mxu1 %v3560_v3 }
 0x121   :  { %827 = vmatprep.mubr.bf16.mxu1 %v3562_v4 }
 0x128   :  { %828 = vmatmul.mubr.bf16.gmra.mrb[88].mxu1 %v3566_v16 }
 0x129   :  { %837 = vmatprep.mubr.bf16.mxu1 %v3568_v19 }
 0x130   :  { %838 = vmatmul.mubr.bf16.gmra.mrb[92].mxu1 %v3572_v30 }
 0x131   :  { %847 = vmatprep.mubr.bf16.mxu1 %v3574_v32 }
 0x138   :  { %848 = vmatmul.mubr.bf16.gmra.mrb[96].mxu1 %v3578_v40 }
 0x139   :  { %857 = vmatprep.mubr.bf16.mxu1 %v3580_v42 }
 0x140   :  { %858 = vmatmul.mubr.bf16.gmra.mrb[100].mxu1 %v136_v49 }
 0x14b   :  { %v578_v17 = vpop.f32.mrb[0].mxu1 }
 0x14c   :  { %v3629_v18 = vadd.f32 %v578_v17, %v3621_v6  ;;  %v580_v27 = vpop.f32.mrb[1].mxu1 }
 0x14d   :  { %v3632_v28 = vadd.f32 %v580_v27, %v3626_v7  ;;  %v582_v37 = vpop.f32.mrb[2].mxu1 }
 0x14e   :  { %v866_v38 = vmul.f32 %v3629_v18, %v3629_v18  ;;  %v3637_v50 = vadd.f32 %v582_v37, %v3621_v6  ;;  %v584_v52 = vpop.f32.mrb[3].mxu1 }
 0x14f   :  { %v867_v3 = vmul.f32 %v3632_v28, %v3632_v28  ;;  %v3642_v4 = vadd.f32 %v584_v52, %v3626_v7 }
 0x150   :  { %v966_v5 = vmul.f32 %v866_v38, %v3629_v18  ;;  %v870_v8 = vmul.f32 %v3637_v50, %v3637_v50 }
 0x151   :  { %v967_v9 = vmul.f32 %v867_v3, %v3632_v28  ;;  %v871_v10 = vmul.f32 %v3642_v4, %v3642_v4 }
 0x152   :  { %v1066_v11 = vmul.f32 0.044715, %v966_v5  ;;  %v970_v12 = vmul.f32 %v870_v8, %v3637_v50 }
 0x153   :  { %v1067_v13 = vmul.f32 0.044715, %v967_v9  ;;  %v971_v14 = vmul.f32 %v871_v10, %v3642_v4  ;;  %v588_v16 = vpop.f32.mrb[4].mxu1 }
 0x154   :  { %v1166_v19 = vadd.f32 %v1066_v11, %v3629_v18  ;;  %v1070_v20 = vmul.f32 0.044715, %v970_v12  ;;  %v3654_v21 = vadd.f32 %v588_v16, %v3621_v6  ;;  %v590_v22 = vpop.f32.mrb[5].mxu1 }
 0x155   :  { %v1071_v23 = vmul.f32 0.044715, %v971_v14  ;;  %v3657_v24 = vadd.f32 %v590_v22, %v3626_v7  ;;  %v592_v25 = vpop.f32.mrb[6].mxu1  ;;  %v1167_v26 = vadd.f32 %v1067_v13, %v3632_v28 }
 0x156   :  { %v1266_v30 = vmul.f32 0.7978846, %v1166_v19  ;;  %v1170_v31 = vadd.f32 %v1070_v20, %v3637_v50  ;;  %v874_v32 = vmul.f32 %v3654_v21, %v3654_v21  ;;  %v3665_v33 = vadd.f32 %v592_v25, %v3621_v6  ;;  %v594_v34 = vpop.f32.mrb[7].mxu1 }
 0x157   :  { %v875_v35 = vmul.f32 %v3657_v24, %v3657_v24  ;;  %v3670_v36 = vadd.f32 %v594_v34, %v3626_v7  ;;  %v1171_v39 = vadd.f32 %v1071_v23, %v3642_v4  ;;  %v1267_v40 = vmul.f32 0.7978846, %v1167_v26 }
 0x158   :  { %3078 = vtanh.f32 %v1266_v30  ;;  %v1270_v42 = vmul.f32 0.7978846, %v1170_v31  ;;  %v974_v44 = vmul.f32 %v874_v32, %v3654_v21  ;;  %v878_v45 = vmul.f32 %v3665_v33, %v3665_v33 }
 0x159   :  { %v975_v46 = vmul.f32 %v875_v35, %v3657_v24  ;;  %v879_v47 = vmul.f32 %v3670_v36, %v3670_v36  ;;  %v1271_v48 = vmul.f32 0.7978846, %v1171_v39  ;;  %3080 = vtanh.f32 %v1267_v40 }
 0x15a   :  { %3082 = vtanh.f32 %v1270_v42  ;;  %v1074_v49 = vmul.f32 0.044715, %v974_v44  ;;  %v978_v54 = vmul.f32 %v878_v45, %v3665_v33  ;;  %v3713_v23 = vrot.slane %v3615_v61, %v218_v1 }
 0x15b   :  { %v1075_v55 = vmul.f32 0.044715, %v975_v46  ;;  %v979_v56 = vmul.f32 %v879_v47, %v3670_v36  ;;  %v598_v57 = vpop.f32.mrb[8].mxu1  ;;  %3084 = vtanh.f32 %v1271_v48 }
 0x15c   :  { %v1174_v59 = vadd.f32 %v1074_v49, %v3654_v21  ;;  %v1078_v60 = vmul.f32 0.044715, %v978_v54  ;;  %v3686_v63 = vadd.f32 %v598_v57, %v3621_v6  ;;  %v600_v0 = vpop.f32.mrb[9].mxu1 }
 0x15d   :  { %v1175_v15 = vadd.f32 %v1075_v55, %v3657_v24  ;;  %v1079_v2 = vmul.f32 0.044715, %v979_v56  ;;  %v3691_v41 = vadd.f32 %v600_v0, %v3626_v7  ;;  %v602_v43 = vpop.f32.mrb[10].mxu1 }
 0x15e   :  { %v1274_v17 = vmul.f32 0.7978846, %v1174_v59  ;;  %v1178_v27 = vadd.f32 %v1078_v60, %v3665_v33  ;;  %v882_v37 = vmul.f32 %v3686_v63, %v3686_v63  ;;  %v3697_v38 = vadd.f32 %v602_v43, %v3621_v6  ;;  %v604_v52 = vpop.f32.mrb[11].mxu1 }
 0x15f   :  { %v1275_v3 = vmul.f32 0.7978846, %v1175_v15  ;;  %v1179_v5 = vadd.f32 %v1079_v2, %v3670_v36  ;;  %v883_v8 = vmul.f32 %v3691_v41, %v3691_v41  ;;  %v3703_v9 = vadd.f32 %v604_v52, %v3626_v7 }
 0x160   :  { %3086 = vtanh.f32 %v1274_v17  ;;  %v1278_v10 = vmul.f32 0.7978846, %v1178_v27  ;;  %v982_v11 = vmul.f32 %v882_v37, %v3686_v63  ;;  %v886_v12 = vmul.f32 %v3697_v38, %v3697_v38 }
 0x161   :  { %3088 = vtanh.f32 %v1275_v3  ;;  %v1279_v13 = vmul.f32 0.7978846, %v1179_v5  ;;  %v983_v14 = vmul.f32 %v883_v8, %v3691_v41  ;;  %v887_v16 = vmul.f32 %v3703_v9, %v3703_v9 }
 0x162   :  { %v3079_v19 = vpop.eup %3078  ;;  %3090 = vtanh.f32 %v1278_v10  ;;  %v1082_v20 = vmul.f32 0.044715, %v982_v11  ;;  %v986_v22 = vmul.f32 %v886_v12, %v3697_v38 }
 0x163   :  { %v3081_v25 = vpop.eup %3080  ;;  %3092 = vtanh.f32 %v1279_v13  ;;  %v1083_v26 = vmul.f32 0.044715, %v983_v14  ;;  %v987_v29 = vmul.f32 %v887_v16, %v3703_v9  ;;  %v608_v30 = vpop.f32.mrb[12].mxu1  ;;  %v3716_v31 = vadd.f32 1.0, %v3079_v19 }
 0x164   :  { %v3083_v32 = vpop.eup %3082  ;;  %v1182_v34 = vadd.f32 %v1082_v20, %v3686_v63  ;;  %v1086_v35 = vmul.f32 0.044715, %v986_v22  ;;  %v3720_v39 = vadd.f32 %v608_v30, %v3621_v6  ;;  %v610_v40 = vpop.f32.mrb[13].mxu1  ;;  %v1467_v42 = vadd.f32 1.0, %v3081_v25 }
 0x165   :  { %v1183_v61 = vadd.f32 %v1083_v26, %v3691_v41  ;;  %v1087_v44 = vmul.f32 0.044715, %v987_v29  ;;  %v3724_v45 = vadd.f32 %v610_v40, %v3626_v7  ;;  %v612_v46 = vpop.f32.mrb[14].mxu1  ;;  %v3726_v47 = vadd.f32 1.0, %v3083_v32  ;;  %v3085_v57 = vpop.eup %3084 }
 0x166   :  { %v1282_v48 = vmul.f32 0.7978846, %v1182_v34  ;;  %v1186_v49 = vadd.f32 %v1086_v35, %v3697_v38  ;;  %v890_v54 = vmul.f32 %v3720_v39, %v3720_v39  ;;  %v3732_v55 = vadd.f32 %v612_v46, %v3621_v6  ;;  %v614_v56 = vpop.f32.mrb[15].mxu1 }
 0x167   :  { %v1283_v59 = vmul.f32 0.7978846, %v1183_v61  ;;  %v1187_v60 = vadd.f32 %v1087_v44, %v3703_v9  ;;  %v891_v0 = vmul.f32 %v3724_v45, %v3724_v45  ;;  %v3738_v1 = vadd.f32 %v614_v56, %v3626_v7 }
 0x168   :  { %3094 = vtanh.f32 %v1282_v48  ;;  %v1286_v15 = vmul.f32 0.7978846, %v1186_v49  ;;  %v990_v2 = vmul.f32 %v890_v54, %v3720_v39  ;;  %v894_v43 = vmul.f32 %v3732_v55, %v3732_v55 }
 0x169   :  { %3096 = vtanh.f32 %v1283_v59  ;;  %v1287_v17 = vmul.f32 0.7978846, %v1187_v60  ;;  %v991_v27 = vmul.f32 %v891_v0, %v3724_v45  ;;  %v895_v37 = vmul.f32 %v3738_v1, %v3738_v1 }
 0x16a   :  { %v3746_v52 = vpop.eup %3086  ;;  %3098 = vtanh.f32 %v1286_v15  ;;  %v1090_v3 = vmul.f32 0.044715, %v990_v2  ;;  %v994_v5 = vmul.f32 %v894_v43, %v3732_v55  ;;  %v1471_v8 = vadd.f32 1.0, %v3085_v57 }
 0x16b   :  { %v3749_v10 = vpop.eup %3088  ;;  %3100 = vtanh.f32 %v1287_v17  ;;  %v1091_v11 = vmul.f32 0.044715, %v991_v27  ;;  %v995_v12 = vmul.f32 %v895_v37, %v3738_v1  ;;  %v618_v13 = vpop.f32.mrb[16].mxu1  ;;  %v1567_v14 = vmul.f32 0.5, %v1467_v42 }
 0x16c   :  { %v3752_v16 = vpop.eup %3090  ;;  %v1190_v19 = vadd.f32 %v1090_v3, %v3720_v39  ;;  %v1094_v20 = vmul.f32 0.044715, %v994_v5  ;;  %v3756_v22 = vadd.f32 %v618_v13, %v3621_v6  ;;  %v620_v25 = vpop.f32.mrb[17].mxu1  ;;  %v1571_v26 = vmul.f32 0.5, %v1471_v8 }
 0x16d   :  { %v3758_v29 = vpop.eup %3092  ;;  %v1191_v30 = vadd.f32 %v1091_v11, %v3724_v45  ;;  %v1095_v32 = vmul.f32 0.044715, %v995_v12  ;;  %v3762_v34 = vadd.f32 %v620_v25, %v3626_v7  ;;  %v622_v35 = vpop.f32.mrb[18].mxu1  ;;  %v1667_v40 = vmul.f32 %v1567_v14, %v3632_v28 }
 0x16e   :  { %v1290_v42 = vmul.f32 0.7978846, %v1190_v19  ;;  %v1194_v61 = vadd.f32 %v1094_v20, %v3732_v55  ;;  %v898_v44 = vmul.f32 %v3756_v22, %v3756_v22  ;;  %v3769_v46 = vadd.f32 %v622_v35, %v3621_v6  ;;  %v624_v48 = vpop.f32.mrb[19].mxu1 }
 0x16f   :  { %v1291_v49 = vmul.f32 0.7978846, %v1191_v30  ;;  %v1195_v54 = vadd.f32 %v1095_v32, %v3738_v1  ;;  %v899_v56 = vmul.f32 %v3762_v34, %v3762_v34  ;;  %v3775_v57 = vadd.f32 %v624_v48, %v3626_v7 }
 0x170   :  { %3102 = vtanh.f32 %v1290_v42  ;;  %v1294_v28 = vmul.f32 0.7978846, %v1194_v61  ;;  %v998_v59 = vmul.f32 %v898_v44, %v3756_v22  ;;  %v902_v60 = vmul.f32 %v3769_v46, %v3769_v46 }
 0x171   :  { %3104 = vtanh.f32 %v1291_v49  ;;  %v1295_v0 = vmul.f32 0.7978846, %v1195_v54  ;;  %v999_v15 = vmul.f32 %v899_v56, %v3762_v34  ;;  %v903_v2 = vmul.f32 %v3775_v57, %v3775_v57  ;;  %v3030_v56 = vld [vmem:[#allocation7 + $0x100] ss:$8 sps:$4 sm:$0xff]  }
 0x172   :  { %v3783_v43 = vpop.eup %3094  ;;  %3106 = vtanh.f32 %v1294_v28  ;;  %v1098_v17 = vmul.f32 0.044715, %v998_v59  ;;  %v1002_v27 = vmul.f32 %v902_v60, %v3769_v46  ;;  %v1671_v37 = vmul.f32 %v1571_v26, %v3642_v4 }
 0x173   :  { %v3787_v3 = vpop.eup %3096  ;;  %3108 = vtanh.f32 %v1295_v0  ;;  %v1099_v5 = vmul.f32 0.044715, %v999_v15  ;;  %v1003_v8 = vmul.f32 %v903_v2, %v3775_v57  ;;  %v1566_v11 = vmul.f32 0.5, %v3716_v31  ;;  %v628_v12 = vpop.f32.mrb[20].mxu1  ;;  %v3035_v0 = vld [vmem:[#allocation7 + $0x114] ss:$8 sps:$4 sm:$0xff]  }
 0x174   :  { %v3791_v13 = vpop.eup %3098  ;;  %v1198_v14 = vadd.f32 %v1098_v17, %v3756_v22  ;;  %v1102_v19 = vmul.f32 0.044715, %v1002_v27  ;;  %v1767_v20 = vpack.c.bf16 %v1671_v37, %v1667_v40  ;;  %v1570_v25 = vmul.f32 0.5, %v3726_v47  ;;  %v630_v30 = vpop.f32.mrb[21].mxu1 }
 0x175   :  { %v3795_v32 = vpop.eup %3100  ;;  %v1199_v4 = vadd.f32 %v1099_v5, %v3762_v34  ;;  %v1103_v26 = vmul.f32 0.044715, %v1003_v8  ;;  %v1666_v35 = vmul.f32 %v1566_v11, %v3629_v18  ;;  %v3800_v42 = vadd.f32 %v628_v12, %v3621_v6  ;;  %v632_v31 = vpop.f32.mrb[22].mxu1  ;;  %v3033_v11 = vld [vmem:[#allocation7 + $0x110] ss:$8 sps:$4 sm:$0xff]  }
 0x176   :  { %v1298_v61 = vmul.f32 0.7978846, %v1198_v14  ;;  %v1202_v44 = vadd.f32 %v1102_v19, %v3769_v46  ;;  %2246 = vmatprep.mubr.bf16.mxu0 %v1767_v20  ;;  %v1670_v40 = vmul.f32 %v1570_v25, %v3637_v50  ;;  %v3805_v47 = vadd.f32 %v630_v30, %v3626_v7  ;;  %v634_v48 = vpop.f32.mrb[23].mxu1  ;;  %v3038_v30 = vld [vmem:[#allocation7 + $0x124] ss:$8 sps:$4 sm:$0xff]  }
 0x177   :  { %v1299_v49 = vmul.f32 0.7978846, %v1199_v4  ;;  %v1203_v54 = vadd.f32 %v1103_v26, %v3775_v57  ;;  %v906_v18 = vmul.f32 %v3800_v42, %v3800_v42  ;;  %v3811_v28 = vadd.f32 %v632_v31, %v3621_v6 }
 0x178   :  { %3110 = vtanh.f32 %v1298_v61  ;;  %v1302_v59 = vmul.f32 0.7978846, %v1202_v44  ;;  %v1766_v60 = vpack.c.bf16 %v1670_v40, %v1666_v35  ;;  %v907_v50 = vmul.f32 %v3805_v47, %v3805_v47 }
 0x179   :  { %3112 = vtanh.f32 %v1299_v49  ;;  %v1303_v15 = vmul.f32 0.7978846, %v1203_v54  ;;  %v1006_v2 = vmul.f32 %v906_v18, %v3800_v42  ;;  %v910_v17 = vmul.f32 %v3811_v28, %v3811_v28 }
 0x17a   :  { %v3818_v27 = vpop.eup %3102  ;;  %3114 = vtanh.f32 %v1302_v59  ;;  %2247 = vmatmul.mubr.bf16.vlgmr.msra.gmra.mrb[0].mxu0 %v1766_v60  ;;  %v1007_v37 = vmul.f32 %v907_v50, %v3805_v47  ;;  %v3822_v5 = vadd.f32 %v634_v48, %v3626_v7  ;;  %v1475_v8 = vadd.f32 1.0, %v3749_v10 }
 0x17b   :  { %v3825_v12 = vpop.eup %3104  ;;  %3116 = vtanh.f32 %v1303_v15  ;;  %2376 = vmatpush1.bf16.msra.mxu0 %v3030_v56  ;;  %v1106_v14 = vmul.f32 0.044715, %v1006_v2  ;;  %v1010_v19 = vmul.f32 %v910_v17, %v3811_v28  ;;  %v1479_v20 = vadd.f32 1.0, %v3758_v29  ;;  %v638_v25 = vpop.f32.mrb[24].mxu1  ;;  %v3036_v17 = vld [vmem:[#allocation7 + $0x120] ss:$8 sps:$4 sm:$0xff]  }
 0x17c   :  { %v3829_v4 = vpop.eup %3106  ;;  %v1107_v26 = vmul.f32 0.044715, %v1007_v37  ;;  %v911_v35 = vmul.f32 %v3822_v5, %v3822_v5  ;;  %v1575_v31 = vmul.f32 0.5, %v1475_v8  ;;  %2377 = vmatprep.subr.bf16.mxu0 %v3035_v0  ;;  %v1474_v10 = vadd.f32 1.0, %v3746_v52  ;;  %v640_v61 = vpop.f32.mrb[25].mxu1 }
 0x17d   :  { %v3834_v44 = vpop.eup %3108  ;;  %v1206_v40 = vadd.f32 %v1106_v14, %v3800_v42  ;;  %v1110_v48 = vmul.f32 0.044715, %v1010_v19  ;;  %v1579_v49 = vmul.f32 0.5, %v1479_v20  ;;  %v1478_v29 = vadd.f32 1.0, %v3752_v16  ;;  %v642_v54 = vpop.f32.mrb[26].mxu1 }
 0x17e   :  { %v1207_v56 = vadd.f32 %v1107_v26, %v3805_v47  ;;  %v1011_v18 = vmul.f32 %v911_v35, %v3822_v5  ;;  %v1675_v59 = vmul.f32 %v1575_v31, %v3657_v24  ;;  %v1574_v60 = vmul.f32 0.5, %v1474_v10  ;;  %v644_v50 = vpop.f32.mrb[27].mxu1  ;;  %v3041_v19 = vld [vmem:[#allocation7 + $0x134] ss:$8 sps:$4 sm:$0xff]  }
 0x17f   :  { %v1306_v0 = vmul.f32 0.7978846, %v1206_v40  ;;  %v1210_v52 = vadd.f32 %v1110_v48, %v3811_v28  ;;  %v1679_v15 = vmul.f32 %v1579_v49, %v3670_v36  ;;  %v1578_v2 = vmul.f32 0.5, %v1478_v29  ;;  %2378 = vmatpush1.bf16.msra.mxu0 %v3033_v11  ;;  %v3039_v40 = vld [vmem:[#allocation7 + $0x130] ss:$8 sps:$4 sm:$0xff]  }
 0x180   :  { %v1307_v37 = vmul.f32 0.7978846, %v1207_v56  ;;  %v1111_v8 = vmul.f32 0.044715, %v1011_v18  ;;  %v1674_v16 = vmul.f32 %v1574_v60, %v3654_v21  ;;  %v3845_v14 = vadd.f32 %v638_v25, %v3621_v6  ;;  %2379 = vmatprep.subr.bf16.mxu0 %v3038_v30 }
 0x181   :  { %3118 = vtanh.f32 %v1306_v0  ;;  %v1310_v24 = vmul.f32 0.7978846, %v1210_v52  ;;  %v1771_v20 = vpack.c.bf16 %v1679_v15, %v1675_v59  ;;  %v1678_v26 = vmul.f32 %v1578_v2, %v3665_v33 }
 0x182   :  { %v3848_v35 = vpop.eup %3110  ;;  %3120 = vtanh.f32 %v1307_v37  ;;  %v1211_v36 = vadd.f32 %v1111_v8, %v3822_v5  ;;  %v914_v11 = vmul.f32 %v3845_v14, %v3845_v14  ;;  %v3854_v21 = vadd.f32 %v640_v61, %v3626_v7 }
 0x183   :  { %v3856_v25 = vpop.eup %3112  ;;  %3122 = vtanh.f32 %v1310_v24  ;;  %2256 = vmatprep.mubr.bf16.mxu0 %v1771_v20  ;;  %v1770_v30 = vpack.c.bf16 %v1678_v26, %v1674_v16  ;;  %v3859_v31 = vadd.f32 %v642_v54, %v3621_v6  ;;  %2380 = vmatpush1.bf16.msra.mxu0 %v3036_v17  ;;  %v3862_v33 = vadd.f32 %v644_v50, %v3626_v7  ;;  %v648_v10 = vpop.f32.mrb[28].mxu1  ;;  %v3044_v54 = vld [vmem:[#allocation7 + $0x144] ss:$8 sps:$4 sm:$0xff]   ;;  %v3042_v20 = vld [vmem:[#allocation7 + $0x140] ss:$8 sps:$4 sm:$0xff]  }
 0x184   :  { %v3864_v48 = vpop.eup %3114  ;;  %v1311_v49 = vmul.f32 0.7978846, %v1211_v36  ;;  %v1014_v61 = vmul.f32 %v914_v11, %v3845_v14  ;;  %v915_v29 = vmul.f32 %v3854_v21, %v3854_v21  ;;  %v1483_v56 = vadd.f32 1.0, %v3787_v3  ;;  %2381 = vmatprep.subr.bf16.mxu0 %v3041_v19  ;;  %v650_v18 = vpop.f32.mrb[29].mxu1  ;;  %v3047_v11 = vld [vmem:[#allocation7 + $0x154] ss:$8 sps:$4 sm:$0xff]  }
 0x185   :  { %v3870_v59 = vpop.eup %3116  ;;  %2257 = vmatmul.mubr.bf16.gmra.mrb[4].mxu0 %v1770_v30  ;;  %v918_v60 = vmul.f32 %v3859_v31, %v3859_v31  ;;  %v919_v50 = vmul.f32 %v3862_v33, %v3862_v33  ;;  %v1487_v0 = vadd.f32 1.0, %v3795_v32  ;;  %v1482_v52 = vadd.f32 1.0, %v3783_v43  ;;  %v652_v15 = vpop.f32.mrb[30].mxu1 }
 0x186   :  { %3124 = vtanh.f32 %v1311_v49  ;;  %v1114_v2 = vmul.f32 0.044715, %v1014_v61  ;;  %v1015_v3 = vmul.f32 %v915_v29, %v3854_v21  ;;  %v1583_v17 = vmul.f32 0.5, %v1483_v56  ;;  %v654_v37 = vpop.f32.mrb[31].mxu1 }
 0x187   :  { %v1018_v8 = vmul.f32 %v918_v60, %v3859_v31  ;;  %v1019_v16 = vmul.f32 %v919_v50, %v3862_v33  ;;  %v1587_v19 = vmul.f32 0.5, %v1487_v0  ;;  %v1486_v24 = vadd.f32 1.0, %v3791_v13  ;;  %2382 = vmatpush1.bf16.msra.mxu0 %v3039_v40 }
 0x188   :  { %v1214_v32 = vadd.f32 %v1114_v2, %v3845_v14  ;;  %v1115_v26 = vmul.f32 0.044715, %v1015_v3  ;;  %v1683_v43 = vmul.f32 %v1583_v17, %v3691_v41  ;;  %v1582_v36 = vmul.f32 0.5, %v1482_v52  ;;  %2383 = vmatprep.subr.bf16.mxu0 %v3044_v54  ;;  %v3045_v2 = vld [vmem:[#allocation7 + $0x150] ss:$8 sps:$4 sm:$0xff]  }
 0x189   :  { %v1118_v30 = vmul.f32 0.044715, %v1018_v8  ;;  %v1119_v49 = vmul.f32 0.044715, %v1019_v16  ;;  %v1687_v61 = vmul.f32 %v1587_v19, %v3703_v9  ;;  %v1586_v29 = vmul.f32 0.5, %v1486_v24 }
 0x18a   :  { %v1314_v56 = vmul.f32 0.7978846, %v1214_v32  ;;  %v1215_v60 = vadd.f32 %v1115_v26, %v3854_v21  ;;  %v1682_v13 = vmul.f32 %v1582_v36, %v3686_v63  ;;  %v3888_v40 = vadd.f32 %v648_v10, %v3621_v6  ;;  %v3050_v16 = vld [vmem:[#allocation7 + $0x164] ss:$8 sps:$4 sm:$0xff]  }
 0x18b   :  { %v3890_v50 = vpop.eup %3118  ;;  %v1218_v41 = vadd.f32 %v1118_v30, %v3859_v31  ;;  %v1219_v54 = vadd.f32 %v1119_v49, %v3862_v33  ;;  %v1775_v0 = vpack.c.bf16 %v1687_v61, %v1683_v43  ;;  %v1686_v52 = vmul.f32 %v1586_v29, %v3697_v38  ;;  %2384 = vmatpush1.bf16.msra.mxu0 %v3042_v20  ;;  %v658_v9 = vpop.f32.mrb[32].mxu1 }
 0x18c   :  { %v3895_v3 = vpop.eup %3120  ;;  %3126 = vtanh.f32 %v1314_v56  ;;  %v1315_v17 = vmul.f32 0.7978846, %v1215_v60  ;;  %v922_v63 = vmul.f32 %v3888_v40, %v3888_v40  ;;  %v3900_v10 = vadd.f32 %v650_v18, %v3626_v7  ;;  %v3902_v8 = vpop.f32.mrb[33].mxu1  ;;  %2385 = vmatprep.subr.bf16.mxu0 %v3047_v11  ;;  %v3048_v60 = vld [vmem:[#allocation7 + $0x160] ss:$8 sps:$4 sm:$0xff]  }
 0x18d   :  { %v3904_v19 = vpop.eup %3122  ;;  %v1318_v38 = vmul.f32 0.7978846, %v1218_v41  ;;  %v1319_v24 = vmul.f32 0.7978846, %v1219_v54  ;;  %2266 = vmatprep.mubr.bf16.mxu0 %v1775_v0  ;;  %v1774_v20 = vpack.c.bf16 %v1686_v52, %v1682_v13  ;;  %v3907_v32 = vadd.f32 %v652_v15, %v3621_v6  ;;  %v662_v26 = vpop.f32.mrb[34].mxu1 }
 0x18e   :  { %3128 = vtanh.f32 %v1315_v17  ;;  %v1022_v43 = vmul.f32 %v922_v63, %v3888_v40  ;;  %v923_v18 = vmul.f32 %v3900_v10, %v3900_v10  ;;  %v3913_v36 = vadd.f32 %v654_v37, %v3626_v7  ;;  %v664_v11 = vpop.f32.mrb[35].mxu1 }
 0x18f   :  { %3130 = vtanh.f32 %v1318_v38  ;;  %2267 = vmatmul.mubr.bf16.gmra.mrb[8].mxu0 %v1774_v20  ;;  %v926_v30 = vmul.f32 %v3907_v32, %v3907_v32  ;;  %v1491_v49 = vadd.f32 1.0, %v3825_v12  ;;  %v1495_v15 = vadd.f32 1.0, %v3834_v44  ;;  %v3053_v12 = vld [vmem:[#allocation7 + $0x174] ss:$8 sps:$4 sm:$0xff]  }
 0x190   :  { %v3919_v61 = vpop.eup %3124  ;;  %3132 = vtanh.f32 %v1319_v24  ;;  %v1122_v29 = vmul.f32 0.044715, %v1022_v43  ;;  %v1023_v56 = vmul.f32 %v923_v18, %v3900_v10  ;;  %v927_v37 = vmul.f32 %v3913_v36, %v3913_v36  ;;  %2386 = vmatpush1.bf16.msra.mxu0 %v3045_v2  ;;  %v3051_v18 = vld [vmem:[#allocation7 + $0x170] ss:$8 sps:$4 sm:$0xff]  }
 0x191   :  { %v1026_v13 = vmul.f32 %v926_v30, %v3907_v32  ;;  %v1591_v41 = vmul.f32 0.5, %v1491_v49  ;;  %v1595_v54 = vmul.f32 0.5, %v1495_v15  ;;  %v1490_v0 = vadd.f32 1.0, %v3818_v27  ;;  %2387 = vmatprep.subr.bf16.mxu0 %v3050_v16 }
 0x192   :  { %v1222_v44 = vadd.f32 %v1122_v29, %v3888_v40  ;;  %v1123_v52 = vmul.f32 0.044715, %v1023_v56  ;;  %v1027_v17 = vmul.f32 %v927_v37, %v3913_v36  ;;  %v1494_v63 = vadd.f32 1.0, %v3829_v4  ;;  %v3056_v37 = vld [vmem:[#allocation7 + $0x184] ss:$8 sps:$4 sm:$0xff]  }
 0x193   :  { %v1126_v38 = vmul.f32 0.044715, %v1026_v13  ;;  %v1691_v24 = vmul.f32 %v1591_v41, %v3724_v45  ;;  %v1695_v2 = vmul.f32 %v1595_v54, %v3738_v1  ;;  %v1590_v20 = vmul.f32 0.5, %v1490_v0  ;;  %v3931_v43 = vpop.f32.mrb[36].mxu1 }
 0x194   :  { %v1322_v30 = vmul.f32 0.7978846, %v1222_v44  ;;  %v1223_v27 = vadd.f32 %v1123_v52, %v3900_v10  ;;  %v1127_v16 = vmul.f32 0.044715, %v1027_v17  ;;  %v1594_v49 = vmul.f32 0.5, %v1494_v63  ;;  %v3934_v15 = vpop.f32.mrb[37].mxu1  ;;  %2388 = vmatpush1.bf16.msra.mxu0 %v3048_v60 }
 0x195   :  { %v1226_v29 = vadd.f32 %v1126_v38, %v3907_v32  ;;  %v1779_v4 = vpack.c.bf16 %v1695_v2, %v1691_v24  ;;  %v1690_v56 = vmul.f32 %v1590_v20, %v3720_v39  ;;  %v3939_v45 = vadd.f32 %v658_v9, %v3621_v6  ;;  %v3941_v1 = vpop.f32.mrb[38].mxu1  ;;  %2389 = vmatprep.subr.bf16.mxu0 %v3053_v12  ;;  %v3054_v38 = vld [vmem:[#allocation7 + $0x180] ss:$8 sps:$4 sm:$0xff]   ;;  %v3059_v20 = vld [vmem:[#allocation7 + $0x194] ss:$8 sps:$4 sm:$0xff]  }
 0x196   :  { %v3943_v13 = vpop.eup %3126  ;;  %3134 = vtanh.f32 %v1322_v30  ;;  %v1323_v41 = vmul.f32 0.7978846, %v1223_v27  ;;  %v1227_v54 = vadd.f32 %v1127_v16, %v3913_v36  ;;  %v1694_v60 = vmul.f32 %v1594_v49, %v3732_v55  ;;  %v3947_v0 = vpop.f32.mrb[39].mxu1 }
 0x197   :  { %v1326_v44 = vmul.f32 0.7978846, %v1226_v29  ;;  %2276 = vmatprep.mubr.bf16.mxu0 %v1779_v4  ;;  %v930_v39 = vmul.f32 %v3939_v45, %v3939_v45  ;;  %v3953_v9 = vadd.f32 %v3902_v8, %v3626_v7  ;;  %v3956_v12 = vadd.f32 %v662_v26, %v3621_v6 }
 0x198   :  { %v3958_v52 = vpop.eup %3128  ;;  %3136 = vtanh.f32 %v1323_v41  ;;  %v1327_v17 = vmul.f32 0.7978846, %v1227_v54  ;;  %v1778_v63 = vpack.c.bf16 %v1694_v60, %v1690_v56  ;;  %v3961_v55 = vadd.f32 %v664_v11, %v3626_v7  ;;  %2390 = vmatpush1.bf16.msra.mxu0 %v3051_v18 }
 0x199   :  { %v3963_v24 = vpop.eup %3130  ;;  %3138 = vtanh.f32 %v1326_v44  ;;  %v1030_v2 = vmul.f32 %v930_v39, %v3939_v45  ;;  %v931_v8 = vmul.f32 %v3953_v9, %v3953_v9  ;;  %v934_v26 = vmul.f32 %v3956_v12, %v3956_v12  ;;  %2391 = vmatprep.subr.bf16.mxu0 %v3056_v37  ;;  %v3057_v37 = vld [vmem:[#allocation7 + $0x190] ss:$8 sps:$4 sm:$0xff]  }
 0x19a   :  { %v3970_v30 = vpop.eup %3132  ;;  %3140 = vtanh.f32 %v1327_v17  ;;  %2277 = vmatmul.mubr.bf16.gmra.mrb[12].mxu0 %v1778_v63  ;;  %v935_v11 = vmul.f32 %v3961_v55, %v3961_v55  ;;  %v1499_v18 = vadd.f32 1.0, %v3856_v25  ;;  %v1503_v27 = vadd.f32 1.0, %v3870_v59  ;;  %v3062_v25 = vld [vmem:[#allocation7 + $0x1a4] ss:$8 sps:$4 sm:$0xff]  }
 0x19b   :  { %v1130_v16 = vmul.f32 0.044715, %v1030_v2  ;;  %v1031_v49 = vmul.f32 %v931_v8, %v3953_v9  ;;  %v1034_v29 = vmul.f32 %v934_v26, %v3956_v12  ;;  %v1498_v4 = vadd.f32 1.0, %v3848_v35  ;;  %v3979_v56 = vpop.f32.mrb[40].mxu1 }
 0x19c   :  { %v1035_v41 = vmul.f32 %v935_v11, %v3961_v55  ;;  %v1599_v54 = vmul.f32 0.5, %v1499_v18  ;;  %v1603_v60 = vmul.f32 0.5, %v1503_v27  ;;  %v1502_v44 = vadd.f32 1.0, %v3864_v48  ;;  %v3983_v39 = vpop.f32.mrb[41].mxu1  ;;  %2392 = vmatpush1.bf16.msra.mxu0 %v3054_v38 }
 0x19d   :  { %v1230_v59 = vadd.f32 %v1130_v16, %v3939_v45  ;;  %v1131_v17 = vmul.f32 0.044715, %v1031_v49  ;;  %v1134_v63 = vmul.f32 0.044715, %v1034_v29  ;;  %v1598_v2 = vmul.f32 0.5, %v1498_v4  ;;  %v3986_v8 = vpop.f32.mrb[42].mxu1  ;;  %2393 = vmatprep.subr.bf16.mxu0 %v3059_v20 }
 0x19e   :  { %v1135_v35 = vmul.f32 0.044715, %v1035_v41  ;;  %v1699_v26 = vmul.f32 %v1599_v54, %v3762_v34  ;;  %v1703_v11 = vmul.f32 %v1603_v60, %v3775_v57  ;;  %v1602_v18 = vmul.f32 0.5, %v1502_v44  ;;  %v3990_v27 = vpop.f32.mrb[43].mxu1 }
 0x19f   :  { %v1330_v48 = vmul.f32 0.7978846, %v1230_v59  ;;  %v1231_v38 = vadd.f32 %v1131_v17, %v3953_v9  ;;  %v1234_v62 = vadd.f32 %v1134_v63, %v3956_v12  ;;  %v1698_v16 = vmul.f32 %v1598_v2, %v3756_v22  ;;  %v3060_v22 = vld [vmem:[#allocation7 + $0x1a0] ss:$8 sps:$4 sm:$0xff]  }
 0x1a0   :  { %v3995_v49 = vpop.eup %3134  ;;  %v1235_v29 = vadd.f32 %v1135_v35, %v3961_v55  ;;  %v1783_v20 = vpack.c.bf16 %v1703_v11, %v1699_v26  ;;  %v1702_v4 = vmul.f32 %v1602_v18, %v3769_v46  ;;  %v4001_v34 = vadd.f32 %v3931_v43, %v3621_v6  ;;  %2394 = vmatpush1.bf16.msra.mxu0 %v3057_v37  ;;  %v3065_v37 = vld [vmem:[#allocation7 + $0x1b4] ss:$8 sps:$4 sm:$0xff]  }
 0x1a1   :  { %3142 = vtanh.f32 %v1330_v48  ;;  %v1331_v57 = vmul.f32 0.7978846, %v1231_v38  ;;  %v1334_v41 = vmul.f32 0.7978846, %v1234_v62  ;;  %v4005_v54 = vadd.f32 %v3934_v15, %v3626_v7  ;;  %2395 = vmatprep.subr.bf16.mxu0 %v3062_v25  ;;  %v3063_v38 = vld [vmem:[#allocation7 + $0x1b0] ss:$8 sps:$4 sm:$0xff]  }
 0x1a2   :  { %v4007_v60 = vpop.eup %3136  ;;  %v1335_v44 = vmul.f32 0.7978846, %v1235_v29  ;;  %2286 = vmatprep.mubr.bf16.mxu0 %v1783_v20  ;;  %v1782_v59 = vpack.c.bf16 %v1702_v4, %v1698_v16  ;;  %v938_v46 = vmul.f32 %v4001_v34, %v4001_v34  ;;  %v4013_v43 = vadd.f32 %v3941_v1, %v3621_v6  ;;  %v3068_v16 = vld [vmem:[#allocation7 + $0x1c4] ss:$8 sps:$4 sm:$0xff]  }
 0x1a3   :  { %v4015_v62 = vpop.eup %3138  ;;  %3144 = vtanh.f32 %v1331_v57  ;;  %v939_v15 = vmul.f32 %v4005_v54, %v4005_v54  ;;  %v4021_v25 = vadd.f32 %v3947_v0, %v3626_v7  ;;  %v1507_v17 = vadd.f32 1.0, %v3895_v3  ;;  %v4024_v63 = vpop.f32.mrb[44].mxu1 }
 0x1a4   :  { %v4026_v2 = vpop.eup %3140  ;;  %3146 = vtanh.f32 %v1334_v41  ;;  %2287 = vmatmul.mubr.bf16.gmra.mrb[16].mxu0 %v1782_v59  ;;  %v1038_v1 = vmul.f32 %v938_v46, %v4001_v34  ;;  %v942_v35 = vmul.f32 %v4013_v43, %v4013_v43  ;;  %v1511_v26 = vadd.f32 1.0, %v3919_v61  ;;  %v4032_v11 = vpop.f32.mrb[45].mxu1 }
 0x1a5   :  { %3148 = vtanh.f32 %v1335_v44  ;;  %v1039_v0 = vmul.f32 %v939_v15, %v4005_v54  ;;  %v943_v3 = vmul.f32 %v4021_v25, %v4021_v25  ;;  %v1607_v18 = vmul.f32 0.5, %v1507_v17  ;;  %v4037_v48 = vpop.f32.mrb[46].mxu1  ;;  %2396 = vmatpush1.bf16.msra.mxu0 %v3060_v22 }
 0x1a6   :  { %v1138_v29 = vmul.f32 0.044715, %v1038_v1  ;;  %v1042_v20 = vmul.f32 %v942_v35, %v4013_v43  ;;  %v1611_v4 = vmul.f32 0.5, %v1511_v26  ;;  %v1506_v61 = vadd.f32 1.0, %v3890_v50  ;;  %v4041_v57 = vpop.f32.mrb[47].mxu1  ;;  %2397 = vmatprep.subr.bf16.mxu0 %v3065_v37 }
 0x1a7   :  { %v1139_v41 = vmul.f32 0.044715, %v1039_v0  ;;  %v1043_v44 = vmul.f32 %v943_v3, %v4021_v25  ;;  %v1707_v59 = vmul.f32 %v1607_v18, %v3805_v47  ;;  %v1510_v46 = vadd.f32 1.0, %v3904_v19  ;;  %v3066_v0 = vld [vmem:[#allocation7 + $0x1c0] ss:$8 sps:$4 sm:$0xff]  }
 0x1a8   :  { %v1238_v22 = vadd.f32 %v1138_v29, %v4001_v34  ;;  %v1142_v15 = vmul.f32 0.044715, %v1042_v20  ;;  %v1711_v17 = vmul.f32 %v1611_v4, %v3822_v5  ;;  %v1606_v1 = vmul.f32 0.5, %v1506_v61  ;;  %v3071_v29 = vld [vmem:[#allocation7 + $0x1d4] ss:$8 sps:$4 sm:$0xff]  }
 0x1a9   :  { %v1239_v35 = vadd.f32 %v1139_v41, %v4005_v54  ;;  %v1143_v26 = vmul.f32 0.044715, %v1043_v44  ;;  %v1610_v50 = vmul.f32 0.5, %v1510_v46  ;;  %v4051_v37 = vadd.f32 %v3979_v56, %v3621_v6  ;;  %2398 = vmatpush1.bf16.msra.mxu0 %v3063_v38 }
 0x1aa   :  { %v1338_v3 = vmul.f32 0.7978846, %v1238_v22  ;;  %v1242_v47 = vadd.f32 %v1142_v15, %v4013_v43  ;;  %v1787_v19 = vpack.c.bf16 %v1711_v17, %v1707_v59  ;;  %v1706_v18 = vmul.f32 %v1606_v1, %v3800_v42  ;;  %2399 = vmatprep.subr.bf16.mxu0 %v3068_v16  ;;  %v3069_v17 = vld [vmem:[#allocation7 + $0x1d0] ss:$8 sps:$4 sm:$0xff]  }
 0x1ab   :  { %v4055_v5 = vpop.eup %3142  ;;  %v1339_v20 = vmul.f32 0.7978846, %v1239_v35  ;;  %v1243_v4 = vadd.f32 %v1143_v26, %v4021_v25  ;;  %v1710_v61 = vmul.f32 %v1610_v50, %v3811_v28  ;;  %v946_v56 = vmul.f32 %v4051_v37, %v4051_v37  ;;  %v4061_v38 = vpop.f32.mrb[48].mxu1  ;;  %v3074_v50 = vld [vmem:[#allocation7 + $0x1e4] ss:$8 sps:$4 sm:$0xff]  }
 0x1ac   :  { %3150 = vtanh.f32 %v1338_v3  ;;  %v1342_v41 = vmul.f32 0.7978846, %v1242_v47  ;;  %2296 = vmatprep.mubr.bf16.mxu0 %v1787_v19  ;;  %v4065_v42 = vadd.f32 %v3983_v39, %v3626_v7  ;;  %v4069_v16 = vadd.f32 %v3986_v8, %v3621_v6  ;;  %v4071_v44 = vpop.f32.mrb[49].mxu1 }
 0x1ad   :  { %v4073_v59 = vpop.eup %3144  ;;  %3152 = vtanh.f32 %v1339_v20  ;;  %v1343_v28 = vmul.f32 0.7978846, %v1243_v4  ;;  %v1786_v46 = vpack.c.bf16 %v1710_v61, %v1706_v18  ;;  %v1046_v22 = vmul.f32 %v946_v56, %v4051_v37  ;;  %v702_v15 = vpop.f32.mrb[50].mxu1  ;;  %2400 = vmatpush1.bf16.msra.mxu0 %v3066_v0 }
 0x1ae   :  { %v4076_v1 = vpop.eup %3146  ;;  %3154 = vtanh.f32 %v1342_v41  ;;  %v947_v39 = vmul.f32 %v4065_v42, %v4065_v42  ;;  %v950_v8 = vmul.f32 %v4069_v16, %v4069_v16  ;;  %v4084_v35 = vadd.f32 %v3990_v27, %v3626_v7  ;;  %v703_v26 = vpop.f32.mrb[51].mxu1  ;;  %2401 = vmatprep.subr.bf16.mxu0 %v3071_v29  ;;  %v3072_v29 = vld [vmem:[#allocation7 + $0x1e0] ss:$8 sps:$4 sm:$0xff]  }
 0x1af   :  { %v4086_v3 = vpop.eup %3148  ;;  %3156 = vtanh.f32 %v1343_v28  ;;  %2297 = vmatmul.mubr.bf16.gmra.mrb[20].mxu0 %v1786_v46  ;;  %v1146_v0 = vmul.f32 0.044715, %v1046_v22  ;;  %v1515_v47 = vadd.f32 1.0, %v3958_v52  ;;  %v1519_v19 = vadd.f32 1.0, %v3970_v30  ;;  %v3077_v52 = vld [vmem:[#allocation7 + $0x1f4] ss:$8 sps:$4 sm:$0xff]  }
 0x1b0   :  { %v1047_v18 = vmul.f32 %v947_v39, %v4065_v42  ;;  %v1050_v20 = vmul.f32 %v950_v8, %v4069_v16  ;;  %v951_v27 = vmul.f32 %v4084_v35, %v4084_v35  ;;  %v1514_v4 = vadd.f32 1.0, %v3943_v13 }
 0x1b1   :  { %v1246_v61 = vadd.f32 %v1146_v0, %v4051_v37  ;;  %v1615_v56 = vmul.f32 0.5, %v1515_v47  ;;  %v1619_v41 = vmul.f32 0.5, %v1519_v19  ;;  %v1518_v28 = vadd.f32 1.0, %v3963_v24  ;;  %2402 = vmatpush1.bf16.msra.mxu0 %v3069_v17 }
 0x1b2   :  { %v1147_v46 = vmul.f32 0.044715, %v1047_v18  ;;  %v1150_v30 = vmul.f32 0.044715, %v1050_v20  ;;  %v1051_v22 = vmul.f32 %v951_v27, %v4084_v35  ;;  %v1614_v15 = vmul.f32 0.5, %v1514_v4  ;;  %2403 = vmatprep.subr.bf16.mxu0 %v3074_v50 }
 0x1b3   :  { %v1346_v39 = vmul.f32 0.7978846, %v1246_v61  ;;  %v1715_v8 = vmul.f32 %v1615_v56, %v3854_v21  ;;  %v1719_v13 = vmul.f32 %v1619_v41, %v3862_v33  ;;  %v1618_v26 = vmul.f32 0.5, %v1518_v28  ;;  %v4100_v53 = vpop.f32.mrb[52].mxu1  ;;  %v3075_v20 = vld [vmem:[#allocation7 + $0x1f0] ss:$8 sps:$4 sm:$0xff]  }
 0x1b4   :  { %v1247_v0 = vadd.f32 %v1147_v46, %v4065_v42  ;;  %v1250_v24 = vadd.f32 %v1150_v30, %v4069_v16  ;;  %v1151_v17 = vmul.f32 0.044715, %v1051_v22  ;;  %v1714_v47 = vmul.f32 %v1614_v15, %v3845_v14  ;;  %v4105_v19 = vpop.f32.mrb[53].mxu1 }
 0x1b5   :  { %3158 = vtanh.f32 %v1346_v39  ;;  %v1791_v18 = vpack.c.bf16 %v1719_v13, %v1715_v8  ;;  %v1718_v50 = vmul.f32 %v1618_v26, %v3859_v31  ;;  %v4110_v21 = vadd.f32 %v4024_v63, %v3621_v6  ;;  %v4112_v33 = vpop.f32.mrb[54].mxu1  ;;  %2404 = vmatpush1.bf16.msra.mxu0 %v3072_v29 }
 0x1b6   :  { %v4114_v27 = vpop.eup %3150  ;;  %v1347_v4 = vmul.f32 0.7978846, %v1247_v0  ;;  %v1350_v61 = vmul.f32 0.7978846, %v1250_v24  ;;  %v1251_v14 = vadd.f32 %v1151_v17, %v4084_v35  ;;  %v4119_v56 = vadd.f32 %v4032_v11, %v3626_v7  ;;  %v4121_v41 = vpop.f32.mrb[55].mxu1  ;;  %2405 = vmatprep.subr.bf16.mxu0 %v3077_v52 }
 0x1b7   :  { %v4123_v31 = vpop.eup %3152  ;;  %2306 = vmatprep.mubr.bf16.mxu0 %v1791_v18  ;;  %v1790_v63 = vpack.c.bf16 %v1718_v50, %v1714_v47  ;;  %v954_v29 = vmul.f32 %v4110_v21, %v4110_v21  ;;  %v4129_v28 = vadd.f32 %v4037_v48, %v3621_v6  ;;  %v4133_v46 = vadd.f32 %v4041_v57, %v3626_v7 }
 0x1b8   :  { %v4135_v11 = vpop.eup %3154  ;;  %3160 = vtanh.f32 %v1347_v4  ;;  %v1351_v30 = vmul.f32 0.7978846, %v1251_v14  ;;  %v955_v52 = vmul.f32 %v4119_v56, %v4119_v56  ;;  %v1523_v22 = vadd.f32 1.0, %v4007_v60 }
 0x1b9   :  { %v4140_v15 = vpop.eup %3156  ;;  %3162 = vtanh.f32 %v1350_v61  ;;  %2307 = vmatmul.mubr.bf16.gmra.mrb[24].mxu0 %v1790_v63  ;;  %v1054_v48 = vmul.f32 %v954_v29, %v4110_v21  ;;  %v958_v39 = vmul.f32 %v4129_v28, %v4129_v28  ;;  %v959_v57 = vmul.f32 %v4133_v46, %v4133_v46 }
 0x1ba   :  { %3164 = vtanh.f32 %v1351_v30  ;;  %v1055_v8 = vmul.f32 %v955_v52, %v4119_v56  ;;  %v1527_v13 = vadd.f32 1.0, %v4026_v2  ;;  %v1623_v26 = vmul.f32 0.5, %v1523_v22  ;;  %2406 = vmatpush1.bf16.msra.mxu0 %v3075_v20 }
 0x1bb   :  { %v1154_v60 = vmul.f32 0.044715, %v1054_v48  ;;  %v1058_v0 = vmul.f32 %v958_v39, %v4129_v28  ;;  %v1059_v24 = vmul.f32 %v959_v57, %v4133_v46  ;;  %v1522_v17 = vadd.f32 1.0, %v3995_v49  ;;  %v4152_v47 = vpop.f32.mrb[56].mxu1 }
 0x1bc   :  { %v1155_v18 = vmul.f32 0.044715, %v1055_v8  ;;  %v1627_v50 = vmul.f32 0.5, %v1527_v13  ;;  %v1723_v4 = vmul.f32 %v1623_v26, %v3900_v10  ;;  %v1526_v61 = vadd.f32 1.0, %v4015_v62  ;;  %v4156_v14 = vpop.f32.mrb[57].mxu1 }
 0x1bd   :  { %v1254_v2 = vadd.f32 %v1154_v60, %v4110_v21  ;;  %v1158_v20 = vmul.f32 0.044715, %v1058_v0  ;;  %v1159_v63 = vmul.f32 0.044715, %v1059_v24  ;;  %v1622_v29 = vmul.f32 0.5, %v1522_v17  ;;  %v4159_v30 = vpop.f32.mrb[58].mxu1 }
 0x1be   :  { %v1255_v52 = vadd.f32 %v1155_v18, %v4119_v56  ;;  %v1727_v49 = vmul.f32 %v1627_v50, %v3913_v36  ;;  %v1626_v22 = vmul.f32 0.5, %v1526_v61  ;;  %v4165_v48 = vadd.f32 %v4061_v38, %v3621_v6  ;;  %v4167_v10 = vpop.f32.mrb[59].mxu1 }
 0x1bf   :  { %v4169_v62 = vpop.eup %3158  ;;  %v1354_v39 = vmul.f32 0.7978846, %v1254_v2  ;;  %v1258_v57 = vadd.f32 %v1158_v20, %v4129_v28  ;;  %v1259_v8 = vadd.f32 %v1159_v63, %v4133_v46  ;;  %v1722_v13 = vmul.f32 %v1622_v29, %v3888_v40 }
 0x1c0   :  { %v1355_v26 = vmul.f32 0.7978846, %v1255_v52  ;;  %v1795_v60 = vpack.c.bf16 %v1727_v49, %v1723_v4  ;;  %v1726_v36 = vmul.f32 %v1626_v22, %v3907_v32  ;;  %v962_v0 = vmul.f32 %v4165_v48, %v4165_v48 }
 0x1c1   :  { %3166 = vtanh.f32 %v1354_v39  ;;  %v1358_v6 = vmul.f32 0.7978846, %v1258_v57  ;;  %v1359_v38 = vmul.f32 0.7978846, %v1259_v8  ;;  %v4179_v24 = vadd.f32 %v4071_v44, %v3626_v7 }
 0x1c2   :  { %v4181_v17 = vpop.eup %3160  ;;  %3168 = vtanh.f32 %v1355_v26  ;;  %2316 = vmatprep.mubr.bf16.mxu0 %v1795_v60  ;;  %v1794_v18 = vpack.c.bf16 %v1726_v36, %v1722_v13  ;;  %v1062_v40 = vmul.f32 %v962_v0, %v4165_v48  ;;  %v1531_v50 = vadd.f32 1.0, %v4073_v59 }
 0x1c3   :  { %v4185_v32 = vpop.eup %3162  ;;  %3170 = vtanh.f32 %v1358_v6  ;;  %v963_v4 = vmul.f32 %v4179_v24, %v4179_v24  ;;  %v1535_v61 = vadd.f32 1.0, %v4086_v3  ;;  %v1530_v7 = vadd.f32 1.0, %v4055_v5  ;;  %v4191_v44 = vpop.f32.mrb[60].mxu1 }
 0x1c4   :  { %v4193_v2 = vpop.eup %3164  ;;  %3172 = vtanh.f32 %v1359_v38  ;;  %2317 = vmatmul.mubr.bf16.gmra.mrb[28].mxu0 %v1794_v18  ;;  %v1162_v20 = vmul.f32 0.044715, %v1062_v40  ;;  %v1631_v63 = vmul.f32 0.5, %v1531_v50  ;;  %v1534_v59 = vadd.f32 1.0, %v4076_v1  ;;  %v4196_v29 = vpop.f32.mrb[61].mxu1 }
 0x1c5   :  { %v1063_v52 = vmul.f32 %v963_v4, %v4179_v24  ;;  %v1635_v49 = vmul.f32 0.5, %v1535_v61  ;;  %v1630_v22 = vmul.f32 0.5, %v1530_v7  ;;  %v4201_v3 = vadd.f32 %v4100_v53, %v3682_v58  ;;  %v4203_v5 = vpop.f32.mrb[62].mxu1 }
 0x1c6   :  { %v1262_v39 = vadd.f32 %v1162_v20, %v4165_v48  ;;  %v1731_v57 = vmul.f32 %v1631_v63, %v3953_v9  ;;  %v1634_v8 = vmul.f32 0.5, %v1534_v59  ;;  %v4209_v1 = vadd.f32 %v4105_v19, %v3713_v23  ;;  %v4211_v13 = vpop.f32.mrb[63].mxu1 }
 0x1c7   :  { %v1163_v26 = vmul.f32 0.044715, %v1063_v52  ;;  %v1735_v60 = vmul.f32 %v1635_v49, %v3961_v55  ;;  %v1730_v36 = vmul.f32 %v1630_v22, %v3939_v45  ;;  %v868_v53 = vmul.f32 %v4201_v3, %v4201_v3 }
 0x1c8   :  { %v1362_v0 = vmul.f32 0.7978846, %v1262_v39  ;;  %v1734_v6 = vmul.f32 %v1634_v8, %v3956_v12  ;;  %v869_v9 = vmul.f32 %v4209_v1, %v4209_v1  ;;  %v4222_v19 = vadd.f32 %v4112_v33, %v3682_v58 }
 0x1c9   :  { %v1263_v38 = vadd.f32 %v1163_v26, %v4179_v24  ;;  %v1799_v18 = vpack.c.bf16 %v1735_v60, %v1731_v57  ;;  %v968_v55 = vmul.f32 %v868_v53, %v4201_v3  ;;  %v4228_v45 = vadd.f32 %v4121_v41, %v3713_v23 }
 0x1ca   :  { %3174 = vtanh.f32 %v1362_v0  ;;  %v1798_v40 = vpack.c.bf16 %v1734_v6, %v1730_v36  ;;  %v969_v12 = vmul.f32 %v869_v9, %v4209_v1  ;;  %v872_v50 = vmul.f32 %v4222_v19, %v4222_v19 }
 0x1cb   :  { %v4233_v4 = vpop.eup %3166  ;;  %v1363_v33 = vmul.f32 0.7978846, %v1263_v38  ;;  %2326 = vmatprep.mubr.bf16.mxu0 %v1799_v18  ;;  %v1068_v61 = vmul.f32 0.044715, %v968_v55  ;;  %v873_v7 = vmul.f32 %v4228_v45, %v4228_v45  ;;  %v1539_v20 = vadd.f32 1.0, %v4123_v31  ;;  %v4238_v63 = vpop.f32.mrb[64].mxu1 }
 0x1cc   :  { %v4240_v41 = vpop.eup %3168  ;;  %2327 = vmatmul.mubr.bf16.gmra.mrb[32].mxu0 %v1798_v40  ;;  %v1069_v59 = vmul.f32 0.044715, %v969_v12  ;;  %v972_v52 = vmul.f32 %v872_v50, %v4222_v19  ;;  %v1543_v49 = vadd.f32 1.0, %v4140_v15  ;;  %v1538_v22 = vadd.f32 1.0, %v4114_v27  ;;  %v4245_v39 = vpop.f32.mrb[65].mxu1 }
 0x1cd   :  { %v4247_v57 = vpop.eup %3170  ;;  %3176 = vtanh.f32 %v1363_v33  ;;  %v1168_v8 = vadd.f32 %v1068_v61, %v4201_v3  ;;  %v973_v31 = vmul.f32 %v873_v7, %v4228_v45  ;;  %v1639_v26 = vmul.f32 0.5, %v1539_v20  ;;  %v4251_v60 = vpop.f32.mrb[66].mxu1 }
 0x1ce   :  { %v4253_v36 = vpop.eup %3172  ;;  %v1169_v53 = vadd.f32 %v1069_v59, %v4209_v1  ;;  %v1072_v0 = vmul.f32 0.044715, %v972_v52  ;;  %v1643_v15 = vmul.f32 0.5, %v1543_v49  ;;  %v1542_v27 = vadd.f32 1.0, %v4135_v11  ;;  %v4257_v6 = vpop.f32.mrb[67].mxu1 }
 0x1cf   :  { %v1268_v9 = vmul.f32 0.7978846, %v1168_v8  ;;  %v1073_v38 = vmul.f32 0.044715, %v973_v31  ;;  %v1739_v18 = vmul.f32 %v1639_v26, %v4005_v54  ;;  %v1638_v55 = vmul.f32 0.5, %v1538_v22 }
 0x1d0   :  { %v1269_v40 = vmul.f32 0.7978846, %v1169_v53  ;;  %v1172_v12 = vadd.f32 %v1072_v0, %v4222_v19  ;;  %v1743_v50 = vmul.f32 %v1643_v15, %v4021_v25  ;;  %v1642_v33 = vmul.f32 0.5, %v1542_v27 }
 0x1d1   :  { %3178 = vtanh.f32 %v1268_v9  ;;  %v1173_v61 = vadd.f32 %v1073_v38, %v4228_v45  ;;  %v1738_v7 = vmul.f32 %v1638_v55, %v4001_v34  ;;  %v4266_v11 = vadd.f32 %v4152_v47, %v3682_v58 }
 0x1d2   :  { %3180 = vtanh.f32 %v1269_v40  ;;  %v1272_v20 = vmul.f32 0.7978846, %v1172_v12  ;;  %v1803_v59 = vpack.c.bf16 %v1743_v50, %v1739_v18  ;;  %v1742_v54 = vmul.f32 %v1642_v33, %v4013_v43 }
 0x1d3   :  { %v1273_v52 = vmul.f32 0.7978846, %v1173_v61  ;;  %v876_v49 = vmul.f32 %v4266_v11, %v4266_v11  ;;  %v4273_v25 = vadd.f32 %v4156_v14, %v3713_v23  ;;  %v4277_v34 = vadd.f32 %v4159_v30, %v3682_v58  ;;  %v4279_v22 = vpop.f32.mrb[68].mxu1 }
 0x1d4   :  { %v4281_v47 = vpop.eup %3174  ;;  %3182 = vtanh.f32 %v1272_v20  ;;  %2336 = vmatprep.mubr.bf16.mxu0 %v1803_v59  ;;  %v1802_v8 = vpack.c.bf16 %v1742_v54, %v1738_v7  ;;  %v4285_v43 = vadd.f32 %v4167_v10, %v3713_v23  ;;  %v1547_v31 = vadd.f32 1.0, %v4181_v17  ;;  %v4288_v26 = vpop.f32.mrb[69].mxu1 }
 0x1d5   :  { %3184 = vtanh.f32 %v1273_v52  ;;  %v976_v14 = vmul.f32 %v876_v49, %v4266_v11  ;;  %v877_v30 = vmul.f32 %v4273_v25, %v4273_v25  ;;  %v880_v53 = vmul.f32 %v4277_v34, %v4277_v34  ;;  %v4295_v0 = vpop.f32.mrb[70].mxu1 }
 0x1d6   :  { %2337 = vmatmul.mubr.bf16.gmra.mrb[36].mxu0 %v1802_v8  ;;  %v881_v10 = vmul.f32 %v4285_v43, %v4285_v43  ;;  %v1551_v15 = vadd.f32 1.0, %v4193_v2  ;;  %v1647_v17 = vmul.f32 0.5, %v1547_v31  ;;  %v1546_v27 = vadd.f32 1.0, %v4169_v62  ;;  %v4301_v9 = vpop.f32.mrb[71].mxu1 }
 0x1d7   :  { %v4303_v38 = vpop.eup %3176  ;;  %v1076_v18 = vmul.f32 0.044715, %v976_v14  ;;  %v977_v55 = vmul.f32 %v877_v30, %v4273_v25  ;;  %v980_v40 = vmul.f32 %v880_v53, %v4277_v34  ;;  %v1550_v12 = vadd.f32 1.0, %v4185_v32 }
 0x1d8   :  { %v981_v50 = vmul.f32 %v881_v10, %v4285_v43  ;;  %v1651_v33 = vmul.f32 0.5, %v1551_v15  ;;  %v1747_v61 = vmul.f32 %v1647_v17, %v4065_v42  ;;  %v1646_v2 = vmul.f32 0.5, %v1546_v27 }
 0x1d9   :  { %v1176_v7 = vadd.f32 %v1076_v18, %v4266_v11  ;;  %v1077_v62 = vmul.f32 0.044715, %v977_v55  ;;  %v1080_v20 = vmul.f32 0.044715, %v980_v40  ;;  %v1650_v59 = vmul.f32 0.5, %v1550_v12 }
 0x1da   :  { %v1081_v54 = vmul.f32 0.044715, %v981_v50  ;;  %v1751_v52 = vmul.f32 %v1651_v33, %v4084_v35  ;;  %v1746_v49 = vmul.f32 %v1646_v2, %v4051_v37  ;;  %v4315_v8 = vadd.f32 %v4191_v44, %v3682_v58 }
 0x1db   :  { %v3179_v32 = vpop.eup %3178  ;;  %v1276_v31 = vmul.f32 0.7978846, %v1176_v7  ;;  %v1177_v14 = vadd.f32 %v1077_v62, %v4273_v25  ;;  %v1180_v42 = vadd.f32 %v1080_v20, %v4277_v34  ;;  %v1750_v30 = vmul.f32 %v1650_v59, %v4069_v16  ;;  %v4320_v53 = vpop.f32.mrb[72].mxu1 }
 0x1dc   :  { %v4322_v10 = vpop.eup %3180  ;;  %v1468_v15 = vadd.f32 1.0, %v3179_v32  ;;  %v1181_v35 = vadd.f32 %v1081_v54, %v4285_v43  ;;  %v1807_v37 = vpack.c.bf16 %v1751_v52, %v1747_v61  ;;  %v884_v44 = vmul.f32 %v4315_v8, %v4315_v8  ;;  %v4327_v17 = vpop.f32.mrb[73].mxu1 }
 0x1dd   :  { %3186 = vtanh.f32 %v1276_v31  ;;  %v1277_v27 = vmul.f32 0.7978846, %v1177_v14  ;;  %v1280_v18 = vmul.f32 0.7978846, %v1180_v42  ;;  %v1806_v55 = vpack.c.bf16 %v1750_v30, %v1746_v49  ;;  %v4329_v40 = vpop.f32.mrb[74].mxu1 }
 0x1de   :  { %v3183_v16 = vpop.eup %3182  ;;  %v1568_v12 = vmul.f32 0.5, %v1468_v15  ;;  %v1281_v50 = vmul.f32 0.7978846, %v1181_v35  ;;  %2346 = vmatprep.mubr.bf16.mxu0 %v1807_v37  ;;  %v984_v33 = vmul.f32 %v884_v44, %v4315_v8  ;;  %v4334_v61 = vadd.f32 %v4196_v29, %v3713_v23  ;;  %v4336_v2 = vpop.f32.mrb[75].mxu1 }
 0x1df   :  { %v4338_v7 = vpop.eup %3184  ;;  %v1472_v62 = vadd.f32 1.0, %v3183_v16  ;;  %3188 = vtanh.f32 %v1277_v27  ;;  %2347 = vmatmul.mubr.bf16.gmra.mrb[40].mxu0 %v1806_v55  ;;  %v4342_v20 = vadd.f32 %v4203_v5, %v3682_v58  ;;  %v4346_v59 = vadd.f32 %v4211_v13, %v3713_v23 }
 0x1e0   :  { %v4349_v54 = vmul.f32 %v1568_v12, %v4201_v3  ;;  %3190 = vtanh.f32 %v1280_v18  ;;  %v1084_v29 = vmul.f32 0.044715, %v984_v33  ;;  %v885_v52 = vmul.f32 %v4334_v61, %v4334_v61 }
 0x1e1   :  { %v1572_v49 = vmul.f32 0.5, %v1472_v62  ;;  %3192 = vtanh.f32 %v1281_v50  ;;  %v888_v32 = vmul.f32 %v4342_v20, %v4342_v20  ;;  %v889_v5 = vmul.f32 %v4346_v59, %v4346_v59 }
 0x1e2   :  { %v1184_v31 = vadd.f32 %v1084_v29, %v4315_v8  ;;  %v985_v13 = vmul.f32 %v885_v52, %v4334_v61  ;;  %v1555_v3 = vadd.f32 1.0, %v4240_v41  ;;  %v1559_v14 = vadd.f32 1.0, %v4253_v36 }
 0x1e3   :  { %v4362_v42 = vmul.f32 %v1572_v49, %v4222_v19  ;;  %v988_v30 = vmul.f32 %v888_v32, %v4342_v20  ;;  %v989_v15 = vmul.f32 %v889_v5, %v4346_v59  ;;  %v1554_v35 = vadd.f32 1.0, %v4233_v4  ;;  %v4367_v37 = vpop.f32.mrb[76].mxu1 }
 0x1e4   :  { %v1284_v44 = vmul.f32 0.7978846, %v1184_v31  ;;  %v1085_v27 = vmul.f32 0.044715, %v985_v13  ;;  %v1655_v18 = vmul.f32 0.5, %v1555_v3  ;;  %v1659_v55 = vmul.f32 0.5, %v1559_v14 }
 0x1e5   :  { %v1088_v16 = vmul.f32 0.044715, %v988_v30  ;;  %v1089_v36 = vmul.f32 0.044715, %v989_v15  ;;  %v1558_v19 = vadd.f32 1.0, %v4247_v57  ;;  %v4372_v12 = vpop.f32.mrb[77].mxu1  ;;  %v4387_v3 = vadd.f32 %v4238_v63, %v3682_v58 }
 0x1e6   :  { %3194 = vtanh.f32 %v1284_v44  ;;  %v1185_v50 = vadd.f32 %v1085_v27, %v4334_v61  ;;  %v1755_v4 = vmul.f32 %v1655_v18, %v4119_v56  ;;  %v1759_v33 = vmul.f32 %v1659_v55, %v4133_v46  ;;  %v4377_v62 = vpop.f32.mrb[78].mxu1 }
 0x1e7   :  { %v4379_v29 = vpop.eup %3186  ;;  %v1188_v52 = vadd.f32 %v1088_v16, %v4342_v20  ;;  %v1189_v49 = vadd.f32 %v1089_v36, %v4346_v59  ;;  %v1654_v32 = vmul.f32 0.5, %v1554_v35  ;;  %v1658_v5 = vmul.f32 0.5, %v1558_v19  ;;  %v4383_v57 = vpop.f32.mrb[79].mxu1 }
 0x1e8   :  { %v1285_v31 = vmul.f32 0.7978846, %v1185_v50  ;;  %v1811_v13 = vpack.c.bf16 %v1759_v33, %v1755_v4  ;;  %v4391_v56 = vadd.f32 %v4245_v39, %v3713_v23  ;;  %v892_v63 = vmul.f32 %v4387_v3, %v4387_v3 }
 0x1e9   :  { %v4393_v46 = vpop.eup %3188  ;;  %v1288_v14 = vmul.f32 0.7978846, %v1188_v52  ;;  %v1289_v30 = vmul.f32 0.7978846, %v1189_v49  ;;  %v1754_v15 = vmul.f32 %v1654_v32, %v4110_v21  ;;  %v1758_v35 = vmul.f32 %v1658_v5, %v4129_v28 }
 0x1ea   :  { %v4397_v44 = vpop.eup %3190  ;;  %3196 = vtanh.f32 %v1285_v31  ;;  %2356 = vmatprep.mubr.bf16.mxu0 %v1811_v13  ;;  %v893_v27 = vmul.f32 %v4391_v56, %v4391_v56  ;;  %v1563_v39 = vadd.f32 1.0, %v4303_v38  ;;  %v4408_v21 = vadd.f32 %v4251_v60, %v3682_v58 }
 0x1eb   :  { %v4404_v18 = vpop.eup %3192  ;;  %3198 = vtanh.f32 %v1288_v14  ;;  %v1810_v55 = vpack.c.bf16 %v1758_v35, %v1754_v15  ;;  %v4412_v28 = vadd.f32 %v4257_v6, %v3713_v23  ;;  %v4414_v16 = vpop.f32.mrb[80].mxu1  ;;  %v992_v36 = vmul.f32 %v892_v63, %v4387_v3 }
 0x1ec   :  { %3200 = vtanh.f32 %v1289_v30  ;;  %v993_v19 = vmul.f32 %v893_v27, %v4391_v56  ;;  %v1663_v38 = vmul.f32 0.5, %v1563_v39  ;;  %v4418_v50 = vpop.f32.mrb[81].mxu1  ;;  %v896_v4 = vmul.f32 %v4408_v21, %v4408_v21 }
 0x1ed   :  { %2357 = vmatmul.mubr.bf16.gmra.mrb[44].mxu0 %v1810_v55  ;;  %v897_v60 = vmul.f32 %v4412_v28, %v4412_v28  ;;  %v1562_v6 = vadd.f32 1.0, %v4281_v47  ;;  %v4427_v33 = vadd.f32 %v4279_v22, %v3682_v58  ;;  %v4429_v52 = vpop.f32.mrb[82].mxu1  ;;  %v1092_v49 = vmul.f32 0.044715, %v992_v36 }
 0x1ee   :  { %v1093_v32 = vmul.f32 0.044715, %v993_v19  ;;  %v1763_v5 = vmul.f32 %v1663_v38, %v4179_v24  ;;  %v4434_v31 = vadd.f32 %v4288_v26, %v3713_v23  ;;  %v4436_v13 = vpop.f32.mrb[83].mxu1  ;;  %v996_v14 = vmul.f32 %v896_v4, %v4408_v21 }
 0x1ef   :  { %v997_v47 = vmul.f32 %v897_v60, %v4412_v28  ;;  %v1662_v30 = vmul.f32 0.5, %v1562_v6  ;;  %v900_v22 = vmul.f32 %v4427_v33, %v4427_v33  ;;  %v1192_v35 = vadd.f32 %v1092_v49, %v4387_v3 }
 0x1f0   :  { %v4442_v15 = vpop.eup %3194  ;;  %v1193_v24 = vadd.f32 %v1093_v32, %v4391_v56  ;;  %v1815_v63 = vpack.c.bf16 %v1763_v5, %v1763_v5  ;;  %v901_v26 = vmul.f32 %v4434_v31, %v4434_v31  ;;  %v1096_v27 = vmul.f32 0.044715, %v996_v14 }
 0x1f1   :  { %v1097_v39 = vmul.f32 0.044715, %v997_v47  ;;  %v1762_v55 = vmul.f32 %v1662_v30, %v4165_v48  ;;  %v1000_v36 = vmul.f32 %v900_v22, %v4427_v33  ;;  %v1292_v19 = vmul.f32 0.7978846, %v1192_v35 }
 0x1f2   :  { %v1293_v38 = vmul.f32 0.7978846, %v1193_v24  ;;  %2366 = vmatprep.mubr.bf16.mxu0 %v1815_v63  ;;  %v1001_v4 = vmul.f32 %v901_v26, %v4434_v31  ;;  %v4453_v60 = vadd.f32 %v4295_v0, %v3682_v58  ;;  %v1196_v6 = vadd.f32 %v1096_v27, %v4408_v21 }
 0x1f3   :  { %v1197_v49 = vadd.f32 %v1097_v39, %v4412_v28  ;;  %v1814_v32 = vpack.c.bf16 %v1762_v55, %v1762_v55  ;;  %v1100_v5 = vmul.f32 0.044715, %v1000_v36  ;;  %v4457_v14 = vpop.f32.mrb[84].mxu1  ;;  %3202 = vtanh.f32 %v1292_v19 }
 0x1f4   :  { %v4459_v48 = vpop.eup %3196  ;;  %v1101_v47 = vmul.f32 0.044715, %v1001_v4  ;;  %v904_v30 = vmul.f32 %v4453_v60, %v4453_v60  ;;  %v4465_v22 = vadd.f32 %v4301_v9, %v3713_v23  ;;  %v4467_v0 = vpop.f32.mrb[85].mxu1  ;;  %3204 = vtanh.f32 %v1293_v38 }
 0x1f5   :  { %v4469_v35 = vpop.eup %3198  ;;  %v1296_v24 = vmul.f32 0.7978846, %v1196_v6  ;;  %v1297_v63 = vmul.f32 0.7978846, %v1197_v49  ;;  %2367 = vmatmul.mubr.bf16.gmra.mrb[48].mxu0 %v1814_v32  ;;  %v1200_v26 = vadd.f32 %v1100_v5, %v4427_v33  ;;  %v4472_v27 = vpop.f32.mrb[86].mxu1  ;;  %v1469_v19 = vadd.f32 1.0, %v4322_v10 }
 0x1f6   :  { %v4474_v39 = vpop.eup %3200  ;;  %v1201_v55 = vadd.f32 %v1101_v47, %v4434_v31  ;;  %v1004_v36 = vmul.f32 %v904_v30, %v4453_v60  ;;  %v905_v9 = vmul.f32 %v4465_v22, %v4465_v22  ;;  %v4481_v4 = vpop.f32.mrb[87].mxu1  ;;  %v1473_v6 = vadd.f32 1.0, %v4338_v7 }
 0x1f7   :  { %3206 = vtanh.f32 %v1296_v24  ;;  %v1300_v38 = vmul.f32 0.7978846, %v1200_v26  ;;  %v4486_v49 = vadd.f32 %v4320_v53, %v3682_v58  ;;  %v1569_v30 = vmul.f32 0.5, %v1469_v19 }
 0x1f8   :  { %3208 = vtanh.f32 %v1297_v63  ;;  %v1301_v32 = vmul.f32 0.7978846, %v1201_v55  ;;  %v1104_v5 = vmul.f32 0.044715, %v1004_v36  ;;  %v1005_v47 = vmul.f32 %v905_v9, %v4465_v22 }
 0x1f9   :  { %4992 = vst [vmem:[#allocation13_spill] sm:$0xff] %v4486_v49  ;;  %3210 = vtanh.f32 %v1300_v38  ;;  %v1573_v41 = vmul.f32 0.5, %v1473_v6  ;;  %v908_v10 = vmul.f32 %v4486_v49, %v4486_v49  ;;  %v4494_v7 = vadd.f32 %v4327_v17, %v3713_v23 }
 0x1fa   :  { %3212 = vtanh.f32 %v1301_v32  ;;  %v1204_v24 = vadd.f32 %v1104_v5, %v4453_v60  ;;  %v1105_v26 = vmul.f32 0.044715, %v1005_v47  ;;  %v1669_v53 = vmul.f32 %v1569_v30, %v4209_v1 }
 0x1fb   :  { %v1673_v63 = vmul.f32 %v1573_v41, %v4228_v45  ;;  %v1008_v55 = vmul.f32 %v908_v10, %v4486_v49  ;;  %v4501_v36 = vadd.f32 %v4329_v40, %v3682_v58  ;;  %v4503_v9 = vpop.f32.mrb[88].mxu1  ;;  %v909_v6 = vmul.f32 %v4494_v7, %v4494_v7 }
 0x1fc   :  { %v1304_v19 = vmul.f32 0.7978846, %v1204_v24  ;;  %v1205_v38 = vadd.f32 %v1105_v26, %v4465_v22  ;;  %v4510_v17 = vadd.f32 %v4336_v2, %v3713_v23  ;;  %v4512_v1 = vpop.f32.mrb[89].mxu1  ;;  %v1477_v32 = vadd.f32 1.0, %v4393_v46 }
 0x1fd   :  { %v1769_v45 = vpack.c.bf16 %v1673_v63, %v1669_v53  ;;  %v1108_v41 = vmul.f32 0.044715, %v1008_v55  ;;  %v912_v40 = vmul.f32 %v4501_v36, %v4501_v36  ;;  %v4517_v5 = vpop.f32.mrb[90].mxu1  ;;  %v4519_v47 = vpop.eup %3202  ;;  %v1009_v10 = vmul.f32 %v909_v6, %v4494_v7 }
 0x1fe   :  { %4993 = vst [vmem:[#allocation14_spill] sm:$0xff] %v4517_v5  ;;  %3214 = vtanh.f32 %v1304_v19  ;;  %v1305_v30 = vmul.f32 0.7978846, %v1205_v38  ;;  %v913_v2 = vmul.f32 %v4510_v17, %v4510_v17  ;;  %v4524_v24 = vpop.f32.mrb[91].mxu1  ;;  %v4526_v26 = vpop.eup %3204  ;;  %v1481_v63 = vadd.f32 1.0, %v4404_v18 }
 0x1ff   :  { %4994 = vst [vmem:[#allocation15_spill] sm:$0xff] %v4524_v24  ;;  %2407 = vmatprep.mubr.bf16.mxu0 %v1769_v45  ;;  %v1208_v53 = vadd.f32 %v1108_v41, %v4486_v49  ;;  %v1012_v46 = vmul.f32 %v912_v40, %v4501_v36  ;;  %v1577_v55 = vmul.f32 0.5, %v1477_v32  ;;  %v4995_v19 = vpack.c.bf16 %v4362_v42, %v4349_v54 }
 0x200   :  { %3216 = vtanh.f32 %v1305_v30  ;;  %v1109_v38 = vmul.f32 0.044715, %v1009_v10  ;;  %v1013_v6 = vmul.f32 %v913_v2, %v4510_v17  ;;  %v1476_v51 = vadd.f32 1.0, %v4379_v29 }
 0x201   :  { %2408 = vmatmul.mubr.bf16.vlgmr.msra.gmra.mrb[0].mxu0 %v4995_v19  ;;  %v4536_v24 = vpop.eup %3206  ;;  %v1308_v45 = vmul.f32 0.7978846, %v1208_v53  ;;  %v1112_v5 = vmul.f32 0.044715, %v1012_v46  ;;  %v1581_v41 = vmul.f32 0.5, %v1481_v63  ;;  %v1677_v40 = vmul.f32 %v1577_v55, %v4273_v25 }
 0x202   :  { %v4539_v49 = vpop.eup %3208  ;;  %v1209_v18 = vadd.f32 %v1109_v38, %v4494_v7  ;;  %v1113_v32 = vmul.f32 0.044715, %v1013_v6  ;;  %v1480_v54 = vadd.f32 1.0, %v4397_v44  ;;  %v1576_v42 = vmul.f32 0.5, %v1476_v51 }
 0x203   :  { %v4543_v30 = vpop.eup %3210  ;;  %3218 = vtanh.f32 %v1308_v45  ;;  %v1212_v29 = vadd.f32 %v1112_v5, %v4501_v36  ;;  %v1681_v10 = vmul.f32 %v1581_v41, %v4285_v43  ;;  %v4549_v2 = vadd.f32 %v4367_v37, %v3682_v58  ;;  %v4551_v25 = vpop.f32.mrb[92].mxu1 }
 0x204   :  { %v4553_v53 = vpop.eup %3212  ;;  %v1309_v46 = vmul.f32 0.7978846, %v1209_v18  ;;  %v1213_v63 = vadd.f32 %v1113_v32, %v4510_v17  ;;  %v1580_v44 = vmul.f32 0.5, %v1480_v54  ;;  %v1676_v51 = vmul.f32 %v1576_v42, %v4266_v11  ;;  %v4557_v55 = vpop.f32.mrb[93].mxu1 }
 0x205   :  { %v1312_v19 = vmul.f32 0.7978846, %v1212_v29  ;;  %v1773_v5 = vpack.c.bf16 %v1681_v10, %v1677_v40  ;;  %v916_v43 = vmul.f32 %v4549_v2, %v4549_v2  ;;  %v4563_v37 = vadd.f32 %v4372_v12, %v3713_v23  ;;  %v4565_v38 = vpop.f32.mrb[94].mxu1 }
 0x206   :  { %3220 = vtanh.f32 %v1309_v46  ;;  %v1313_v6 = vmul.f32 0.7978846, %v1213_v63  ;;  %v1680_v45 = vmul.f32 %v1580_v44, %v4277_v34  ;;  %v4570_v11 = vadd.f32 %v4377_v62, %v3682_v58  ;;  %v4572_v41 = vpop.f32.mrb[95].mxu1 }
 0x207   :  { %4996 = vst [vmem:[#allocation16_spill] sm:$0xff] %v4572_v41  ;;  %3222 = vtanh.f32 %v1312_v19  ;;  %2417 = vmatprep.mubr.bf16.mxu0 %v1773_v5  ;;  %v1016_v40 = vmul.f32 %v916_v43, %v4549_v2  ;;  %v917_v12 = vmul.f32 %v4563_v37, %v4563_v37  ;;  %v4579_v18 = vadd.f32 %v4383_v57, %v3713_v23 }
 0x208   :  { %v4581_v32 = vpop.eup %3214  ;;  %3224 = vtanh.f32 %v1313_v6  ;;  %v1772_v34 = vpack.c.bf16 %v1680_v45, %v1676_v51  ;;  %v920_v62 = vmul.f32 %v4570_v11, %v4570_v11  ;;  %v1485_v54 = vadd.f32 1.0, %v4459_v48 }
 0x209   :  { %v1116_v42 = vmul.f32 0.044715, %v1016_v40  ;;  %v1017_v29 = vmul.f32 %v917_v12, %v4563_v37  ;;  %v921_v10 = vmul.f32 %v4579_v18, %v4579_v18  ;;  %v1489_v46 = vadd.f32 1.0, %v4474_v39 }
 0x20a   :  { %v4590_v63 = vpop.eup %3216  ;;  %2418 = vmatmul.mubr.bf16.gmra.mrb[4].mxu0 %v1772_v34  ;;  %v1020_v57 = vmul.f32 %v920_v62, %v4570_v11  ;;  %v1585_v44 = vmul.f32 0.5, %v1485_v54  ;;  %v1484_v51 = vadd.f32 1.0, %v4442_v15  ;;  %v1488_v19 = vadd.f32 1.0, %v4469_v35 }
 0x20b   :  { %v1216_v48 = vadd.f32 %v1116_v42, %v4549_v2  ;;  %v1117_v5 = vmul.f32 0.044715, %v1017_v29  ;;  %v1021_v43 = vmul.f32 %v921_v10, %v4579_v18  ;;  %v1589_v6 = vmul.f32 0.5, %v1489_v46  ;;  %v4597_v45 = vpop.f32.mrb[96].mxu1 }
 0x20c   :  { %v1120_v40 = vmul.f32 0.044715, %v1020_v57  ;;  %v1685_v39 = vmul.f32 %v1585_v44, %v4334_v61  ;;  %v1584_v12 = vmul.f32 0.5, %v1484_v51  ;;  %v1588_v34 = vmul.f32 0.5, %v1488_v19  ;;  %v4600_v41 = vpop.f32.mrb[97].mxu1 }
 0x20d   :  { %v4602_v62 = vpop.eup %3218  ;;  %v1316_v15 = vmul.f32 0.7978846, %v1216_v48  ;;  %v1217_v35 = vadd.f32 %v1117_v5, %v4563_v37  ;;  %v1121_v54 = vmul.f32 0.044715, %v1021_v43  ;;  %v1689_v42 = vmul.f32 %v1589_v6, %v4346_v59  ;;  %v4606_v29 = vpop.f32.mrb[98].mxu1 }
 0x20e   :  { %v1220_v10 = vadd.f32 %v1120_v40, %v4570_v11  ;;  %v1684_v46 = vmul.f32 %v1584_v12, %v4315_v8  ;;  %v1688_v61 = vmul.f32 %v1588_v34, %v4342_v20  ;;  %v4613_v57 = vadd.f32 %v4414_v16, %v3682_v58  ;;  %v4615_v44 = vpop.f32.mrb[99].mxu1 }
 0x20f   :  { %4997 = vst [vmem:[#allocation17_spill] sm:$0xff] %v4615_v44  ;;  %3226 = vtanh.f32 %v1316_v15  ;;  %v1317_v51 = vmul.f32 0.7978846, %v1217_v35  ;;  %v1221_v19 = vadd.f32 %v1121_v54, %v4579_v18  ;;  %v1777_v48 = vpack.c.bf16 %v1689_v42, %v1685_v39 }
 0x210   :  { %v4618_v59 = vpop.eup %3220  ;;  %v1320_v5 = vmul.f32 0.7978846, %v1220_v10  ;;  %v1776_v43 = vpack.c.bf16 %v1688_v61, %v1684_v46  ;;  %v924_v8 = vmul.f32 %v4613_v57, %v4613_v57  ;;  %v4624_v20 = vadd.f32 %v4418_v50, %v3713_v23 }
 0x211   :  { %v4626_v16 = vpop.eup %3222  ;;  %3228 = vtanh.f32 %v1317_v51  ;;  %v1321_v6 = vmul.f32 0.7978846, %v1221_v19  ;;  %2427 = vmatprep.mubr.bf16.mxu0 %v1777_v48  ;;  %v4630_v40 = vadd.f32 %v4429_v52, %v3682_v58  ;;  %v4634_v39 = vadd.f32 %v4436_v13, %v3713_v23 }
 0x212   :  { %v4636_v12 = vpop.eup %3224  ;;  %3230 = vtanh.f32 %v1320_v5  ;;  %2428 = vmatmul.mubr.bf16.gmra.mrb[8].mxu0 %v1776_v43  ;;  %v1024_v50 = vmul.f32 %v924_v8, %v4613_v57  ;;  %v925_v34 = vmul.f32 %v4624_v20, %v4624_v20  ;;  %v1493_v15 = vadd.f32 1.0, %v4526_v26 }
 0x213   :  { %3232 = vtanh.f32 %v1321_v6  ;;  %v928_v52 = vmul.f32 %v4630_v40, %v4630_v40  ;;  %v929_v35 = vmul.f32 %v4634_v39, %v4634_v39  ;;  %v1497_v13 = vadd.f32 1.0, %v4539_v49  ;;  %v4647_v54 = vpop.f32.mrb[100].mxu1 }
 0x214   :  { %4998 = vst [vmem:[#allocation18_spill] sm:$0xff] %v4647_v54  ;;  %v1124_v42 = vmul.f32 0.044715, %v1024_v50  ;;  %v1025_v10 = vmul.f32 %v925_v34, %v4624_v20  ;;  %v1593_v46 = vmul.f32 0.5, %v1493_v15  ;;  %v1492_v61 = vadd.f32 1.0, %v4519_v47  ;;  %v4651_v51 = vpop.f32.mrb[101].mxu1 }
 0x215   :  { %4999 = vst [vmem:[#allocation19_spill] sm:$0xff] %v4651_v51  ;;  %v1028_v26 = vmul.f32 %v928_v52, %v4630_v40  ;;  %v1029_v19 = vmul.f32 %v929_v35, %v4634_v39  ;;  %v1597_v48 = vmul.f32 0.5, %v1497_v13  ;;  %v1496_v5 = vadd.f32 1.0, %v4536_v24  ;;  %v863_v43 = vpop.f32.mrb[102].mxu1 }
 0x216   :  { %v1224_v49 = vadd.f32 %v1124_v42, %v4613_v57  ;;  %v1125_v8 = vmul.f32 0.044715, %v1025_v10  ;;  %v1693_v6 = vmul.f32 %v1593_v46, %v4391_v56  ;;  %v1592_v50 = vmul.f32 0.5, %v1492_v61  ;;  %v864_v34 = vpop.f32.mrb[103].mxu1 }
 0x217   :  { %v1128_v15 = vmul.f32 0.044715, %v1028_v26  ;;  %v1129_v54 = vmul.f32 0.044715, %v1029_v19  ;;  %v1697_v47 = vmul.f32 %v1597_v48, %v4412_v28  ;;  %v1596_v51 = vmul.f32 0.5, %v1496_v5 }
 0x218   :  { %v1324_v44 = vmul.f32 0.7978846, %v1224_v49  ;;  %v1225_v52 = vadd.f32 %v1125_v8, %v4624_v20  ;;  %v1692_v35 = vmul.f32 %v1592_v50, %v4387_v3  ;;  %v4663_v24 = vadd.f32 %v4457_v14, %v3682_v58 }
 0x219   :  { %v4665_v13 = vpop.eup %3226  ;;  %v1228_v56 = vadd.f32 %v1128_v15, %v4630_v40  ;;  %v1229_v42 = vadd.f32 %v1129_v54, %v4634_v39  ;;  %v1781_v10 = vpack.c.bf16 %v1697_v47, %v1693_v6  ;;  %v1696_v46 = vmul.f32 %v1596_v51, %v4408_v21 }
 0x21a   :  { %3234 = vtanh.f32 %v1324_v44  ;;  %v1325_v28 = vmul.f32 0.7978846, %v1225_v52  ;;  %v932_v61 = vmul.f32 %v4663_v24, %v4663_v24  ;;  %v4674_v3 = vadd.f32 %v4467_v0, %v3713_v23 }
 0x21b   :  { %v4676_v14 = vpop.eup %3228  ;;  %v1328_v26 = vmul.f32 0.7978846, %v1228_v56  ;;  %v1329_v19 = vmul.f32 0.7978846, %v1229_v42  ;;  %2437 = vmatprep.mubr.bf16.mxu0 %v1781_v10  ;;  %v1780_v48 = vpack.c.bf16 %v1696_v46, %v1692_v35  ;;  %v4680_v54 = vadd.f32 %v4472_v27, %v3682_v58 }
 0x21c   :  { %v4682_v21 = vpop.eup %3230  ;;  %3236 = vtanh.f32 %v1325_v28  ;;  %v1032_v44 = vmul.f32 %v932_v61, %v4663_v24  ;;  %v933_v51 = vmul.f32 %v4674_v3, %v4674_v3  ;;  %v4689_v0 = vadd.f32 %v4481_v4, %v3713_v23 }
 0x21d   :  { %v4691_v5 = vpop.eup %3232  ;;  %3238 = vtanh.f32 %v1328_v26  ;;  %2438 = vmatmul.mubr.bf16.gmra.mrb[12].mxu0 %v1780_v48  ;;  %v936_v27 = vmul.f32 %v4680_v54, %v4680_v54  ;;  %v1501_v43 = vadd.f32 1.0, %v4553_v53  ;;  %v1505_v49 = vadd.f32 1.0, %v4590_v63 }
 0x21e   :  { %3240 = vtanh.f32 %v1329_v19  ;;  %v1132_v8 = vmul.f32 0.044715, %v1032_v44  ;;  %v1033_v6 = vmul.f32 %v933_v51, %v4674_v3  ;;  %v937_v50 = vmul.f32 %v4689_v0, %v4689_v0 }
 0x21f   :  { %v1036_v4 = vmul.f32 %v936_v27, %v4680_v54  ;;  %v1601_v34 = vmul.f32 0.5, %v1501_v43  ;;  %v1605_v15 = vmul.f32 0.5, %v1505_v49  ;;  %v1500_v47 = vadd.f32 1.0, %v4543_v30 }
 0x220   :  { %v1232_v52 = vadd.f32 %v1132_v8, %v4663_v24  ;;  %v1133_v35 = vmul.f32 0.044715, %v1033_v6  ;;  %v1037_v53 = vmul.f32 %v937_v50, %v4689_v0  ;;  %v1504_v63 = vadd.f32 1.0, %v4581_v32 }
 0x221   :  { %v1136_v56 = vmul.f32 0.044715, %v1036_v4  ;;  %v1701_v42 = vmul.f32 %v1601_v34, %v4434_v31  ;;  %v1705_v10 = vmul.f32 %v1605_v15, %v4465_v22  ;;  %v1600_v46 = vmul.f32 0.5, %v1500_v47 }
 0x222   :  { %v1332_v28 = vmul.f32 0.7978846, %v1232_v52  ;;  %v1233_v61 = vadd.f32 %v1133_v35, %v4674_v3  ;;  %v1137_v26 = vmul.f32 0.044715, %v1037_v53  ;;  %v1604_v19 = vmul.f32 0.5, %v1504_v63 }
 0x223   :  { %v1236_v30 = vadd.f32 %v1136_v56, %v4680_v54  ;;  %v1785_v48 = vpack.c.bf16 %v1705_v10, %v1701_v42  ;;  %v1700_v44 = vmul.f32 %v1600_v46, %v4427_v33  ;;  %v4712_v51 = vadd.f32 %v4503_v9, %v3682_v58  ;;  %v5000_v9 = vld [vmem:[#allocation14_spill] sm:$0xff] }
 0x224   :  { %v4714_v32 = vpop.eup %3234  ;;  %3242 = vtanh.f32 %v1332_v28  ;;  %v1333_v31 = vmul.f32 0.7978846, %v1233_v61  ;;  %v1237_v22 = vadd.f32 %v1137_v26, %v4689_v0  ;;  %v1704_v27 = vmul.f32 %v1604_v19, %v4453_v60  ;;  %v5001_v60 = vld [vmem:[#allocation15_spill] sm:$0xff] }
 0x225   :  { %v1336_v43 = vmul.f32 0.7978846, %v1236_v30  ;;  %2447 = vmatprep.mubr.bf16.mxu0 %v1785_v48  ;;  %v940_v49 = vmul.f32 %v4712_v51, %v4712_v51  ;;  %v4722_v33 = vadd.f32 %v4512_v1, %v3713_v23  ;;  %v4726_v8 = vadd.f32 %v5000_v9, %v3682_v58 }
 0x226   :  { %v4728_v6 = vpop.eup %3236  ;;  %3244 = vtanh.f32 %v1333_v31  ;;  %v1337_v50 = vmul.f32 0.7978846, %v1237_v22  ;;  %v1784_v4 = vpack.c.bf16 %v1704_v27, %v1700_v44  ;;  %v4732_v34 = vadd.f32 %v5001_v60, %v3713_v23 }
 0x227   :  { %v4734_v15 = vpop.eup %3238  ;;  %3246 = vtanh.f32 %v1336_v43  ;;  %v1040_v47 = vmul.f32 %v940_v49, %v4712_v51  ;;  %v941_v1 = vmul.f32 %v4722_v33, %v4722_v33  ;;  %v944_v52 = vmul.f32 %v4726_v8, %v4726_v8 }
 0x228   :  { %v4741_v35 = vpop.eup %3240  ;;  %3248 = vtanh.f32 %v1337_v50  ;;  %2448 = vmatmul.mubr.bf16.gmra.mrb[16].mxu0 %v1784_v4  ;;  %v945_v53 = vmul.f32 %v4732_v34, %v4732_v34  ;;  %v1509_v63 = vadd.f32 1.0, %v4618_v59  ;;  %v1513_v56 = vadd.f32 1.0, %v4636_v12  ;;  %v5002_v50 = vld [vmem:[#allocation13_spill] sm:$0xff] }
 0x229   :  { %v1140_v42 = vmul.f32 0.044715, %v1040_v47  ;;  %v1041_v10 = vmul.f32 %v941_v1, %v4722_v33  ;;  %v1044_v46 = vmul.f32 %v944_v52, %v4726_v8  ;;  %v1508_v28 = vadd.f32 1.0, %v4602_v62 }
 0x22a   :  { %v1045_v61 = vmul.f32 %v945_v53, %v4732_v34  ;;  %v1609_v26 = vmul.f32 0.5, %v1509_v63  ;;  %v1613_v19 = vmul.f32 0.5, %v1513_v56  ;;  %v1512_v30 = vadd.f32 1.0, %v4626_v16 }
 0x22b   :  { %v1240_v48 = vadd.f32 %v1140_v42, %v4712_v51  ;;  %v1141_v44 = vmul.f32 0.044715, %v1041_v10  ;;  %v1144_v31 = vmul.f32 0.044715, %v1044_v46  ;;  %v1608_v59 = vmul.f32 0.5, %v1508_v28 }
 0x22c   :  { %v1145_v22 = vmul.f32 0.044715, %v1045_v61  ;;  %v1709_v12 = vmul.f32 %v1609_v26, %v4494_v7  ;;  %v1713_v27 = vmul.f32 %v1613_v19, %v4510_v17  ;;  %v1612_v43 = vmul.f32 0.5, %v1512_v30 }
 0x22d   :  { %v1340_v49 = vmul.f32 0.7978846, %v1240_v48  ;;  %v1241_v62 = vadd.f32 %v1141_v44, %v4722_v33  ;;  %v1244_v9 = vadd.f32 %v1144_v31, %v4726_v8  ;;  %v1708_v4 = vmul.f32 %v1608_v59, %v5002_v50 }
 0x22e   :  { %v4758_v60 = vpop.eup %3242  ;;  %v1245_v16 = vadd.f32 %v1145_v22, %v4732_v34  ;;  %v1789_v47 = vpack.c.bf16 %v1713_v27, %v1709_v12  ;;  %v1712_v1 = vmul.f32 %v1612_v43, %v4501_v36  ;;  %v4764_v7 = vadd.f32 %v4551_v25, %v3682_v58 }
 0x22f   :  { %3250 = vtanh.f32 %v1340_v49  ;;  %v1341_v17 = vmul.f32 0.7978846, %v1241_v62  ;;  %v1344_v52 = vmul.f32 0.7978846, %v1244_v9  ;;  %v4768_v53 = vadd.f32 %v4557_v55, %v3713_v23  ;;  %v5003_v55 = vld [vmem:[#allocation16_spill] sm:$0xff] }
 0x230   :  { %v4770_v63 = vpop.eup %3244  ;;  %v1345_v56 = vmul.f32 0.7978846, %v1245_v16  ;;  %2457 = vmatprep.mubr.bf16.mxu0 %v1789_v47  ;;  %v1788_v42 = vpack.c.bf16 %v1712_v1, %v1708_v4  ;;  %v948_v10 = vmul.f32 %v4764_v7, %v4764_v7  ;;  %v4776_v36 = vadd.f32 %v4565_v38, %v3682_v58 }
 0x231   :  { %v4778_v25 = vpop.eup %3246  ;;  %3252 = vtanh.f32 %v1341_v17  ;;  %v949_v46 = vmul.f32 %v4768_v53, %v4768_v53  ;;  %v4784_v28 = vadd.f32 %v5003_v55, %v3713_v23  ;;  %v1517_v61 = vadd.f32 1.0, %v4676_v14 }
 0x232   :  { %v4787_v26 = vpop.eup %3248  ;;  %3254 = vtanh.f32 %v1344_v52  ;;  %2458 = vmatmul.mubr.bf16.gmra.mrb[20].mxu0 %v1788_v42  ;;  %v1048_v19 = vmul.f32 %v948_v10, %v4764_v7  ;;  %v952_v38 = vmul.f32 %v4776_v36, %v4776_v36  ;;  %v1521_v30 = vadd.f32 1.0, %v4691_v5 }
 0x233   :  { %3256 = vtanh.f32 %v1345_v56  ;;  %v1049_v48 = vmul.f32 %v949_v46, %v4768_v53  ;;  %v953_v44 = vmul.f32 %v4784_v28, %v4784_v28  ;;  %v1617_v31 = vmul.f32 0.5, %v1517_v61 }
 0x234   :  { %v1148_v59 = vmul.f32 0.044715, %v1048_v19  ;;  %v1052_v14 = vmul.f32 %v952_v38, %v4776_v36  ;;  %v1621_v22 = vmul.f32 0.5, %v1521_v30  ;;  %v1516_v12 = vadd.f32 1.0, %v4665_v13 }
 0x235   :  { %v1149_v27 = vmul.f32 0.044715, %v1049_v48  ;;  %v1053_v43 = vmul.f32 %v953_v44, %v4784_v28  ;;  %v1717_v49 = vmul.f32 %v1617_v31, %v4563_v37  ;;  %v1520_v5 = vadd.f32 1.0, %v4682_v21  ;;  %v5004_v44 = vld [vmem:[#allocation17_spill] sm:$0xff] }
 0x236   :  { %v1248_v62 = vadd.f32 %v1148_v59, %v4764_v7  ;;  %v1152_v9 = vmul.f32 0.044715, %v1052_v14  ;;  %v1721_v50 = vmul.f32 %v1621_v22, %v4579_v18  ;;  %v1616_v4 = vmul.f32 0.5, %v1516_v12 }
 0x237   :  { %v1249_v16 = vadd.f32 %v1149_v27, %v4768_v53  ;;  %v1153_v47 = vmul.f32 0.044715, %v1053_v43  ;;  %v1620_v1 = vmul.f32 0.5, %v1520_v5  ;;  %v4806_v13 = vadd.f32 %v4597_v45, %v3682_v58 }
 0x238   :  { %v1348_v17 = vmul.f32 0.7978846, %v1248_v62  ;;  %v1252_v52 = vadd.f32 %v1152_v9, %v4776_v36  ;;  %v1793_v37 = vpack.c.bf16 %v1721_v50, %v1717_v49  ;;  %v1716_v21 = vmul.f32 %v1616_v4, %v4549_v2 }
 0x239   :  { %v4810_v56 = vpop.eup %3250  ;;  %v1349_v42 = vmul.f32 0.7978846, %v1249_v16  ;;  %v1253_v18 = vadd.f32 %v1153_v47, %v4784_v28  ;;  %v1720_v10 = vmul.f32 %v1620_v1, %v4570_v11  ;;  %v956_v46 = vmul.f32 %v4806_v13, %v4806_v13 }
 0x23a   :  { %3258 = vtanh.f32 %v1348_v17  ;;  %v1352_v55 = vmul.f32 0.7978846, %v1252_v52  ;;  %2467 = vmatprep.mubr.bf16.mxu0 %v1793_v37  ;;  %v4818_v45 = vadd.f32 %v4600_v41, %v3713_v23  ;;  %v4822_v2 = vadd.f32 %v4606_v29, %v3682_v58 }
 0x23b   :  { %v4824_v61 = vpop.eup %3252  ;;  %3260 = vtanh.f32 %v1349_v42  ;;  %v1353_v19 = vmul.f32 0.7978846, %v1253_v18  ;;  %v1792_v38 = vpack.c.bf16 %v1720_v10, %v1716_v21  ;;  %v1056_v11 = vmul.f32 %v956_v46, %v4806_v13  ;;  %v5005_v10 = vld [vmem:[#allocation18_spill] sm:$0xff] }
 0x23c   :  { %v4827_v30 = vpop.eup %3254  ;;  %3262 = vtanh.f32 %v1352_v55  ;;  %v957_v48 = vmul.f32 %v4818_v45, %v4818_v45  ;;  %v960_v41 = vmul.f32 %v4822_v2, %v4822_v2  ;;  %v4835_v29 = vadd.f32 %v5004_v44, %v3713_v23 }
 0x23d   :  { %v4837_v31 = vpop.eup %3256  ;;  %3264 = vtanh.f32 %v1353_v19  ;;  %2468 = vmatmul.mubr.bf16.gmra.mrb[24].mxu0 %v1792_v38  ;;  %v1156_v59 = vmul.f32 0.044715, %v1056_v11  ;;  %v1525_v14 = vadd.f32 1.0, %v4728_v6  ;;  %v1529_v22 = vadd.f32 1.0, %v4741_v35  ;;  %v5006_v38 = vld [vmem:[#allocation19_spill] sm:$0xff] }
 0x23e   :  { %v1057_v12 = vmul.f32 %v957_v48, %v4818_v45  ;;  %v1060_v27 = vmul.f32 %v960_v41, %v4822_v2  ;;  %v961_v43 = vmul.f32 %v4835_v29, %v4835_v29  ;;  %v1524_v49 = vadd.f32 1.0, %v4714_v32 }
 0x23f   :  { %v1256_v5 = vadd.f32 %v1156_v59, %v4806_v13  ;;  %v1625_v62 = vmul.f32 0.5, %v1525_v14  ;;  %v1629_v9 = vmul.f32 0.5, %v1529_v22  ;;  %v1528_v50 = vadd.f32 1.0, %v4734_v15 }
 0x240   :  { %v1157_v4 = vmul.f32 0.044715, %v1057_v12  ;;  %v1160_v16 = vmul.f32 0.044715, %v1060_v27  ;;  %v1061_v6 = vmul.f32 %v961_v43, %v4835_v29  ;;  %v1624_v35 = vmul.f32 0.5, %v1524_v49 }
 0x241   :  { %v1356_v47 = vmul.f32 0.7978846, %v1256_v5  ;;  %v1725_v1 = vmul.f32 %v1625_v62, %v4624_v20  ;;  %v1729_v17 = vmul.f32 %v1629_v9, %v4634_v39  ;;  %v1628_v52 = vmul.f32 0.5, %v1528_v50 }
 0x242   :  { %v1257_v37 = vadd.f32 %v1157_v4, %v4818_v45  ;;  %v1260_v32 = vadd.f32 %v1160_v16, %v4822_v2  ;;  %v1161_v21 = vmul.f32 0.044715, %v1061_v6  ;;  %v1724_v42 = vmul.f32 %v1624_v35, %v4613_v57 }
 0x243   :  { %3266 = vtanh.f32 %v1356_v47  ;;  %v1797_v15 = vpack.c.bf16 %v1729_v17, %v1725_v1  ;;  %v1728_v18 = vmul.f32 %v1628_v52, %v4630_v40  ;;  %v4857_v46 = vadd.f32 %v5005_v10, %v3682_v58 }
 0x244   :  { %v3259_v55 = vpop.eup %3258  ;;  %v1357_v20 = vmul.f32 0.7978846, %v1257_v37  ;;  %v1360_v19 = vmul.f32 0.7978846, %v1260_v32  ;;  %v1261_v39 = vadd.f32 %v1161_v21, %v4835_v29  ;;  %v4862_v11 = vadd.f32 %v5006_v38, %v3713_v23 }
 0x245   :  { %v3261_v48 = vpop.eup %3260  ;;  %2477 = vmatprep.mubr.bf16.mxu0 %v1797_v15  ;;  %v1796_v57 = vpack.c.bf16 %v1728_v18, %v1724_v42  ;;  %v964_v41 = vmul.f32 %v4857_v46, %v4857_v46  ;;  %v1533_v40 = vadd.f32 1.0, %v4770_v63  ;;  %v1537_v58 = vadd.f32 1.0, %v4787_v26 }
 0x246   :  { %v3263_v44 = vpop.eup %3262  ;;  %3268 = vtanh.f32 %v1357_v20  ;;  %v1361_v59 = vmul.f32 0.7978846, %v1261_v39  ;;  %v965_v14 = vmul.f32 %v4862_v11, %v4862_v11  ;;  %v1532_v22 = vadd.f32 1.0, %v4758_v60 }
 0x247   :  { %v3265_v23 = vpop.eup %3264  ;;  %3270 = vtanh.f32 %v1360_v19  ;;  %2478 = vmatmul.mubr.bf16.gmra.mrb[28].mxu0 %v1796_v57  ;;  %v1064_v12 = vmul.f32 %v964_v41, %v4857_v46  ;;  %v1633_v27 = vmul.f32 0.5, %v1533_v40  ;;  %v1637_v43 = vmul.f32 0.5, %v1537_v58 }
 0x248   :  { %3272 = vtanh.f32 %v1361_v59  ;;  %v1065_v63 = vmul.f32 %v965_v14, %v4862_v11  ;;  %v1536_v26 = vadd.f32 1.0, %v4778_v25  ;;  %v1632_v49 = vmul.f32 0.5, %v1532_v22 }
 0x249   :  { %v1164_v5 = vmul.f32 0.044715, %v1064_v12  ;;  %v1733_v62 = vmul.f32 %v1633_v27, %v4674_v3  ;;  %v1737_v9 = vmul.f32 %v1637_v43, %v4689_v0  ;;  %v1541_v60 = vadd.f32 1.0, %v4824_v61 }
 0x24a   :  { %v1165_v50 = vmul.f32 0.044715, %v1065_v63  ;;  %v1636_v4 = vmul.f32 0.5, %v1536_v26  ;;  %v1732_v16 = vmul.f32 %v1632_v49, %v4663_v24  ;;  %v1545_v6 = vadd.f32 1.0, %v4837_v31 }
 0x24b   :  { %v1264_v35 = vadd.f32 %v1164_v5, %v4857_v46  ;;  %v1801_v47 = vpack.c.bf16 %v1737_v9, %v1733_v62  ;;  %v1641_v1 = vmul.f32 0.5, %v1541_v60  ;;  %v1540_v25 = vadd.f32 1.0, %v4810_v56 }
 0x24c   :  { %v1265_v17 = vadd.f32 %v1165_v50, %v4862_v11  ;;  %v1736_v3 = vmul.f32 %v1636_v4, %v4680_v54  ;;  %v1645_v52 = vmul.f32 0.5, %v1545_v6  ;;  %v1544_v0 = vadd.f32 1.0, %v4827_v30 }
 0x24d   :  { %v3267_v61 = vpop.eup %3266  ;;  %2487 = vmatprep.mubr.bf16.mxu0 %v1801_v47  ;;  %v1741_v37 = vmul.f32 %v1641_v1, %v4722_v33  ;;  %v1640_v24 = vmul.f32 0.5, %v1540_v25  ;;  %v1549_v32 = vadd.f32 1.0, %v3261_v48  ;;  %v1364_v18 = vmul.f32 0.7978846, %v1264_v35  ;;  %v1882_v25 = vld [vmem:[%s4984_s4] sm:$0x3] }
 0x24e   :  { %v1365_v31 = vmul.f32 0.7978846, %v1265_v17  ;;  %v1800_v21 = vpack.c.bf16 %v1736_v3, %v1732_v16  ;;  %v1745_v42 = vmul.f32 %v1645_v52, %v4732_v34  ;;  %v1644_v15 = vmul.f32 0.5, %v1544_v0  ;;  %s3429_s4 = smov [#allocation8]  }
 0x24f   :  { %v1740_v56 = vmul.f32 %v1640_v24, %v4712_v51  ;;  %v1553_v10 = vadd.f32 1.0, %v3265_v23  ;;  %v1649_v20 = vmul.f32 0.5, %v1549_v32  ;;  %v1548_v39 = vadd.f32 1.0, %v3259_v55  ;;  %s2641_s10 = sshll.u32 %s3429_s4, 4  ;;  %s2642_s10 = int_to_ptr.vmem [resolvable:$true] %s2641_s10 }
 0x250   :  { %v3269_v54 = vpop.eup %3268  ;;  %3274 = vtanh.f32 %v1365_v31  ;;  %2488 = vmatmul.mubr.bf16.gmra.mrb[32].mxu0 %v1800_v21  ;;  %v1805_v30 = vpack.c.bf16 %v1745_v42, %v1741_v37  ;;  %v1744_v19 = vmul.f32 %v1644_v15, %v4726_v8  ;;  %v1552_v57 = vadd.f32 1.0, %v3263_v44  ;;  %v3278_v31 = vld [vmem:[#allocation2] sm:$0xff]  ;;  %s3394_s11 = scalar_lea.vmem %s2642_s10, 6400  ;;  %p3399_p11 = scmp.lt.s32.totalorder %s2642_s10, %s2642_s10 }
 0x251   :  { %v3271_v33 = vpop.eup %3270  ;;  %v1653_v38 = vmul.f32 0.5, %v1553_v10  ;;  %v1749_v48 = vmul.f32 %v1649_v20, %v4768_v53  ;;  %v1557_v41 = vadd.f32 1.0, %v3269_v54  ;;  %v1648_v58 = vmul.f32 0.5, %v1548_v39  ;;  %v3280_v20 = vld [vmem:[#allocation2 + $0x10] sm:$0xff]  ;;  %p3395_p10 = scmp.ne.s32.totalorder %s2642_s10, %s3394_s11  ;;  %p3400_p12 = scmp.lt.s32.totalorder %s3394_s11, %s3394_s11 }
 0x252   :  { %v3273_v34 = vpop.eup %3272  ;;  %2497 = vmatprep.mubr.bf16.mxu0 %v1805_v30  ;;  %v1804_v40 = vpack.c.bf16 %v1744_v19, %v1740_v56  ;;  %v1556_v51 = vadd.f32 1.0, %v3267_v61  ;;  %v1560_v59 = vadd.f32 1.0, %v3271_v33  ;;  %v1652_v22 = vmul.f32 0.5, %v1552_v57  ;;  %v3281_v30 = vld [vmem:[#allocation2 + $0x18] sm:$0xff] }
 0x253   :  { %v1753_v14 = vmul.f32 %v1653_v38, %v4784_v28  ;;  %v1561_v23 = vadd.f32 1.0, %v3273_v34  ;;  %v1657_v12 = vmul.f32 0.5, %v1557_v41  ;;  %3276 = vtanh.f32 %v1364_v18  ;;  %v3279_v18 = vld [vmem:[#allocation2 + $0x8] sm:$0xff]  ;;  %v3282_v41 = vld [vmem:[#allocation2 + $0x20] sm:$0xff]  ;;  %p3401_p13 = por %p3400_p12, %p3399_p11 }
 0x254   :  { %v1656_v8 = vmul.f32 0.5, %v1556_v51  ;;  %v1660_v55 = vmul.f32 0.5, %v1560_v59  ;;  %v1748_v43 = vmul.f32 %v1648_v58, %v4764_v7  ;;  %v1752_v53 = vmul.f32 %v1652_v22, %v4776_v36  ;;  %v3283_v51 = vld [vmem:[#allocation2 + $0x28] sm:$0xff]  ;;  %v3284_v22 = vld [vmem:[#allocation2 + $0x30] sm:$0xff] }
 0x255   :  { %v1809_v27 = vpack.c.bf16 %v1753_v14, %v1749_v48  ;;  %v1661_v44 = vmul.f32 0.5, %v1561_v23  ;;  %v1757_v5 = vmul.f32 %v1657_v12, %v4818_v45  ;;  %v3285_v12 = vld [vmem:[#allocation2 + $0x38] sm:$0xff]  ;;  %p3402_p0 = pnand %p3401_p13, %p3395_p10 }
 0x256   :  { %v1756_v63 = vmul.f32 %v1656_v8, %v4806_v13  ;;  %v1760_v26 = vmul.f32 %v1660_v55, %v4822_v2  ;;  %v1808_v49 = vpack.c.bf16 %v1752_v53, %v1748_v43 }
 0x257   :  { %v1761_v28 = vmul.f32 %v1661_v44, %v4835_v29 }
 0x258   :  { %2498 = vmatmul.mubr.bf16.gmra.mrb[36].mxu0 %v1804_v40  ;;  %v1812_v62 = vpack.c.bf16 %v1760_v26, %v1756_v63  ;;  %v3286_v63 = vld [vmem:[#allocation2 + $0x40] sm:$0xff] }
 0x259   :  { %2507 = vmatprep.mubr.bf16.mxu0 %v1809_v27  ;;  %v1813_v9 = vpack.c.bf16 %v1761_v28, %v1757_v5  ;;  %v3287_v28 = vld [vmem:[#allocation2 + $0x48] sm:$0xff] }
 0x25a   :  { %v3275_v60 = vpop.eup %3274 }
 0x25b   :  { %v1565_v50 = vadd.f32 1.0, %v3275_v60  ;;  %v3288_v60 = vld [vmem:[#allocation2 + $0x50] sm:$0xff] }
 0x25d   :  { %v1665_v4 = vmul.f32 0.5, %v1565_v50  ;;  %v3277_v7 = vpop.eup %3276 }
 0x25e   :  { %v1564_v13 = vadd.f32 1.0, %v3277_v7 }
 0x25f   :  { %v1765_v36 = vmul.f32 %v1665_v4, %v4862_v11  ;;  %v5007_v11 = vld [vmem:[#allocation12_spill] sm:$0xff]  ;;  %v3289_v4 = vld [vmem:[#allocation2 + $0x58] sm:$0xff] }
 0x260   :  { %2508 = vmatmul.mubr.bf16.gmra.mrb[40].mxu0 %v1808_v49  ;;  %v1664_v2 = vmul.f32 0.5, %v1564_v13  ;;  %v5008_v17 = vsub.s32 0, %v5007_v11  ;;  %v5009_v52 = vsub.s32 1, %v5007_v11  ;;  %v3291_v11 = vld [vmem:[#allocation2 + $0x68] sm:$0xff] }
 0x261   :  { %2517 = vmatprep.mubr.bf16.mxu0 %v1813_v9  ;;  %v1817_v16 = vpack.c.bf16 %v1765_v36, %v1765_v36 }
 0x262   :  { %v1764_v45 = vmul.f32 %v1664_v2, %v4857_v46  ;;  %v4907_v3 = vrot.slane %v1882_v25, %v5008_v17  ;;  %v4911_v0 = vrot.slane %v1882_v25, %v5009_v52 }
 0x264   :  { %v1816_v29 = vpack.c.bf16 %v1764_v45, %v1764_v45 }
 0x268   :  { %2518 = vmatmul.mubr.bf16.gmra.mrb[44].mxu0 %v1812_v62 }
 0x269   :  { %2527 = vmatprep.mubr.bf16.mxu0 %v1817_v16 }
 0x270   :  { %2528 = vmatmul.mubr.bf16.gmra.mrb[52].mxu0 %v1816_v29  ;;  %v3290_v29 = vld [vmem:[#allocation2 + $0x60] sm:$0xff] }
 0x2c8   :  { %v4898_v6 = vpop.f32.mrb[48].mxu0 }
 0x2c9   :  { %v4900_v35 = vpop.f32.mrb[49].mxu0 }
 0x2ca   :  { %v2372_v47 = vpop.f32.mrb[50].mxu0 }
 0x2cb   :  { %v2373_v1 = vpop.f32.mrb[51].mxu0 }
 0x2d4   :  { %v2409_v46 = vpop.f32.mrb[0].mxu0 }
 0x2d5   :  { %v2782_v61 = vadd.f32 %v2409_v46, %v4907_v3  ;;  %v2411_v37 = vpop.f32.mrb[1].mxu0  ;;  %v3292_v46 = vld [vmem:[#allocation2 + $0x70] sm:$0xff] }
 0x2d6   :  { %v2783_v24 = vadd.f32 %v2411_v37, %v4911_v0  ;;  %v2413_v32 = vpop.f32.mrb[2].mxu0  ;;  %v3293_v37 = vld [vmem:[#allocation2 + $0x78] sm:$0xff] }
 0x2d7   :  { %v2536_v21 = vadd.f32 %v3278_v31, %v2782_v61  ;;  %v2784_v42 = vadd.f32 %v2413_v32, %v4907_v3  ;;  %v2415_v15 = vpop.f32.mrb[3].mxu0 }
 0x2d8   :  { %v2537_v56 = vadd.f32 %v3279_v18, %v2783_v24  ;;  %v2785_v10 = vadd.f32 %v2415_v15, %v4911_v0  ;;  %v3294_v18 = vld [vmem:[#allocation2 + $0x80] sm:$0xff] }
 0x2d9   :  { %2586 = vst [vmem:[#allocation8] sm:$0xff] %v2536_v21  ;;  %v2538_v54 = vadd.f32 %v3280_v20, %v2784_v42 }
 0x2da   :  { %2587 = vst [vmem:[#allocation8 + $0x8] sm:$0xff] %v2537_v56  ;;  %v2539_v19 = vadd.f32 %v3281_v30, %v2785_v10 }
 0x2db   :  { %2588 = vst [vmem:[#allocation8 + $0x10] sm:$0xff] %v2538_v54  ;;  %v3295_v54 = vld [vmem:[#allocation2 + $0x88] sm:$0xff] }
 0x2dc   :  { %2589 = vst [vmem:[#allocation8 + $0x18] sm:$0xff] %v2539_v19 }
 0x2dd   :  { %v2419_v39 = vpop.f32.mrb[4].mxu0 }
 0x2de   :  { %v2786_v33 = vadd.f32 %v2419_v39, %v4907_v3  ;;  %v2421_v38 = vpop.f32.mrb[5].mxu0  ;;  %v3296_v39 = vld [vmem:[#allocation2 + $0x90] sm:$0xff] }
 0x2df   :  { %v2787_v48 = vadd.f32 %v2421_v38, %v4911_v0  ;;  %v2423_v57 = vpop.f32.mrb[6].mxu0  ;;  %v3297_v38 = vld [vmem:[#allocation2 + $0x98] sm:$0xff] }
 0x2e0   :  { %v2540_v34 = vadd.f32 %v3282_v41, %v2786_v33  ;;  %v2788_v40 = vadd.f32 %v2423_v57, %v4907_v3  ;;  %v2425_v58 = vpop.f32.mrb[7].mxu0 }
 0x2e1   :  { %v2541_v59 = vadd.f32 %v3283_v51, %v2787_v48  ;;  %v2789_v14 = vadd.f32 %v2425_v58, %v4911_v0  ;;  %v3298_v51 = vld [vmem:[#allocation2 + $0xa0] sm:$0xff] }
 0x2e2   :  { %2590 = vst [vmem:[#allocation8 + $0x20] sm:$0xff] %v2540_v34  ;;  %v2542_v23 = vadd.f32 %v3284_v22, %v2788_v40 }
 0x2e3   :  { %2591 = vst [vmem:[#allocation8 + $0x28] sm:$0xff] %v2541_v59  ;;  %v2543_v8 = vadd.f32 %v3285_v12, %v2789_v14 }
 0x2e4   :  { %2592 = vst [vmem:[#allocation8 + $0x30] sm:$0xff] %v2542_v23  ;;  %v3299_v23 = vld [vmem:[#allocation2 + $0xa8] sm:$0xff] }
 0x2e5   :  { %2593 = vst [vmem:[#allocation8 + $0x38] sm:$0xff] %v2543_v8  ;;  %v2429_v55 = vpop.f32.mrb[8].mxu0 }
 0x2e6   :  { %v2790_v27 = vadd.f32 %v2429_v55, %v4907_v3  ;;  %v2431_v43 = vpop.f32.mrb[9].mxu0  ;;  %v3300_v55 = vld [vmem:[#allocation2 + $0xb0] sm:$0xff] }
 0x2e7   :  { %v2791_v53 = vadd.f32 %v2431_v43, %v4911_v0  ;;  %v2433_v44 = vpop.f32.mrb[10].mxu0  ;;  %v3301_v43 = vld [vmem:[#allocation2 + $0xb8] sm:$0xff] }
 0x2e8   :  { %v2544_v26 = vadd.f32 %v3286_v63, %v2790_v27  ;;  %v2792_v49 = vadd.f32 %v2433_v44, %v4907_v3  ;;  %v2435_v5 = vpop.f32.mrb[11].mxu0 }
 0x2e9   :  { %v2545_v62 = vadd.f32 %v3287_v28, %v2791_v53  ;;  %v2793_v9 = vadd.f32 %v2435_v5, %v4911_v0  ;;  %v3302_v28 = vld [vmem:[#allocation2 + $0xc0] sm:$0xff] }
 0x2ea   :  { %2594 = vst [vmem:[#allocation8 + $0x40] sm:$0xff] %v2544_v26  ;;  %v2546_v50 = vadd.f32 %v3288_v60, %v2792_v49 }
 0x2eb   :  { %2595 = vst [vmem:[#allocation8 + $0x48] sm:$0xff] %v2545_v62  ;;  %v2547_v7 = vadd.f32 %v3289_v4, %v2793_v9 }
 0x2ec   :  { %2596 = vst [vmem:[#allocation8 + $0x50] sm:$0xff] %v2546_v50  ;;  %v3303_v50 = vld [vmem:[#allocation2 + $0xc8] sm:$0xff] }
 0x2ed   :  { %2597 = vst [vmem:[#allocation8 + $0x58] sm:$0xff] %v2547_v7 }
 0x2f0   :  { %v2439_v36 = vpop.f32.mrb[12].mxu0 }
 0x2f1   :  { %v2794_v13 = vadd.f32 %v2439_v36, %v4907_v3  ;;  %v2441_v16 = vpop.f32.mrb[13].mxu0  ;;  %v3304_v36 = vld [vmem:[#allocation2 + $0xd0] sm:$0xff] }
 0x2f2   :  { %v2795_v2 = vadd.f32 %v2441_v16, %v4911_v0  ;;  %v2443_v45 = vpop.f32.mrb[14].mxu0  ;;  %v3305_v16 = vld [vmem:[#allocation2 + $0xd8] sm:$0xff] }
 0x2f3   :  { %v2548_v47 = vadd.f32 %v3290_v29, %v2794_v13  ;;  %v2796_v1 = vadd.f32 %v2443_v45, %v4907_v3  ;;  %v2445_v25 = vpop.f32.mrb[15].mxu0 }
 0x2f4   :  { %v2549_v17 = vadd.f32 %v3291_v11, %v2795_v2  ;;  %v2797_v52 = vadd.f32 %v2445_v25, %v4911_v0  ;;  %v3306_v11 = vld [vmem:[#allocation2 + $0xe0] sm:$0xff] }
 0x2f5   :  { %2598 = vst [vmem:[#allocation8 + $0x60] sm:$0xff] %v2548_v47  ;;  %v2550_v61 = vadd.f32 %v3292_v46, %v2796_v1 }
 0x2f6   :  { %2599 = vst [vmem:[#allocation8 + $0x68] sm:$0xff] %v2549_v17  ;;  %v2551_v24 = vadd.f32 %v3293_v37, %v2797_v52 }
 0x2f7   :  { %2600 = vst [vmem:[#allocation8 + $0x70] sm:$0xff] %v2550_v61  ;;  %v3307_v61 = vld [vmem:[#allocation2 + $0xe8] sm:$0xff] }
 0x2f8   :  { %2601 = vst [vmem:[#allocation8 + $0x78] sm:$0xff] %v2551_v24 }
 0x2fb   :  { %v2449_v32 = vpop.f32.mrb[16].mxu0 }
 0x2fc   :  { %v2798_v31 = vadd.f32 %v2449_v32, %v4907_v3  ;;  %v2451_v21 = vpop.f32.mrb[17].mxu0  ;;  %v3308_v32 = vld [vmem:[#allocation2 + $0xf0] sm:$0xff] }
 0x2fd   :  { %v2799_v42 = vadd.f32 %v2451_v21, %v4911_v0  ;;  %v2453_v15 = vpop.f32.mrb[18].mxu0  ;;  %v3309_v21 = vld [vmem:[#allocation2 + $0xf8] sm:$0xff] }
 0x2fe   :  { %v2552_v56 = vadd.f32 %v3294_v18, %v2798_v31  ;;  %v2800_v10 = vadd.f32 %v2453_v15, %v4907_v3  ;;  %v2455_v20 = vpop.f32.mrb[19].mxu0 }
 0x2ff   :  { %v2553_v30 = vadd.f32 %v3295_v54, %v2799_v42  ;;  %v2801_v19 = vadd.f32 %v2455_v20, %v4911_v0  ;;  %v3310_v54 = vld [vmem:[#allocation2 + $0x100] sm:$0xff] }
 0x300   :  { %2602 = vst [vmem:[#allocation8 + $0x80] sm:$0xff] %v2552_v56  ;;  %v2554_v33 = vadd.f32 %v3296_v39, %v2800_v10 }
 0x301   :  { %2603 = vst [vmem:[#allocation8 + $0x88] sm:$0xff] %v2553_v30  ;;  %v2555_v48 = vadd.f32 %v3297_v38, %v2801_v19 }
 0x302   :  { %2604 = vst [vmem:[#allocation8 + $0x90] sm:$0xff] %v2554_v33  ;;  %v3311_v33 = vld [vmem:[#allocation2 + $0x108] sm:$0xff] }
 0x303   :  { %2605 = vst [vmem:[#allocation8 + $0x98] sm:$0xff] %v2555_v48 }
 0x305   :  { %v2459_v57 = vpop.f32.mrb[20].mxu0 }
 0x306   :  { %v2802_v41 = vadd.f32 %v2459_v57, %v4907_v3  ;;  %v2461_v34 = vpop.f32.mrb[21].mxu0  ;;  %v3312_v57 = vld [vmem:[#allocation2 + $0x110] sm:$0xff] }
 0x307   :  { %v2803_v40 = vadd.f32 %v2461_v34, %v4911_v0  ;;  %v2463_v58 = vpop.f32.mrb[22].mxu0  ;;  %v3313_v34 = vld [vmem:[#allocation2 + $0x118] sm:$0xff] }
 0x308   :  { %v2556_v59 = vadd.f32 %v3298_v51, %v2802_v41  ;;  %v2804_v14 = vadd.f32 %v2463_v58, %v4907_v3  ;;  %v2465_v22 = vpop.f32.mrb[23].mxu0 }
 0x309   :  { %v2557_v12 = vadd.f32 %v3299_v23, %v2803_v40  ;;  %v2805_v8 = vadd.f32 %v2465_v22, %v4911_v0  ;;  %v3314_v23 = vld [vmem:[#allocation2 + $0x120] sm:$0xff] }
 0x30a   :  { %2606 = vst [vmem:[#allocation8 + $0xa0] sm:$0xff] %v2556_v59  ;;  %v2558_v27 = vadd.f32 %v3300_v55, %v2804_v14 }
 0x30b   :  { %2607 = vst [vmem:[#allocation8 + $0xa8] sm:$0xff] %v2557_v12  ;;  %v2559_v53 = vadd.f32 %v3301_v43, %v2805_v8 }
 0x30c   :  { %2608 = vst [vmem:[#allocation8 + $0xb0] sm:$0xff] %v2558_v27  ;;  %v3315_v27 = vld [vmem:[#allocation2 + $0x128] sm:$0xff] }
 0x30d   :  { %2609 = vst [vmem:[#allocation8 + $0xb8] sm:$0xff] %v2559_v53 }
 0x310   :  { %v2469_v44 = vpop.f32.mrb[24].mxu0 }
 0x311   :  { %v2806_v63 = vadd.f32 %v2469_v44, %v4907_v3  ;;  %v2471_v26 = vpop.f32.mrb[25].mxu0  ;;  %v3316_v44 = vld [vmem:[#allocation2 + $0x130] sm:$0xff] }
 0x312   :  { %v2807_v49 = vadd.f32 %v2471_v26, %v4911_v0  ;;  %v2473_v5 = vpop.f32.mrb[26].mxu0  ;;  %v3317_v26 = vld [vmem:[#allocation2 + $0x138] sm:$0xff] }
 0x313   :  { %v2560_v62 = vadd.f32 %v3302_v28, %v2806_v63  ;;  %v2808_v9 = vadd.f32 %v2473_v5, %v4907_v3  ;;  %v2475_v60 = vpop.f32.mrb[27].mxu0 }
 0x314   :  { %v2561_v4 = vadd.f32 %v3303_v50, %v2807_v49  ;;  %v2809_v7 = vadd.f32 %v2475_v60, %v4911_v0  ;;  %v3318_v50 = vld [vmem:[#allocation2 + $0x140] sm:$0xff] }
 0x315   :  { %2610 = vst [vmem:[#allocation8 + $0xc0] sm:$0xff] %v2560_v62  ;;  %v2562_v13 = vadd.f32 %v3304_v36, %v2808_v9 }
 0x316   :  { %2611 = vst [vmem:[#allocation8 + $0xc8] sm:$0xff] %v2561_v4  ;;  %v2563_v2 = vadd.f32 %v3305_v16, %v2809_v7 }
 0x317   :  { %2612 = vst [vmem:[#allocation8 + $0xd0] sm:$0xff] %v2562_v13  ;;  %v3319_v13 = vld [vmem:[#allocation2 + $0x148] sm:$0xff] }
 0x318   :  { %2613 = vst [vmem:[#allocation8 + $0xd8] sm:$0xff] %v2563_v2 }
 0x31a   :  { %v2479_v45 = vpop.f32.mrb[28].mxu0 }
 0x31b   :  { %v2810_v29 = vadd.f32 %v2479_v45, %v4907_v3  ;;  %v2481_v47 = vpop.f32.mrb[29].mxu0  ;;  %v3320_v45 = vld [vmem:[#allocation2 + $0x150] sm:$0xff] }
 0x31c   :  { %v2811_v1 = vadd.f32 %v2481_v47, %v4911_v0  ;;  %v2483_v25 = vpop.f32.mrb[30].mxu0  ;;  %v3321_v47 = vld [vmem:[#allocation2 + $0x158] sm:$0xff] }
 0x31d   :  { %v2564_v17 = vadd.f32 %v3306_v11, %v2810_v29  ;;  %v2812_v52 = vadd.f32 %v2483_v25, %v4907_v3  ;;  %v2485_v46 = vpop.f32.mrb[31].mxu0 }
 0x31e   :  { %v2565_v37 = vadd.f32 %v3307_v61, %v2811_v1  ;;  %v2813_v24 = vadd.f32 %v2485_v46, %v4911_v0  ;;  %v3322_v61 = vld [vmem:[#allocation2 + $0x160] sm:$0xff] }
 0x31f   :  { %2614 = vst [vmem:[#allocation8 + $0xe0] sm:$0xff] %v2564_v17  ;;  %v2566_v31 = vadd.f32 %v3308_v32, %v2812_v52 }
 0x320   :  { %2615 = vst [vmem:[#allocation8 + $0xe8] sm:$0xff] %v2565_v37  ;;  %v2567_v42 = vadd.f32 %v3309_v21, %v2813_v24 }
 0x321   :  { %2616 = vst [vmem:[#allocation8 + $0xf0] sm:$0xff] %v2566_v31  ;;  %v3323_v31 = vld [vmem:[#allocation2 + $0x168] sm:$0xff] }
 0x322   :  { %2617 = vst [vmem:[#allocation8 + $0xf8] sm:$0xff] %v2567_v42 }
 0x323   :  { %v2489_v15 = vpop.f32.mrb[32].mxu0 }
 0x324   :  { %v2814_v18 = vadd.f32 %v2489_v15, %v4907_v3  ;;  %v2491_v56 = vpop.f32.mrb[33].mxu0  ;;  %v3324_v15 = vld [vmem:[#allocation2 + $0x170] sm:$0xff] }
 0x325   :  { %v2815_v10 = vadd.f32 %v2491_v56, %v4911_v0  ;;  %v2493_v20 = vpop.f32.mrb[34].mxu0  ;;  %v3325_v56 = vld [vmem:[#allocation2 + $0x178] sm:$0xff] }
 0x326   :  { %v2568_v30 = vadd.f32 %v3310_v54, %v2814_v18  ;;  %v2816_v19 = vadd.f32 %v2493_v20, %v4907_v3  ;;  %v2495_v39 = vpop.f32.mrb[35].mxu0  ;;  %v2369_v20 = vadd.f32 %v4898_v6, %v4907_v3  ;;  %v2371_v54 = vadd.f32 %v4900_v35, %v4911_v0 }
 0x327   :  { %v2569_v38 = vadd.f32 %v3311_v33, %v2815_v10  ;;  %v2817_v48 = vadd.f32 %v2495_v39, %v4911_v0 }
 0x328   :  { %2618 = vst [vmem:[#allocation8 + $0x100] sm:$0xff] %v2568_v30  ;;  %v2570_v41 = vadd.f32 %v3312_v57, %v2816_v19 }
 0x329   :  { %2619 = vst [vmem:[#allocation8 + $0x108] sm:$0xff] %v2569_v38  ;;  %v2571_v40 = vadd.f32 %v3313_v34, %v2817_v48  ;;  %v3326_v48 = vld [vmem:[#allocation2 + $0x180] sm:$0xff]  ;;  %v3327_v34 = vld [vmem:[#allocation2 + $0x188] sm:$0xff] }
 0x32a   :  { %2620 = vst [vmem:[#allocation8 + $0x110] sm:$0xff] %v2570_v41 }
 0x32b   :  { %2621 = vst [vmem:[#allocation8 + $0x118] sm:$0xff] %v2571_v40  ;;  %v2499_v58 = vpop.f32.mrb[36].mxu0 }
 0x32c   :  { %v2818_v51 = vadd.f32 %v2499_v58, %v4907_v3  ;;  %v2501_v59 = vpop.f32.mrb[37].mxu0 }
 0x32d   :  { %v2819_v14 = vadd.f32 %v2501_v59, %v4911_v0  ;;  %v2503_v22 = vpop.f32.mrb[38].mxu0 }
 0x32e   :  { %v2572_v12 = vadd.f32 %v3314_v23, %v2818_v51  ;;  %v2820_v8 = vadd.f32 %v2503_v22, %v4907_v3  ;;  %v2505_v55 = vpop.f32.mrb[39].mxu0 }
 0x32f   :  { %v2573_v43 = vadd.f32 %v3315_v27, %v2819_v14  ;;  %v2821_v53 = vadd.f32 %v2505_v55, %v4911_v0 }
 0x330   :  { %2622 = vst [vmem:[#allocation8 + $0x120] sm:$0xff] %v2572_v12  ;;  %v2574_v63 = vadd.f32 %v3316_v44, %v2820_v8 }
 0x331   :  { %2623 = vst [vmem:[#allocation8 + $0x128] sm:$0xff] %v2573_v43  ;;  %v2575_v49 = vadd.f32 %v3317_v26, %v2821_v53 }
 0x332   :  { %2624 = vst [vmem:[#allocation8 + $0x130] sm:$0xff] %v2574_v63 }
 0x333   :  { %2625 = vst [vmem:[#allocation8 + $0x138] sm:$0xff] %v2575_v49  ;;  %v2509_v5 = vpop.f32.mrb[40].mxu0 }
 0x334   :  { %v2822_v28 = vadd.f32 %v2509_v5, %v4907_v3  ;;  %v2511_v62 = vpop.f32.mrb[41].mxu0 }
 0x335   :  { %v2823_v9 = vadd.f32 %v2511_v62, %v4911_v0  ;;  %v2513_v60 = vpop.f32.mrb[42].mxu0 }
 0x336   :  { %v2576_v4 = vadd.f32 %v3318_v50, %v2822_v28  ;;  %v2824_v7 = vadd.f32 %v2513_v60, %v4907_v3  ;;  %v2515_v36 = vpop.f32.mrb[43].mxu0 }
 0x337   :  { %v2577_v16 = vadd.f32 %v3319_v13, %v2823_v9  ;;  %v2825_v2 = vadd.f32 %v2515_v36, %v4911_v0 }
 0x338   :  { %2626 = vst [vmem:[#allocation8 + $0x140] sm:$0xff] %v2576_v4  ;;  %v2578_v29 = vadd.f32 %v3320_v45, %v2824_v7 }
 0x339   :  { %2627 = vst [vmem:[#allocation8 + $0x148] sm:$0xff] %v2577_v16  ;;  %v2579_v1 = vadd.f32 %v3321_v47, %v2825_v2 }
 0x33a   :  { %2628 = vst [vmem:[#allocation8 + $0x150] sm:$0xff] %v2578_v29 }
 0x33b   :  { %2629 = vst [vmem:[#allocation8 + $0x158] sm:$0xff] %v2579_v1  ;;  %v2519_v25 = vpop.f32.mrb[44].mxu0 }
 0x33c   :  { %v2826_v11 = vadd.f32 %v2519_v25, %v4907_v3  ;;  %v2521_v17 = vpop.f32.mrb[45].mxu0 }
 0x33d   :  { %v2827_v52 = vadd.f32 %v2521_v17, %v4911_v0  ;;  %v2523_v46 = vpop.f32.mrb[46].mxu0 }
 0x33e   :  { %v2580_v37 = vadd.f32 %v3322_v61, %v2826_v11  ;;  %v2828_v24 = vadd.f32 %v2523_v46, %v4907_v3  ;;  %v2525_v32 = vpop.f32.mrb[47].mxu0 }
 0x33f   :  { %v2581_v21 = vadd.f32 %v3323_v31, %v2827_v52  ;;  %v2829_v42 = vadd.f32 %v2525_v32, %v4911_v0 }
 0x340   :  { %2630 = vst [vmem:[#allocation8 + $0x160] sm:$0xff] %v2580_v37  ;;  %v2582_v18 = vadd.f32 %v3324_v15, %v2828_v24 }
 0x341   :  { %2631 = vst [vmem:[#allocation8 + $0x168] sm:$0xff] %v2581_v21  ;;  %v2583_v10 = vadd.f32 %v3325_v56, %v2829_v42 }
 0x342   :  { %2632 = vst [vmem:[#allocation8 + $0x170] sm:$0xff] %v2582_v18 }
 0x343   :  { %2633 = vst [vmem:[#allocation8 + $0x178] sm:$0xff] %v2583_v10  ;;  %v2529_v30 = vpop.f32.mrb[52].mxu0 }
 0x344   :  { %v2530_v19 = vadd.f32 %v2529_v30, %v2369_v20  ;;  %v2531_v39 = vpop.f32.mrb[53].mxu0 }
 0x345   :  { %v2532_v33 = vadd.f32 %v2531_v39, %v2371_v54  ;;  %v2533_v38 = vpop.f32.mrb[54].mxu0 }
 0x346   :  { %v2584_v57 = vadd.f32 %v3326_v48, %v2530_v19  ;;  %v2534_v41 = vpop.f32.mrb[55].mxu0 }
 0x347   :  { %v2585_v40 = vadd.f32 %v3327_v34, %v2532_v33 }
 0x348   :  { %2634 = vst [vmem:[#allocation8 + $0x180] sm:$0xff] %v2584_v57 }
 0x349   :  { %2635 = vst [vmem:[#allocation8 + $0x188] sm:$0xff] %v2585_v40 }
 0x34a   :  { %3405 = shalt.err (!%p3402_p0)
}
 0x34b   :  { %s3406_s14 = scalar_lea.hbm %s4985_s5, 6400 }
 0x34c   :  { %p3407_p1 = scmp.ne.s32.totalorder %s4985_s5, %s3406_s14  ;;  %p3410_p2 = scmp.lt.u32.totalorder %s3406_s14, %s4985_s5 }
 0x34e   :  { %p3412_p3 = pnand %p3410_p2, %p3407_p1 }
 0x350   :  { %3415 = shalt.err (!%p3412_p3)
}
 0x351   :  { %2647 = dma.vmem_to_hbm [thread:$0]  %s2642_s10, 6400, %s4985_s5, [#allocation4], %s3424_s30, %s3424_s30, %s3425_s6  }
 0x352   :  { %3420 = dma.done.wait [#allocation4], 6400  }
 0x353   :  { %3421 = vsyncadd [#allocation4], 4294960896 }
 0x354   :  { %2651 = vsyncpa [#allocation3], 1 }
 0x355   :  { %2652 = vsyncpa [#allocation6], 1 }
 0x356   :  { %2653 = vsyncpa [#allocation4], 1 }

</bundles_post_ra>
